<compile_context>
chip_gen: v5e
topology: v5e:2x2
jax: 0.10.0
libtpu: 0.0.40
codegen_flags: <defaults>
</compile_context>

<pallas_src>
import functools
import math

import jax
import jax.numpy as jnp
from jax.experimental import pallas as pl
from jax.experimental.pallas import tpu as pltpu


_VMEM_LIMIT = 48 * 1024 * 1024  # fits v7x (64 MiB physical) with headroom; fine on v5e/v6e
_CP_PAR = pltpu.CompilerParams(dimension_semantics=("parallel",),
                               vmem_limit_bytes=_VMEM_LIMIT)
_CP_SEQ = pltpu.CompilerParams(dimension_semantics=("arbitrary",),
                               vmem_limit_bytes=_VMEM_LIMIT)


def _mxu_dot(a, b):
    # bf16 operands on the MXU, f32 accumulation; epilogues stay f32.
    return jnp.dot(a.astype(jnp.bfloat16), b.astype(jnp.bfloat16),
                   preferred_element_type=jnp.float32)


def _row_tiles(M, target):
    """Row tile (multiple of 8 unless it equals M) and grid size."""
    tm = M if M <= target else max(8, (target // 8) * 8)
    return tm, pl.cdiv(M, tm)


# ----------------------- fused linear (+activation) kernel -----------------------
def _linear_kernel(x_ref, w_ref, b_ref, o_ref, *, act):
    y = _mxu_dot(x_ref[...], w_ref[...]) + b_ref[...]
    if act == "relu":
        y = jnp.maximum(y, 0.0)
    elif act == "tanh":
        y = jnp.tanh(y)
    o_ref[...] = y.astype(o_ref.dtype)


def linear(x, w, b, act="none", tile_m=512):
    M, K = x.shape
    N = w.shape[1]
    tm, gm = _row_tiles(M, tile_m)
    return pl.pallas_call(
        functools.partial(_linear_kernel, act=act),
        grid=(gm,),
        in_specs=[pl.BlockSpec((tm, K), lambda i: (i, 0)),
                  pl.BlockSpec((K, N), lambda i: (0, 0)),
                  pl.BlockSpec((1, N), lambda i: (0, 0))],
        out_specs=pl.BlockSpec((tm, N), lambda i: (i, 0)),
        out_shape=jax.ShapeDtypeStruct((M, N), jnp.float32),
        compiler_params=_CP_PAR,
    )(x, w, b.reshape(1, N))


# --------------------------------- layernorm --------------------------------------
def _layernorm_kernel(x_ref, g_ref, b_ref, o_ref):
    x = x_ref[...]
    mu = jnp.mean(x, axis=-1, keepdims=True)
    var = jnp.mean((x - mu) ** 2, axis=-1, keepdims=True)
    o_ref[...] = (x - mu) * jax.lax.rsqrt(var + 1e-12) * g_ref[...] + b_ref[...]


def layernorm(x, gamma, beta, tile_m=1024):
    M, H = x.shape
    tm, gm = _row_tiles(M, tile_m)
    return pl.pallas_call(
        _layernorm_kernel,
        grid=(gm,),
        in_specs=[pl.BlockSpec((tm, H), lambda i: (i, 0)),
                  pl.BlockSpec((1, H), lambda i: (0, 0)),
                  pl.BlockSpec((1, H), lambda i: (0, 0))],
        out_specs=pl.BlockSpec((tm, H), lambda i: (i, 0)),
        out_shape=jax.ShapeDtypeStruct((M, H), jnp.float32),
        compiler_params=_CP_PAR,
    )(x, gamma.reshape(1, H), beta.reshape(1, H))


# -------- fused QKV GEMM + attention + out-projection + residual + layernorm -------
def _attention_block_kernel(x_ref, bias_ref, wqkv_ref, bqkv_ref, wo_ref, bo_ref,
                            g_ref, be_ref, o_ref, *, nh, dh, H):
    Bb, T, _ = x_ref.shape
    x2 = x_ref[...].reshape(Bb * T, H)                    # residual + QKV input
    qkv = (_mxu_dot(x2, wqkv_ref[...]) + bqkv_ref[...]).reshape(Bb, T, 3 * H)
    bias = bias_ref[...]                                  # (Bb, 1, T) additive key mask
    scale = 1.0 / math.sqrt(dh)

    heads = []
    for h in range(nh):                                   # static unroll; batched over Bb sequences
        q = qkv[:, :, h * dh:(h + 1) * dh]
        k = qkv[:, :, H + h * dh:H + (h + 1) * dh]
        v = qkv[:, :, 2 * H + h * dh:2 * H + (h + 1) * dh]
        s = jnp.einsum("bqd,bkd->bqk",
                       q.astype(jnp.bfloat16), k.astype(jnp.bfloat16),
                       preferred_element_type=jnp.float32)
        s = s * scale + bias
        s = s - jnp.max(s, axis=-1, keepdims=True)
        p = jnp.exp(s)
        p = p * pl.reciprocal(jnp.sum(p, axis=-1, keepdims=True), approx=True)
        heads.append(jnp.einsum("bqk,bkd->bqd",
                                p.astype(jnp.bfloat16), v.astype(jnp.bfloat16),
                                preferred_element_type=jnp.float32))
    ctx = jnp.concatenate(heads, axis=-1).reshape(Bb * T, H)

    attn = _mxu_dot(ctx, wo_ref[...]) + bo_ref[...]
    y = attn + x2
    mu = jnp.mean(y, axis=-1, keepdims=True)
    var = jnp.mean((y - mu) ** 2, axis=-1, keepdims=True)
    y = (y - mu) * jax.lax.rsqrt(var + 1e-12) * g_ref[...] + be_ref[...]
    o_ref[...] = y.reshape(Bb, T, H)


def attention_block(x, add_bias, wqkv, bqkv, wo, bo, gamma, beta, nh,
                    block_bytes=2 << 20):
    BU, T, H = x.shape
    dh = H // nh
    # batch multiple sequences per grid step (~block_bytes of in-kernel qkv per block)
    bblk = max(1, min(BU, block_bytes // max(1, T * 3 * H * 4)))
    while BU % bblk:
        bblk -= 1
    specx = pl.BlockSpec((bblk, T, H), lambda i: (i, 0, 0))
    return pl.pallas_call(
        functools.partial(_attention_block_kernel, nh=nh, dh=dh, H=H),
        grid=(BU // bblk,),
        in_specs=[specx,
                  pl.BlockSpec((bblk, 1, T), lambda i: (i, 0, 0)),
                  pl.BlockSpec((H, 3 * H), lambda i: (0, 0)),
                  pl.BlockSpec((1, 3 * H), lambda i: (0, 0)),
                  pl.BlockSpec((H, H), lambda i: (0, 0)),
                  pl.BlockSpec((1, H), lambda i: (0, 0)),
                  pl.BlockSpec((1, H), lambda i: (0, 0)),
                  pl.BlockSpec((1, H), lambda i: (0, 0))],
        out_specs=specx,
        out_shape=jax.ShapeDtypeStruct((BU, T, H), jnp.float32),
        compiler_params=_CP_PAR,
    )(x, add_bias, wqkv, bqkv.reshape(1, 3 * H), wo, bo.reshape(1, H),
      gamma.reshape(1, H), beta.reshape(1, H))


# ----------------- fused FFN (wi + GELU + wf) + residual + layernorm ----------------
def _ffn_kernel(x_ref, wi_ref, bi_ref, wf_ref, bf_ref, g_ref, b_ref, o_ref):
    x = x_ref[...]
    # TODO(synk): HF BERT uses exact erf-GELU; tanh-approximate GELU used here.
    mid = jax.nn.gelu(_mxu_dot(x, wi_ref[...]) + bi_ref[...], approximate=True)
    y = _mxu_dot(mid, wf_ref[...]) + bf_ref[...]
    y = y + x
    mu = jnp.mean(y, axis=-1, keepdims=True)
    var = jnp.mean((y - mu) ** 2, axis=-1, keepdims=True)
    o_ref[...] = (y - mu) * jax.lax.rsqrt(var + 1e-12) * g_ref[...] + b_ref[...]


def ffn_block(x, wi, bi, wf, bf, gamma, beta, tile_m=512):
    M, H = x.shape
    inter = wi.shape[1]
    tm, gm = _row_tiles(M, tile_m)
    return pl.pallas_call(
        _ffn_kernel,
        grid=(gm,),
        in_specs=[pl.BlockSpec((tm, H), lambda i: (i, 0)),
                  pl.BlockSpec((H, inter), lambda i: (0, 0)),
                  pl.BlockSpec((1, inter), lambda i: (0, 0)),
                  pl.BlockSpec((inter, H), lambda i: (0, 0)),
                  pl.BlockSpec((1, H), lambda i: (0, 0)),
                  pl.BlockSpec((1, H), lambda i: (0, 0)),
                  pl.BlockSpec((1, H), lambda i: (0, 0))],
        out_specs=pl.BlockSpec((tm, H), lambda i: (i, 0)),
        out_shape=jax.ShapeDtypeStruct((M, H), jnp.float32),
        compiler_params=_CP_PAR,
    )(x, wi, bi.reshape(1, inter), wf, bf.reshape(1, H),
      gamma.reshape(1, H), beta.reshape(1, H))


# ---------------- fused pooler(tanh) + zero-mask + utterance fc(ReLU) ----------------
def _pool_enc_kernel(cls_ref, pw_ref, pb_ref, nz_ref, ew_ref, eb_ref, o_ref):
    pooled = jnp.tanh(_mxu_dot(cls_ref[...], pw_ref[...]) + pb_ref[...])
    pooled = pooled * nz_ref[...]            # zero fully-padded utterances
    enc = jnp.maximum(_mxu_dot(pooled, ew_ref[...]) + eb_ref[...], 0.0)
    o_ref[...] = enc


def pool_enc(cls, pool_w, pool_b, nz, enc_w, enc_b, tile_m=512):
    M, H = cls.shape
    tm, gm = _row_tiles(M, tile_m)
    return pl.pallas_call(
        _pool_enc_kernel,
        grid=(gm,),
        in_specs=[pl.BlockSpec((tm, H), lambda i: (i, 0)),
                  pl.BlockSpec((H, H), lambda i: (0, 0)),
                  pl.BlockSpec((1, H), lambda i: (0, 0)),
                  pl.BlockSpec((tm, 1), lambda i: (i, 0)),
                  pl.BlockSpec((H, H), lambda i: (0, 0)),
                  pl.BlockSpec((1, H), lambda i: (0, 0))],
        out_specs=pl.BlockSpec((tm, H), lambda i: (i, 0)),
        out_shape=jax.ShapeDtypeStruct((M, H), jnp.float32),
        compiler_params=_CP_PAR,
    )(cls, pool_w, pool_b.reshape(1, H), nz, enc_w, enc_b.reshape(1, H))


# --------------------------- fused bidirectional LSTM ------------------------------
# Input projection (x @ W_ih + b_ih + b_hh) is precomputed outside as one GEMM for
# both directions; this kernel only runs the recurrence for BOTH directions per
# grid step, writing into a VMEM-resident (2, U, B, hid) output.
# TODO(synk): on v7x the two directions could run on the two TensorCores via pl.core_map.
def _bilstm_kernel(gxf_ref, gxr_ref, whhf_ref, whhr_ref, o_ref,
                   hf_sc, cf_sc, hb_sc, cb_sc, *, hid):
    t = pl.program_id(0)
    last = pl.num_programs(0) - 1

    @pl.when(t == 0)
    def _():
        hf_sc[...] = jnp.zeros_like(hf_sc)
        cf_sc[...] = jnp.zeros_like(cf_sc)
        hb_sc[...] = jnp.zeros_like(hb_sc)
        cb_sc[...] = jnp.zeros_like(cb_sc)

    def cell(gx, whh_ref, h_sc, c_sc):
        gates = gx + _mxu_dot(h_sc[...], whh_ref[...])
        i = jax.nn.sigmoid(gates[:, 0 * hid:1 * hid])   # PyTorch gate order: i, f, g, o
        f = jax.nn.sigmoid(gates[:, 1 * hid:2 * hid])
        g = jnp.tanh(gates[:, 2 * hid:3 * hid])
        o = jax.nn.sigmoid(gates[:, 3 * hid:4 * hid])
        c = f * c_sc[...] + i * g
        h = o * jnp.tanh(c)
        c_sc[...] = c
        h_sc[...] = h
        return h

    h_f = cell(gxf_ref[0], whhf_ref, hf_sc, cf_sc)
    h_b = cell(gxr_ref[0], whhr_ref, hb_sc, cb_sc)
    o_ref[pl.ds(0, 1), pl.ds(t, 1), :, :] = h_f[None, None, :, :]
    o_ref[pl.ds(1, 1), pl.ds(last - t, 1), :, :] = h_b[None, None, :, :]


def bilstm(gx_f, gx_r, whh_f, whh_r, hid):
    U, B, G = gx_f.shape
    return pl.pallas_call(
        functools.partial(_bilstm_kernel, hid=hid),
        grid=(U,),
        in_specs=[pl.BlockSpec((1, B, G), lambda t: (t, 0, 0)),
                  pl.BlockSpec((1, B, G), lambda t: (U - 1 - t, 0, 0)),
                  pl.BlockSpec((hid, G), lambda t: (0, 0)),
                  pl.BlockSpec((hid, G), lambda t: (0, 0))],
        out_specs=pl.BlockSpec((2, U, B, hid), lambda t: (0, 0, 0, 0)),
        out_shape=jax.ShapeDtypeStruct((2, U, B, hid), jnp.float32),
        scratch_shapes=[pltpu.VMEM((B, hid), jnp.float32),
                        pltpu.VMEM((B, hid), jnp.float32),
                        pltpu.VMEM((B, hid), jnp.float32),
                        pltpu.VMEM((B, hid), jnp.float32)],
        compiler_params=_CP_SEQ,
    )(gx_f, gx_r, whh_f, whh_r)


# ----------------------------- BERT utterance encoder ------------------------------
def bert_encoder_forward(params, input_ids, attention_mask):
    BU, T = input_ids.shape
    H = params["word_emb"].shape[1]
    nh = params["num_heads"]

    # embeddings (gather is plain-JAX glue); token_type_ids implicitly all zero
    emb = (jnp.take(params["word_emb"], input_ids, axis=0)
           + params["pos_emb"][None, :T, :]
           + params["type_emb"][0][None, None, :])
    h = layernorm(emb.reshape(BU * T, H), params["emb_ln_g"], params["emb_ln_b"])

    add_bias = ((1.0 - attention_mask) * -10000.0).astype(jnp.float32)[:, None, :]

    for layer in params["layers"]:
        h = attention_block(h.reshape(BU, T, H), add_bias,
                            layer["w_qkv"], layer["b_qkv"],
                            layer["wo"], layer["bo"],
                            layer["attn_ln_g"], layer["attn_ln_b"], nh)
        h = h.reshape(BU * T, H)
        h = ffn_block(h, layer["wi"], layer["bi"], layer["wf"], layer["bf"],
                      layer["ffn_ln_g"], layer["ffn_ln_b"])
    return h.reshape(BU, T, H)


# ------------------------------- DialogueClassifier --------------------------------
def dialogue_classifier_forward(params, input_ids, attention_mask):
    B, U, L = input_ids.shape
    ids = input_ids.reshape(B * U, L)
    mask = attention_mask.reshape(B * U, L).astype(jnp.float32)

    bert = params["bert"]
    seq = bert_encoder_forward(bert, ids, mask)              # (B*U, L, H)
    cls = seq[:, 0, :]                                       # (B*U, H)

    # pooler(tanh) -> zero fully-padded utterances -> utterance fc(Linear+ReLU), fused
    nz = (jnp.sum(mask, axis=1) > 0).astype(jnp.float32)[:, None]
    enc = pool_enc(cls, bert["pool_w"], bert["pool_b"], nz,
                   params["enc_fc_w"], params["enc_fc_b"])   # (B*U, H)

    H = enc.shape[1]
    hid = params["lstm_hid"]

    # time-major [U, B, H]; single small transpose of the utterance encodings
    x_tm = jnp.transpose(enc.reshape(B, U, H), (1, 0, 2)).reshape(U * B, H)

    # hoisted LSTM input projection, both directions in one GEMM (b_ih + b_hh pre-summed)
    gx = linear(x_tm, params["wih_cat"], params["b_ih_hh"]).reshape(U, B, 8 * hid)
    gx_f = gx[:, :, :4 * hid]
    gx_r = gx[:, :, 4 * hid:]

    rnn = bilstm(gx_f, gx_r, params["whh_f"], params["whh_r"], hid)  # (2, U, B, hid)

    # tiny (2*hid -> out_dim=7) classifier in plain XLA as a split GEMM (no concat)
    logits = (jnp.einsum("ubh,ho->ubo", rnn[0], params["out_w"][:hid])
              + jnp.einsum("ubh,ho->ubo", rnn[1], params["out_w"][hid:])
              + params["out_b"])
    return jnp.transpose(logits, (1, 0, 2))   # (B, U, out_dim); softmax not applied in forward


# ------------------------------ one-time weight prep --------------------------------
def prepare_params(params):
    """Call ONCE outside jit: concat QKV / LSTM-input weights, sum LSTM biases, and
    pre-cast the large GEMM weights to bf16 (halves weight HBM->VMEM traffic; the MXU
    path already computes in bf16 with f32 accumulation)."""
    bf16 = lambda a: a.astype(jnp.bfloat16)
    bert = dict(params["bert"])
    layers = []
    for layer in bert["layers"]:
        layers.append(dict(
            w_qkv=bf16(jnp.concatenate([layer["wq"], layer["wk"], layer["wv"]], axis=1)),
            b_qkv=jnp.concatenate([layer["bq"], layer["bk"], layer["bv"]]),
            wo=bf16(layer["wo"]), bo=layer["bo"],
            attn_ln_g=layer["attn_ln_g"], attn_ln_b=layer["attn_ln_b"],
            wi=bf16(layer["wi"]), bi=layer["bi"],
            wf=bf16(layer["wf"]), bf=layer["bf"],
            ffn_ln_g=layer["ffn_ln_g"], ffn_ln_b=layer["ffn_ln_b"],
        ))
    bert["layers"] = layers
    bert["pool_w"] = bf16(bert["pool_w"])

    p = dict(params)
    p["bert"] = bert
    p["enc_fc_w"] = bf16(params["enc_fc_w"])
    p["wih_cat"] = bf16(jnp.concatenate([params["wih_f"], params["wih_r"]], axis=1))
    p["b_ih_hh"] = jnp.concatenate([params["b_ih_f"] + params["b_hh_f"],
                                    params["b_ih_r"] + params["b_hh_r"]])
    p["whh_f"] = bf16(params["whh_f"])
    p["whh_r"] = bf16(params["whh_r"])
    return p


# --------------------------------- parameter init ----------------------------------
def init_params(key, *, vocab=50, H=32, nh=2, inter=64, n_layers=2, max_pos=16,
                lstm_hid=16, out_dim=7):
    state = {"key": key}

    def w(shape):
        state["key"], sub = jax.random.split(state["key"])
        return 0.02 * jax.random.normal(sub, shape, dtype=jnp.float32)

    layers = []
    for _ in range(n_layers):
        layers.append(dict(
            wq=w((H, H)), bq=w((H,)),
            wk=w((H, H)), bk=w((H,)),
            wv=w((H, H)), bv=w((H,)),
            wo=w((H, H)), bo=w((H,)),
            attn_ln_g=jnp.ones((H,), jnp.float32), attn_ln_b=jnp.zeros((H,), jnp.float32),
            wi=w((H, inter)), bi=w((inter,)),
            wf=w((inter, H)), bf=w((H,)),
            ffn_ln_g=jnp.ones((H,), jnp.float32), ffn_ln_b=jnp.zeros((H,), jnp.float32),
        ))
    bert = dict(
        num_heads=nh,
        word_emb=w((vocab, H)),
        pos_emb=w((max_pos, H)),
        type_emb=w((2, H)),
        emb_ln_g=jnp.ones((H,), jnp.float32), emb_ln_b=jnp.zeros((H,), jnp.float32),
        layers=layers,
        pool_w=w((H, H)), pool_b=w((H,)),
    )
    params = dict(
        bert=bert,
        enc_fc_w=w((H, H)), enc_fc_b=w((H,)),
        lstm_hid=lstm_hid,
        wih_f=w((H, 4 * lstm_hid)), whh_f=w((lstm_hid, 4 * lstm_hid)),
        b_ih_f=w((4 * lstm_hid,)), b_hh_f=w((4 * lstm_hid,)),
        wih_r=w((H, 4 * lstm_hid)), whh_r=w((lstm_hid, 4 * lstm_hid)),
        b_ih_r=w((4 * lstm_hid,)), b_hh_r=w((4 * lstm_hid,)),
        out_w=w((2 * lstm_hid, out_dim)), out_b=w((out_dim,)),
    )
    return params


if __name__ == "__main__":
    key = jax.random.PRNGKey(0)
    k_param, k_ids = jax.random.split(key)

    B, U, L = 2, 4, 8
    params = prepare_params(
        init_params(k_param, vocab=50, H=32, nh=2, inter=64, n_layers=2,
                    max_pos=16, lstm_hid=16, out_dim=7))

    input_ids = jax.random.randint(k_ids, (B, U, L), 0, 50, dtype=jnp.int32)
    attention_mask = jnp.ones((B, U, L), dtype=jnp.int32)
    attention_mask = attention_mask.at[0, 3].set(0)      # an all-padding utterance
    attention_mask = attention_mask.at[1, 2, 5:].set(0)  # partially padded utterance

    fwd = jax.jit(lambda ids, m: dialogue_classifier_forward(params, ids, m))
    out = jax.block_until_ready(fwd(input_ids, attention_mask))
    assert out.shape == (B, U, 7)
    print("KERNEL_OK")
</pallas_src>

<mosaic_0001>
module attributes {stable_mosaic.version = 11 : i64} {
  func.func @_layernorm_kernel(%arg0: i32, %arg1: memref<64x32xf32, #tpu.memory_space<vmem>>, %arg2: memref<1x32xf32, #tpu.memory_space<vmem>>, %arg3: memref<1x32xf32, #tpu.memory_space<vmem>>, %arg4: memref<64x32xf32, #tpu.memory_space<vmem>>) attributes {dimension_semantics = [#tpu.dimension_semantics<parallel>], iteration_bounds = array<i64: 1>, scalar_prefetch = 0 : i64, scratch_operands = 0 : i64, tpu.core_type = #tpu.core_type<tc>, window_params = [{transform_indices = @transform_0, window_bounds = array<i64: 64, 32>}, {pipeline_mode = #tpu.pipeline_mode<synchronous>, transform_indices = @transform_1, window_bounds = array<i64: 1, 32>}, {pipeline_mode = #tpu.pipeline_mode<synchronous>, transform_indices = @transform_2, window_bounds = array<i64: 1, 32>}, {transform_indices = @transform_3, window_bounds = array<i64: 64, 32>}]} {
    %c0 = arith.constant 0 : index
    %c0_0 = arith.constant 0 : index
    %0 = vector.load %arg1[%c0, %c0_0] : memref<64x32xf32, #tpu.memory_space<vmem>>, vector<64x32xf32>
    %cst = arith.constant dense<0.000000e+00> : vector<64xf32>
    %1 = vector.multi_reduction <add>, %0, %cst [1] : vector<64x32xf32> to vector<64xf32>
    %2 = vector.shape_cast %1 : vector<64xf32> to vector<64x1xf32>
    %cst_1 = arith.constant 3.200000e+01 : f32
    %3 = vector.broadcast %cst_1 : f32 to vector<64x1xf32>
    %4 = arith.divf %2, %3 : vector<64x1xf32>
    %5 = vector.broadcast %4 : vector<64x1xf32> to vector<64x32xf32>
    %6 = arith.subf %0, %5 : vector<64x32xf32>
    %7 = arith.mulf %6, %6 : vector<64x32xf32>
    %cst_2 = arith.constant dense<0.000000e+00> : vector<64xf32>
    %8 = vector.multi_reduction <add>, %7, %cst_2 [1] : vector<64x32xf32> to vector<64xf32>
    %9 = vector.shape_cast %8 : vector<64xf32> to vector<64x1xf32>
    %cst_3 = arith.constant 3.200000e+01 : f32
    %10 = vector.broadcast %cst_3 : f32 to vector<64x1xf32>
    %11 = arith.divf %9, %10 : vector<64x1xf32>
    %12 = vector.broadcast %4 : vector<64x1xf32> to vector<64x32xf32>
    %13 = arith.subf %0, %12 : vector<64x32xf32>
    %cst_4 = arith.constant 9.99999996E-13 : f32
    %14 = vector.broadcast %cst_4 : f32 to vector<64x1xf32>
    %15 = arith.addf %11, %14 : vector<64x1xf32>
    %16 = math.rsqrt %15 : vector<64x1xf32>
    %17 = vector.broadcast %16 : vector<64x1xf32> to vector<64x32xf32>
    %18 = arith.mulf %13, %17 : vector<64x32xf32>
    %c0_5 = arith.constant 0 : index
    %c0_6 = arith.constant 0 : index
    %19 = vector.load %arg2[%c0_5, %c0_6] : memref<1x32xf32, #tpu.memory_space<vmem>>, vector<1x32xf32>
    %20 = vector.broadcast %19 : vector<1x32xf32> to vector<64x32xf32>
    %21 = arith.mulf %18, %20 : vector<64x32xf32>
    %c0_7 = arith.constant 0 : index
    %c0_8 = arith.constant 0 : index
    %22 = vector.load %arg3[%c0_7, %c0_8] : memref<1x32xf32, #tpu.memory_space<vmem>>, vector<1x32xf32>
    %23 = vector.broadcast %22 : vector<1x32xf32> to vector<64x32xf32>
    %24 = arith.addf %21, %23 : vector<64x32xf32>
    %c0_9 = arith.constant 0 : index
    %c0_10 = arith.constant 0 : index
    %25 = vector.load %arg4[%c0_9, %c0_10] : memref<64x32xf32, #tpu.memory_space<vmem>>, vector<64x32xf32>
    tpu.vector_store %arg4[%c0_9, %c0_10], %24 {strides = array<i32>} : memref<64x32xf32, #tpu.memory_space<vmem>>, vector<64x32xf32>,
    return
  }
  func.func @transform_0(%arg0: i32) -> (i32, i32) {
    %c0_i32 = arith.constant 0 : i32
    %c0_i32_0 = arith.constant 0 : i32
    return %arg0, %c0_i32 : i32, i32
  }
  func.func @transform_1(%arg0: i32) -> (i32, i32) {
    %c0_i32 = arith.constant 0 : i32
    %c0_i32_0 = arith.constant 0 : i32
    %c0_i32_1 = arith.constant 0 : i32
    return %c0_i32, %c0_i32_0 : i32, i32
  }
  func.func @transform_2(%arg0: i32) -> (i32, i32) {
    %c0_i32 = arith.constant 0 : i32
    %c0_i32_0 = arith.constant 0 : i32
    %c0_i32_1 = arith.constant 0 : i32
    return %c0_i32, %c0_i32_0 : i32, i32
  }
  func.func @transform_3(%arg0: i32) -> (i32, i32) {
    %c0_i32 = arith.constant 0 : i32
    %c0_i32_0 = arith.constant 0 : i32
    return %arg0, %c0_i32 : i32, i32
  }
}

module attributes {stable_mosaic.version = 11 : i64} {
  func.func @_ffn_kernel(%arg0: i32, %arg1: memref<64x32xf32, #tpu.memory_space<vmem>>, %arg2: memref<32x64xbf16, #tpu.memory_space<vmem>>, %arg3: memref<1x64xf32, #tpu.memory_space<vmem>>, %arg4: memref<64x32xbf16, #tpu.memory_space<vmem>>, %arg5: memref<1x32xf32, #tpu.memory_space<vmem>>, %arg6: memref<1x32xf32, #tpu.memory_space<vmem>>, %arg7: memref<1x32xf32, #tpu.memory_space<vmem>>, %arg8: memref<64x32xf32, #tpu.memory_space<vmem>>) attributes {dimension_semantics = [#tpu.dimension_semantics<parallel>], iteration_bounds = array<i64: 1>, scalar_prefetch = 0 : i64, scratch_operands = 0 : i64, tpu.core_type = #tpu.core_type<tc>, window_params = [{transform_indices = @transform_0, window_bounds = array<i64: 64, 32>}, {pipeline_mode = #tpu.pipeline_mode<synchronous>, transform_indices = @transform_1, window_bounds = array<i64: 32, 64>}, {pipeline_mode = #tpu.pipeline_mode<synchronous>, transform_indices = @transform_2, window_bounds = array<i64: 1, 64>}, {pipeline_mode = #tpu.pipeline_mode<synchronous>, transform_indices = @transform_3, window_bounds = array<i64: 64, 32>}, {pipeline_mode = #tpu.pipeline_mode<synchronous>, transform_indices = @transform_4, window_bounds = array<i64: 1, 32>}, {pipeline_mode = #tpu.pipeline_mode<synchronous>, transform_indices = @transform_5, window_bounds = array<i64: 1, 32>}, {pipeline_mode = #tpu.pipeline_mode<synchronous>, transform_indices = @transform_6, window_bounds = array<i64: 1, 32>}, {transform_indices = @transform_7, window_bounds = array<i64: 64, 32>}]} {
    %c0 = arith.constant 0 : index
    %c0_0 = arith.constant 0 : index
    %0 = vector.load %arg1[%c0, %c0_0] : memref<64x32xf32, #tpu.memory_space<vmem>>, vector<64x32xf32>
    %c0_1 = arith.constant 0 : index
    %c0_2 = arith.constant 0 : index
    %1 = vector.load %arg2[%c0_1, %c0_2] : memref<32x64xbf16, #tpu.memory_space<vmem>>, vector<32x64xbf16>
    %2 = arith.truncf %0 : vector<64x32xf32> to vector<64x32xbf16>
    %cst = arith.constant dense<0.000000e+00> : vector<64x64xf32>
    %3 = tpu.matmul %2, %1, %cst {dimension_numbers = #tpu.dot_dimension_numbers<[1], [0], [0], [1], [0, 0, 1, 1], [], []>} : vector<64x32xbf16>, vector<32x64xbf16>, vector<64x64xf32> -> vector<64x64xf32>
    %c0_3 = arith.constant 0 : index
    %c0_4 = arith.constant 0 : index
    %4 = vector.load %arg3[%c0_3, %c0_4] : memref<1x64xf32, #tpu.memory_space<vmem>>, vector<1x64xf32>
    %5 = vector.broadcast %4 : vector<1x64xf32> to vector<64x64xf32>
    %6 = arith.addf %3, %5 : vector<64x64xf32>
    %7 = arith.mulf %6, %6 : vector<64x64xf32>
    %8 = arith.mulf %6, %7 : vector<64x64xf32>
    %cst_5 = arith.constant 4.471500e-02 : f32
    %9 = vector.broadcast %cst_5 : f32 to vector<64x64xf32>
    %10 = arith.mulf %9, %8 : vector<64x64xf32>
    %11 = arith.addf %6, %10 : vector<64x64xf32>
    %cst_6 = arith.constant 0.797884583 : f32
    %12 = vector.broadcast %cst_6 : f32 to vector<64x64xf32>
    %13 = arith.mulf %12, %11 : vector<64x64xf32>
    %14 = math.tanh %13 : vector<64x64xf32>
    %cst_7 = arith.constant 1.000000e+00 : f32
    %15 = vector.broadcast %cst_7 : f32 to vector<64x64xf32>
    %16 = arith.addf %15, %14 : vector<64x64xf32>
    %cst_8 = arith.constant 5.000000e-01 : f32
    %17 = vector.broadcast %cst_8 : f32 to vector<64x64xf32>
    %18 = arith.mulf %17, %16 : vector<64x64xf32>
    %19 = arith.mulf %6, %18 : vector<64x64xf32>
    %c0_9 = arith.constant 0 : index
    %c0_10 = arith.constant 0 : index
    %20 = vector.load %arg4[%c0_9, %c0_10] : memref<64x32xbf16, #tpu.memory_space<vmem>>, vector<64x32xbf16>
    %21 = arith.truncf %19 : vector<64x64xf32> to vector<64x64xbf16>
    %cst_11 = arith.constant dense<0.000000e+00> : vector<64x32xf32>
    %22 = tpu.matmul %21, %20, %cst_11 {dimension_numbers = #tpu.dot_dimension_numbers<[1], [0], [0], [1], [0, 0, 1, 1], [], []>} : vector<64x64xbf16>, vector<64x32xbf16>, vector<64x32xf32> -> vector<64x32xf32>
    %c0_12 = arith.constant 0 : index
    %c0_13 = arith.constant 0 : index
    %23 = vector.load %arg5[%c0_12, %c0_13] : memref<1x32xf32, #tpu.memory_space<vmem>>, vector<1x32xf32>
    %24 = vector.broadcast %23 : vector<1x32xf32> to vector<64x32xf32>
    %25 = arith.addf %22, %24 : vector<64x32xf32>
    %26 = arith.addf %25, %0 : vector<64x32xf32>
    %cst_14 = arith.constant dense<0.000000e+00> : vector<64xf32>
    %27 = vector.multi_reduction <add>, %26, %cst_14 [1] : vector<64x32xf32> to vector<64xf32>
    %28 = vector.shape_cast %27 : vector<64xf32> to vector<64x1xf32>
    %cst_15 = arith.constant 3.200000e+01 : f32
    %29 = vector.broadcast %cst_15 : f32 to vector<64x1xf32>
    %30 = arith.divf %28, %29 : vector<64x1xf32>
    %31 = vector.broadcast %30 : vector<64x1xf32> to vector<64x32xf32>
    %32 = arith.subf %26, %31 : vector<64x32xf32>
    %33 = arith.mulf %32, %32 : vector<64x32xf32>
    %cst_16 = arith.constant dense<0.000000e+00> : vector<64xf32>
    %34 = vector.multi_reduction <add>, %33, %cst_16 [1] : vector<64x32xf32> to vector<64xf32>
    %35 = vector.shape_cast %34 : vector<64xf32> to vector<64x1xf32>
    %cst_17 = arith.constant 3.200000e+01 : f32
    %36 = vector.broadcast %cst_17 : f32 to vector<64x1xf32>
    %37 = arith.divf %35, %36 : vector<64x1xf32>
    %38 = vector.broadcast %30 : vector<64x1xf32> to vector<64x32xf32>
    %39 = arith.subf %26, %38 : vector<64x32xf32>
    %cst_18 = arith.constant 9.99999996E-13 : f32
    %40 = vector.broadcast %cst_18 : f32 to vector<64x1xf32>
    %41 = arith.addf %37, %40 : vector<64x1xf32>
    %42 = math.rsqrt %41 : vector<64x1xf32>
    %43 = vector.broadcast %42 : vector<64x1xf32> to vector<64x32xf32>
    %44 = arith.mulf %39, %43 : vector<64x32xf32>
    %c0_19 = arith.constant 0 : index
    %c0_20 = arith.constant 0 : index
    %45 = vector.load %arg6[%c0_19, %c0_20] : memref<1x32xf32, #tpu.memory_space<vmem>>, vector<1x32xf32>
    %46 = vector.broadcast %45 : vector<1x32xf32> to vector<64x32xf32>
    %47 = arith.mulf %44, %46 : vector<64x32xf32>
    %c0_21 = arith.constant 0 : index
    %c0_22 = arith.constant 0 : index
    %48 = vector.load %arg7[%c0_21, %c0_22] : memref<1x32xf32, #tpu.memory_space<vmem>>, vector<1x32xf32>
    %49 = vector.broadcast %48 : vector<1x32xf32> to vector<64x32xf32>
    %50 = arith.addf %47, %49 : vector<64x32xf32>
    %c0_23 = arith.constant 0 : index
    %c0_24 = arith.constant 0 : index
    %51 = vector.load %arg8[%c0_23, %c0_24] : memref<64x32xf32, #tpu.memory_space<vmem>>, vector<64x32xf32>
    tpu.vector_store %arg8[%c0_23, %c0_24], %50 {strides = array<i32>} : memref<64x32xf32, #tpu.memory_space<vmem>>, vector<64x32xf32>,
    return
  }
  func.func @transform_0(%arg0: i32) -> (i32, i32) {
    %c0_i32 = arith.constant 0 : i32
    %c0_i32_0 = arith.constant 0 : i32
    return %arg0, %c0_i32 : i32, i32
  }
  func.func @transform_1(%arg0: i32) -> (i32, i32) {
    %c0_i32 = arith.constant 0 : i32
    %c0_i32_0 = arith.constant 0 : i32
    %c0_i32_1 = arith.constant 0 : i32
    return %c0_i32, %c0_i32_0 : i32, i32
  }
  func.func @transform_2(%arg0: i32) -> (i32, i32) {
    %c0_i32 = arith.constant 0 : i32
    %c0_i32_0 = arith.constant 0 : i32
    %c0_i32_1 = arith.constant 0 : i32
    return %c0_i32, %c0_i32_0 : i32, i32
  }
  func.func @transform_3(%arg0: i32) -> (i32, i32) {
    %c0_i32 = arith.constant 0 : i32
    %c0_i32_0 = arith.constant 0 : i32
    %c0_i32_1 = arith.constant 0 : i32
    return %c0_i32, %c0_i32_0 : i32, i32
  }
  func.func @transform_4(%arg0: i32) -> (i32, i32) {
    %c0_i32 = arith.constant 0 : i32
    %c0_i32_0 = arith.constant 0 : i32
    %c0_i32_1 = arith.constant 0 : i32
    return %c0_i32, %c0_i32_0 : i32, i32
  }
  func.func @transform_5(%arg0: i32) -> (i32, i32) {
    %c0_i32 = arith.constant 0 : i32
    %c0_i32_0 = arith.constant 0 : i32
    %c0_i32_1 = arith.constant 0 : i32
    return %c0_i32, %c0_i32_0 : i32, i32
  }
  func.func @transform_6(%arg0: i32) -> (i32, i32) {
    %c0_i32 = arith.constant 0 : i32
    %c0_i32_0 = arith.constant 0 : i32
    %c0_i32_1 = arith.constant 0 : i32
    return %c0_i32, %c0_i32_0 : i32, i32
  }
  func.func @transform_7(%arg0: i32) -> (i32, i32) {
    %c0_i32 = arith.constant 0 : i32
    %c0_i32_0 = arith.constant 0 : i32
    return %arg0, %c0_i32 : i32, i32
  }
}

module attributes {stable_mosaic.version = 11 : i64} {
  func.func @_attention_block_kernel(%arg0: i32, %arg1: memref<8x8x32xf32, #tpu.memory_space<vmem>>, %arg2: memref<8x1x8xf32, #tpu.memory_space<vmem>>, %arg3: memref<32x96xbf16, #tpu.memory_space<vmem>>, %arg4: memref<1x96xf32, #tpu.memory_space<vmem>>, %arg5: memref<32x32xbf16, #tpu.memory_space<vmem>>, %arg6: memref<1x32xf32, #tpu.memory_space<vmem>>, %arg7: memref<1x32xf32, #tpu.memory_space<vmem>>, %arg8: memref<1x32xf32, #tpu.memory_space<vmem>>, %arg9: memref<8x8x32xf32, #tpu.memory_space<vmem>>) attributes {dimension_semantics = [#tpu.dimension_semantics<parallel>], iteration_bounds = array<i64: 1>, scalar_prefetch = 0 : i64, scratch_operands = 0 : i64, tpu.core_type = #tpu.core_type<tc>, window_params = [{transform_indices = @transform_0, window_bounds = array<i64: 8, 8, 32>}, {transform_indices = @transform_1, window_bounds = array<i64: 8, 1, 8>}, {pipeline_mode = #tpu.pipeline_mode<synchronous>, transform_indices = @transform_2, window_bounds = array<i64: 32, 96>}, {pipeline_mode = #tpu.pipeline_mode<synchronous>, transform_indices = @transform_3, window_bounds = array<i64: 1, 96>}, {pipeline_mode = #tpu.pipeline_mode<synchronous>, transform_indices = @transform_4, window_bounds = array<i64: 32, 32>}, {pipeline_mode = #tpu.pipeline_mode<synchronous>, transform_indices = @transform_5, window_bounds = array<i64: 1, 32>}, {pipeline_mode = #tpu.pipeline_mode<synchronous>, transform_indices = @transform_6, window_bounds = array<i64: 1, 32>}, {pipeline_mode = #tpu.pipeline_mode<synchronous>, transform_indices = @transform_7, window_bounds = array<i64: 1, 32>}, {transform_indices = @transform_8, window_bounds = array<i64: 8, 8, 32>}]} {
    %c0 = arith.constant 0 : index
    %c0_0 = arith.constant 0 : index
    %c0_1 = arith.constant 0 : index
    %0 = vector.load %arg1[%c0, %c0_0, %c0_1] : memref<8x8x32xf32, #tpu.memory_space<vmem>>, vector<8x8x32xf32>
    %1 = vector.shape_cast %0 : vector<8x8x32xf32> to vector<64x32xf32>
    %c0_2 = arith.constant 0 : index
    %c0_3 = arith.constant 0 : index
    %2 = vector.load %arg3[%c0_2, %c0_3] : memref<32x96xbf16, #tpu.memory_space<vmem>>, vector<32x96xbf16>
    %3 = arith.truncf %1 : vector<64x32xf32> to vector<64x32xbf16>
    %cst = arith.constant dense<0.000000e+00> : vector<64x96xf32>
    %4 = tpu.matmul %3, %2, %cst {dimension_numbers = #tpu.dot_dimension_numbers<[1], [0], [0], [1], [0, 0, 1, 1], [], []>} : vector<64x32xbf16>, vector<32x96xbf16>, vector<64x96xf32> -> vector<64x96xf32>
    %c0_4 = arith.constant 0 : index
    %c0_5 = arith.constant 0 : index
    %5 = vector.load %arg4[%c0_4, %c0_5] : memref<1x96xf32, #tpu.memory_space<vmem>>, vector<1x96xf32>
    %6 = vector.broadcast %5 : vector<1x96xf32> to vector<64x96xf32>
    %7 = arith.addf %4, %6 : vector<64x96xf32>
    %8 = vector.shape_cast %7 : vector<64x96xf32> to vector<8x8x96xf32>
    %c0_6 = arith.constant 0 : index
    %c0_7 = arith.constant 0 : index
    %c0_8 = arith.constant 0 : index
    %9 = vector.load %arg2[%c0_6, %c0_7, %c0_8] : memref<8x1x8xf32, #tpu.memory_space<vmem>>, vector<8x1x8xf32>
    %10 = vector.extract_strided_slice %8 {offsets = [0, 0, 0], sizes = [8, 8, 16], strides = [1, 1, 1]} : vector<8x8x96xf32> to vector<8x8x16xf32>
    %11 = vector.extract_strided_slice %8 {offsets = [0, 0, 32], sizes = [8, 8, 16], strides = [1, 1, 1]} : vector<8x8x96xf32> to vector<8x8x16xf32>
    %12 = vector.extract_strided_slice %8 {offsets = [0, 0, 64], sizes = [8, 8, 16], strides = [1, 1, 1]} : vector<8x8x96xf32> to vector<8x8x16xf32>
    %13 = arith.truncf %10 : vector<8x8x16xf32> to vector<8x8x16xbf16>
    %14 = arith.truncf %11 : vector<8x8x16xf32> to vector<8x8x16xbf16>
    "tpu.trace_start"() <{level = 10 : i32, message = "bqd,bkd->bqk"}> : () -> ()
    %cst_9 = arith.constant dense<0.000000e+00> : vector<8x8x8xf32>
    %15 = tpu.matmul %13, %14, %cst_9 {dimension_numbers = #tpu.dot_dimension_numbers<[2], [2], [1], [1], [0, 0, 0, 1, 1, 1], [0], [0]>} : vector<8x8x16xbf16>, vector<8x8x16xbf16>, vector<8x8x8xf32> -> vector<8x8x8xf32>
    "tpu.trace_stop"() : () -> ()
    %cst_10 = arith.constant 2.500000e-01 : f32
    %16 = vector.broadcast %cst_10 : f32 to vector<8x8x8xf32>
    %17 = arith.mulf %15, %16 : vector<8x8x8xf32>
    %18 = vector.broadcast %9 : vector<8x1x8xf32> to vector<8x8x8xf32>
    %19 = arith.addf %17, %18 : vector<8x8x8xf32>
    %cst_11 = arith.constant dense<0xFF800000> : vector<8x8xf32>
    %20 = vector.multi_reduction <maximumf>, %19, %cst_11 [2] : vector<8x8x8xf32> to vector<8x8xf32>
    %21 = vector.shape_cast %20 : vector<8x8xf32> to vector<8x8x1xf32>
    %22 = vector.broadcast %21 : vector<8x8x1xf32> to vector<8x8x8xf32>
    %23 = arith.subf %19, %22 : vector<8x8x8xf32>
    %24 = math.exp %23 : vector<8x8x8xf32>
    %cst_12 = arith.constant dense<0.000000e+00> : vector<8x8xf32>
    %25 = vector.multi_reduction <add>, %24, %cst_12 [2] : vector<8x8x8xf32> to vector<8x8xf32>
    %26 = vector.shape_cast %25 : vector<8x8xf32> to vector<8x8x1xf32>
    %27 = tpu.reciprocal %26 {approx = true} : vector<8x8x1xf32> -> vector<8x8x1xf32>
    %28 = vector.broadcast %27 : vector<8x8x1xf32> to vector<8x8x8xf32>
    %29 = arith.mulf %24, %28 : vector<8x8x8xf32>
    %30 = arith.truncf %29 : vector<8x8x8xf32> to vector<8x8x8xbf16>
    %31 = arith.truncf %12 : vector<8x8x16xf32> to vector<8x8x16xbf16>
    "tpu.trace_start"() <{level = 10 : i32, message = "bqk,bkd->bqd"}> : () -> ()
    %cst_13 = arith.constant dense<0.000000e+00> : vector<8x8x16xf32>
    %32 = tpu.matmul %30, %31, %cst_13 {dimension_numbers = #tpu.dot_dimension_numbers<[2], [1], [1], [2], [0, 0, 0, 1, 1, 2], [0], [0]>} : vector<8x8x8xbf16>, vector<8x8x16xbf16>, vector<8x8x16xf32> -> vector<8x8x16xf32>
    "tpu.trace_stop"() : () -> ()
    %33 = vector.extract_strided_slice %8 {offsets = [0, 0, 16], sizes = [8, 8, 16], strides = [1, 1, 1]} : vector<8x8x96xf32> to vector<8x8x16xf32>
    %34 = vector.extract_strided_slice %8 {offsets = [0, 0, 48], sizes = [8, 8, 16], strides = [1, 1, 1]} : vector<8x8x96xf32> to vector<8x8x16xf32>
    %35 = vector.extract_strided_slice %8 {offsets = [0, 0, 80], sizes = [8, 8, 16], strides = [1, 1, 1]} : vector<8x8x96xf32> to vector<8x8x16xf32>
    %36 = arith.truncf %33 : vector<8x8x16xf32> to vector<8x8x16xbf16>
    %37 = arith.truncf %34 : vector<8x8x16xf32> to vector<8x8x16xbf16>
    "tpu.trace_start"() <{level = 10 : i32, message = "bqd,bkd->bqk"}> : () -> ()
    %cst_14 = arith.constant dense<0.000000e+00> : vector<8x8x8xf32>
    %38 = tpu.matmul %36, %37, %cst_14 {dimension_numbers = #tpu.dot_dimension_numbers<[2], [2], [1], [1], [0, 0, 0, 1, 1, 1], [0], [0]>} : vector<8x8x16xbf16>, vector<8x8x16xbf16>, vector<8x8x8xf32> -> vector<8x8x8xf32>
    "tpu.trace_stop"() : () -> ()
    %cst_15 = arith.constant 2.500000e-01 : f32
    %39 = vector.broadcast %cst_15 : f32 to vector<8x8x8xf32>
    %40 = arith.mulf %38, %39 : vector<8x8x8xf32>
    %41 = vector.broadcast %9 : vector<8x1x8xf32> to vector<8x8x8xf32>
    %42 = arith.addf %40, %41 : vector<8x8x8xf32>
    %cst_16 = arith.constant dense<0xFF800000> : vector<8x8xf32>
    %43 = vector.multi_reduction <maximumf>, %42, %cst_16 [2] : vector<8x8x8xf32> to vector<8x8xf32>
    %44 = vector.shape_cast %43 : vector<8x8xf32> to vector<8x8x1xf32>
    %45 = vector.broadcast %44 : vector<8x8x1xf32> to vector<8x8x8xf32>
    %46 = arith.subf %42, %45 : vector<8x8x8xf32>
    %47 = math.exp %46 : vector<8x8x8xf32>
    %cst_17 = arith.constant dense<0.000000e+00> : vector<8x8xf32>
    %48 = vector.multi_reduction <add>, %47, %cst_17 [2] : vector<8x8x8xf32> to vector<8x8xf32>
    %49 = vector.shape_cast %48 : vector<8x8xf32> to vector<8x8x1xf32>
    %50 = tpu.reciprocal %49 {approx = true} : vector<8x8x1xf32> -> vector<8x8x1xf32>
    %51 = vector.broadcast %50 : vector<8x8x1xf32> to vector<8x8x8xf32>
    %52 = arith.mulf %47, %51 : vector<8x8x8xf32>
    %53 = arith.truncf %52 : vector<8x8x8xf32> to vector<8x8x8xbf16>
    %54 = arith.truncf %35 : vector<8x8x16xf32> to vector<8x8x16xbf16>
    "tpu.trace_start"() <{level = 10 : i32, message = "bqk,bkd->bqd"}> : () -> ()
    %cst_18 = arith.constant dense<0.000000e+00> : vector<8x8x16xf32>
    %55 = tpu.matmul %53, %54, %cst_18 {dimension_numbers = #tpu.dot_dimension_numbers<[2], [1], [1], [2], [0, 0, 0, 1, 1, 2], [0], [0]>} : vector<8x8x8xbf16>, vector<8x8x16xbf16>, vector<8x8x16xf32> -> vector<8x8x16xf32>
    "tpu.trace_stop"() : () -> ()
    %56 = tpu.concatenate %32, %55 in 2 : vector<8x8x16xf32>, vector<8x8x16xf32> -> vector<8x8x32xf32>
    %57 = vector.shape_cast %56 : vector<8x8x32xf32> to vector<64x32xf32>
    %c0_19 = arith.constant 0 : index
    %c0_20 = arith.constant 0 : index
    %58 = vector.load %arg5[%c0_19, %c0_20] : memref<32x32xbf16, #tpu.memory_space<vmem>>, vector<32x32xbf16>
    %59 = arith.truncf %57 : vector<64x32xf32> to vector<64x32xbf16>
    %cst_21 = arith.constant dense<0.000000e+00> : vector<64x32xf32>
    %60 = tpu.matmul %59, %58, %cst_21 {dimension_numbers = #tpu.dot_dimension_numbers<[1], [0], [0], [1], [0, 0, 1, 1], [], []>} : vector<64x32xbf16>, vector<32x32xbf16>, vector<64x32xf32> -> vector<64x32xf32>
    %c0_22 = arith.constant 0 : index
    %c0_23 = arith.constant 0 : index
    %61 = vector.load %arg6[%c0_22, %c0_23] : memref<1x32xf32, #tpu.memory_space<vmem>>, vector<1x32xf32>
    %62 = vector.broadcast %61 : vector<1x32xf32> to vector<64x32xf32>
    %63 = arith.addf %60, %62 : vector<64x32xf32>
    %64 = arith.addf %63, %1 : vector<64x32xf32>
    %cst_24 = arith.constant dense<0.000000e+00> : vector<64xf32>
    %65 = vector.multi_reduction <add>, %64, %cst_24 [1] : vector<64x32xf32> to vector<64xf32>
    %66 = vector.shape_cast %65 : vector<64xf32> to vector<64x1xf32>
    %cst_25 = arith.constant 3.200000e+01 : f32
    %67 = vector.broadcast %cst_25 : f32 to vector<64x1xf32>
    %68 = arith.divf %66, %67 : vector<64x1xf32>
    %69 = vector.broadcast %68 : vector<64x1xf32> to vector<64x32xf32>
    %70 = arith.subf %64, %69 : vector<64x32xf32>
    %71 = arith.mulf %70, %70 : vector<64x32xf32>
    %cst_26 = arith.constant dense<0.000000e+00> : vector<64xf32>
    %72 = vector.multi_reduction <add>, %71, %cst_26 [1] : vector<64x32xf32> to vector<64xf32>
    %73 = vector.shape_cast %72 : vector<64xf32> to vector<64x1xf32>
    %cst_27 = arith.constant 3.200000e+01 : f32
    %74 = vector.broadcast %cst_27 : f32 to vector<64x1xf32>
    %75 = arith.divf %73, %74 : vector<64x1xf32>
    %76 = vector.broadcast %68 : vector<64x1xf32> to vector<64x32xf32>
    %77 = arith.subf %64, %76 : vector<64x32xf32>
    %cst_28 = arith.constant 9.99999996E-13 : f32
    %78 = vector.broadcast %cst_28 : f32 to vector<64x1xf32>
    %79 = arith.addf %75, %78 : vector<64x1xf32>
    %80 = math.rsqrt %79 : vector<64x1xf32>
    %81 = vector.broadcast %80 : vector<64x1xf32> to vector<64x32xf32>
    %82 = arith.mulf %77, %81 : vector<64x32xf32>
    %c0_29 = arith.constant 0 : index
    %c0_30 = arith.constant 0 : index
    %83 = vector.load %arg7[%c0_29, %c0_30] : memref<1x32xf32, #tpu.memory_space<vmem>>, vector<1x32xf32>
    %84 = vector.broadcast %83 : vector<1x32xf32> to vector<64x32xf32>
    %85 = arith.mulf %82, %84 : vector<64x32xf32>
    %c0_31 = arith.constant 0 : index
    %c0_32 = arith.constant 0 : index
    %86 = vector.load %arg8[%c0_31, %c0_32] : memref<1x32xf32, #tpu.memory_space<vmem>>, vector<1x32xf32>
    %87 = vector.broadcast %86 : vector<1x32xf32> to vector<64x32xf32>
    %88 = arith.addf %85, %87 : vector<64x32xf32>
    %89 = vector.shape_cast %88 : vector<64x32xf32> to vector<8x8x32xf32>
    %c0_33 = arith.constant 0 : index
    %c0_34 = arith.constant 0 : index
    %c0_35 = arith.constant 0 : index
    %90 = vector.load %arg9[%c0_33, %c0_34, %c0_35] : memref<8x8x32xf32, #tpu.memory_space<vmem>>, vector<8x8x32xf32>
    tpu.vector_store %arg9[%c0_33, %c0_34, %c0_35], %89 {strides = array<i32>} : memref<8x8x32xf32, #tpu.memory_space<vmem>>, vector<8x8x32xf32>,
    return
  }
  func.func @transform_0(%arg0: i32) -> (i32, i32, i32) {
    %c0_i32 = arith.constant 0 : i32
    %c0_i32_0 = arith.constant 0 : i32
    %c0_i32_1 = arith.constant 0 : i32
    return %arg0, %c0_i32, %c0_i32_0 : i32, i32, i32
  }
  func.func @transform_1(%arg0: i32) -> (i32, i32, i32) {
    %c0_i32 = arith.constant 0 : i32
    %c0_i32_0 = arith.constant 0 : i32
    %c0_i32_1 = arith.constant 0 : i32
    return %arg0, %c0_i32, %c0_i32_0 : i32, i32, i32
  }
  func.func @transform_2(%arg0: i32) -> (i32, i32) {
    %c0_i32 = arith.constant 0 : i32
    %c0_i32_0 = arith.constant 0 : i32
    %c0_i32_1 = arith.constant 0 : i32
    return %c0_i32, %c0_i32_0 : i32, i32
  }
  func.func @transform_3(%arg0: i32) -> (i32, i32) {
    %c0_i32 = arith.constant 0 : i32
    %c0_i32_0 = arith.constant 0 : i32
    %c0_i32_1 = arith.constant 0 : i32
    return %c0_i32, %c0_i32_0 : i32, i32
  }
  func.func @transform_4(%arg0: i32) -> (i32, i32) {
    %c0_i32 = arith.constant 0 : i32
    %c0_i32_0 = arith.constant 0 : i32
    %c0_i32_1 = arith.constant 0 : i32
    return %c0_i32, %c0_i32_0 : i32, i32
  }
  func.func @transform_5(%arg0: i32) -> (i32, i32) {
    %c0_i32 = arith.constant 0 : i32
    %c0_i32_0 = arith.constant 0 : i32
    %c0_i32_1 = arith.constant 0 : i32
    return %c0_i32, %c0_i32_0 : i32, i32
  }
  func.func @transform_6(%arg0: i32) -> (i32, i32) {
    %c0_i32 = arith.constant 0 : i32
    %c0_i32_0 = arith.constant 0 : i32
    %c0_i32_1 = arith.constant 0 : i32
    return %c0_i32, %c0_i32_0 : i32, i32
  }
  func.func @transform_7(%arg0: i32) -> (i32, i32) {
    %c0_i32 = arith.constant 0 : i32
    %c0_i32_0 = arith.constant 0 : i32
    %c0_i32_1 = arith.constant 0 : i32
    return %c0_i32, %c0_i32_0 : i32, i32
  }
  func.func @transform_8(%arg0: i32) -> (i32, i32, i32) {
    %c0_i32 = arith.constant 0 : i32
    %c0_i32_0 = arith.constant 0 : i32
    %c0_i32_1 = arith.constant 0 : i32
    return %arg0, %c0_i32, %c0_i32_0 : i32, i32, i32
  }
}

module attributes {stable_mosaic.version = 11 : i64} {
  func.func @_pool_enc_kernel(%arg0: i32, %arg1: memref<8x32xf32, #tpu.memory_space<vmem>>, %arg2: memref<32x32xbf16, #tpu.memory_space<vmem>>, %arg3: memref<1x32xf32, #tpu.memory_space<vmem>>, %arg4: memref<8x1xf32, #tpu.memory_space<vmem>>, %arg5: memref<32x32xbf16, #tpu.memory_space<vmem>>, %arg6: memref<1x32xf32, #tpu.memory_space<vmem>>, %arg7: memref<8x32xf32, #tpu.memory_space<vmem>>) attributes {dimension_semantics = [#tpu.dimension_semantics<parallel>], iteration_bounds = array<i64: 1>, scalar_prefetch = 0 : i64, scratch_operands = 0 : i64, tpu.core_type = #tpu.core_type<tc>, window_params = [{transform_indices = @transform_0, window_bounds = array<i64: 8, 32>}, {pipeline_mode = #tpu.pipeline_mode<synchronous>, transform_indices = @transform_1, window_bounds = array<i64: 32, 32>}, {pipeline_mode = #tpu.pipeline_mode<synchronous>, transform_indices = @transform_2, window_bounds = array<i64: 1, 32>}, {transform_indices = @transform_3, window_bounds = array<i64: 8, 1>}, {pipeline_mode = #tpu.pipeline_mode<synchronous>, transform_indices = @transform_4, window_bounds = array<i64: 32, 32>}, {pipeline_mode = #tpu.pipeline_mode<synchronous>, transform_indices = @transform_5, window_bounds = array<i64: 1, 32>}, {transform_indices = @transform_6, window_bounds = array<i64: 8, 32>}]} {
    %c0 = arith.constant 0 : index
    %c0_0 = arith.constant 0 : index
    %0 = vector.load %arg1[%c0, %c0_0] : memref<8x32xf32, #tpu.memory_space<vmem>>, vector<8x32xf32>
    %c0_1 = arith.constant 0 : index
    %c0_2 = arith.constant 0 : index
    %1 = vector.load %arg2[%c0_1, %c0_2] : memref<32x32xbf16, #tpu.memory_space<vmem>>, vector<32x32xbf16>
    %2 = arith.truncf %0 : vector<8x32xf32> to vector<8x32xbf16>
    %cst = arith.constant dense<0.000000e+00> : vector<8x32xf32>
    %3 = tpu.matmul %2, %1, %cst {dimension_numbers = #tpu.dot_dimension_numbers<[1], [0], [0], [1], [0, 0, 1, 1], [], []>} : vector<8x32xbf16>, vector<32x32xbf16>, vector<8x32xf32> -> vector<8x32xf32>
    %c0_3 = arith.constant 0 : index
    %c0_4 = arith.constant 0 : index
    %4 = vector.load %arg3[%c0_3, %c0_4] : memref<1x32xf32, #tpu.memory_space<vmem>>, vector<1x32xf32>
    %5 = vector.broadcast %4 : vector<1x32xf32> to vector<8x32xf32>
    %6 = arith.addf %3, %5 : vector<8x32xf32>
    %7 = math.tanh %6 : vector<8x32xf32>
    %c0_5 = arith.constant 0 : index
    %c0_6 = arith.constant 0 : index
    %8 = vector.load %arg4[%c0_5, %c0_6] : memref<8x1xf32, #tpu.memory_space<vmem>>, vector<8x1xf32>
    %9 = vector.broadcast %8 : vector<8x1xf32> to vector<8x32xf32>
    %10 = arith.mulf %7, %9 : vector<8x32xf32>
    %c0_7 = arith.constant 0 : index
    %c0_8 = arith.constant 0 : index
    %11 = vector.load %arg5[%c0_7, %c0_8] : memref<32x32xbf16, #tpu.memory_space<vmem>>, vector<32x32xbf16>
    %12 = arith.truncf %10 : vector<8x32xf32> to vector<8x32xbf16>
    %cst_9 = arith.constant dense<0.000000e+00> : vector<8x32xf32>
    %13 = tpu.matmul %12, %11, %cst_9 {dimension_numbers = #tpu.dot_dimension_numbers<[1], [0], [0], [1], [0, 0, 1, 1], [], []>} : vector<8x32xbf16>, vector<32x32xbf16>, vector<8x32xf32> -> vector<8x32xf32>
    %c0_10 = arith.constant 0 : index
    %c0_11 = arith.constant 0 : index
    %14 = vector.load %arg6[%c0_10, %c0_11] : memref<1x32xf32, #tpu.memory_space<vmem>>, vector<1x32xf32>
    %15 = vector.broadcast %14 : vector<1x32xf32> to vector<8x32xf32>
    %16 = arith.addf %13, %15 : vector<8x32xf32>
    %cst_12 = arith.constant 0.000000e+00 : f32
    %17 = vector.broadcast %cst_12 : f32 to vector<8x32xf32>
    %18 = arith.maximumf %16, %17 : vector<8x32xf32>
    %c0_13 = arith.constant 0 : index
    %c0_14 = arith.constant 0 : index
    %19 = vector.load %arg7[%c0_13, %c0_14] : memref<8x32xf32, #tpu.memory_space<vmem>>, vector<8x32xf32>
    tpu.vector_store %arg7[%c0_13, %c0_14], %18 {strides = array<i32>} : memref<8x32xf32, #tpu.memory_space<vmem>>, vector<8x32xf32>,
    return
  }
  func.func @transform_0(%arg0: i32) -> (i32, i32) {
    %c0_i32 = arith.constant 0 : i32
    %c0_i32_0 = arith.constant 0 : i32
    return %arg0, %c0_i32 : i32, i32
  }
  func.func @transform_1(%arg0: i32) -> (i32, i32) {
    %c0_i32 = arith.constant 0 : i32
    %c0_i32_0 = arith.constant 0 : i32
    %c0_i32_1 = arith.constant 0 : i32
    return %c0_i32, %c0_i32_0 : i32, i32
  }
  func.func @transform_2(%arg0: i32) -> (i32, i32) {
    %c0_i32 = arith.constant 0 : i32
    %c0_i32_0 = arith.constant 0 : i32
    %c0_i32_1 = arith.constant 0 : i32
    return %c0_i32, %c0_i32_0 : i32, i32
  }
  func.func @transform_3(%arg0: i32) -> (i32, i32) {
    %c0_i32 = arith.constant 0 : i32
    %c0_i32_0 = arith.constant 0 : i32
    return %arg0, %c0_i32 : i32, i32
  }
  func.func @transform_4(%arg0: i32) -> (i32, i32) {
    %c0_i32 = arith.constant 0 : i32
    %c0_i32_0 = arith.constant 0 : i32
    %c0_i32_1 = arith.constant 0 : i32
    return %c0_i32, %c0_i32_0 : i32, i32
  }
  func.func @transform_5(%arg0: i32) -> (i32, i32) {
    %c0_i32 = arith.constant 0 : i32
    %c0_i32_0 = arith.constant 0 : i32
    %c0_i32_1 = arith.constant 0 : i32
    return %c0_i32, %c0_i32_0 : i32, i32
  }
  func.func @transform_6(%arg0: i32) -> (i32, i32) {
    %c0_i32 = arith.constant 0 : i32
    %c0_i32_0 = arith.constant 0 : i32
    return %arg0, %c0_i32 : i32, i32
  }
}

module attributes {stable_mosaic.version = 11 : i64} {
  func.func @_linear_kernel(%arg0: i32, %arg1: memref<8x32xf32, #tpu.memory_space<vmem>>, %arg2: memref<32x128xbf16, #tpu.memory_space<vmem>>, %arg3: memref<1x128xf32, #tpu.memory_space<vmem>>, %arg4: memref<8x128xf32, #tpu.memory_space<vmem>>) attributes {dimension_semantics = [#tpu.dimension_semantics<parallel>], iteration_bounds = array<i64: 1>, scalar_prefetch = 0 : i64, scratch_operands = 0 : i64, tpu.core_type = #tpu.core_type<tc>, window_params = [{transform_indices = @transform_0, window_bounds = array<i64: 8, 32>}, {pipeline_mode = #tpu.pipeline_mode<synchronous>, transform_indices = @transform_1, window_bounds = array<i64: 32, 128>}, {pipeline_mode = #tpu.pipeline_mode<synchronous>, transform_indices = @transform_2, window_bounds = array<i64: 1, 128>}, {transform_indices = @transform_3, window_bounds = array<i64: 8, 128>}]} {
    %c0 = arith.constant 0 : index
    %c0_0 = arith.constant 0 : index
    %0 = vector.load %arg1[%c0, %c0_0] : memref<8x32xf32, #tpu.memory_space<vmem>>, vector<8x32xf32>
    %c0_1 = arith.constant 0 : index
    %c0_2 = arith.constant 0 : index
    %1 = vector.load %arg2[%c0_1, %c0_2] : memref<32x128xbf16, #tpu.memory_space<vmem>>, vector<32x128xbf16>
    %2 = arith.truncf %0 : vector<8x32xf32> to vector<8x32xbf16>
    %cst = arith.constant dense<0.000000e+00> : vector<8x128xf32>
    %3 = tpu.matmul %2, %1, %cst {dimension_numbers = #tpu.dot_dimension_numbers<[1], [0], [0], [1], [0, 0, 1, 1], [], []>} : vector<8x32xbf16>, vector<32x128xbf16>, vector<8x128xf32> -> vector<8x128xf32>
    %c0_3 = arith.constant 0 : index
    %c0_4 = arith.constant 0 : index
    %4 = vector.load %arg3[%c0_3, %c0_4] : memref<1x128xf32, #tpu.memory_space<vmem>>, vector<1x128xf32>
    %5 = vector.broadcast %4 : vector<1x128xf32> to vector<8x128xf32>
    %6 = arith.addf %3, %5 : vector<8x128xf32>
    %c0_5 = arith.constant 0 : index
    %c0_6 = arith.constant 0 : index
    %7 = vector.load %arg4[%c0_5, %c0_6] : memref<8x128xf32, #tpu.memory_space<vmem>>, vector<8x128xf32>
    tpu.vector_store %arg4[%c0_5, %c0_6], %6 {strides = array<i32>} : memref<8x128xf32, #tpu.memory_space<vmem>>, vector<8x128xf32>,
    return
  }
  func.func @transform_0(%arg0: i32) -> (i32, i32) {
    %c0_i32 = arith.constant 0 : i32
    %c0_i32_0 = arith.constant 0 : i32
    return %arg0, %c0_i32 : i32, i32
  }
  func.func @transform_1(%arg0: i32) -> (i32, i32) {
    %c0_i32 = arith.constant 0 : i32
    %c0_i32_0 = arith.constant 0 : i32
    %c0_i32_1 = arith.constant 0 : i32
    return %c0_i32, %c0_i32_0 : i32, i32
  }
  func.func @transform_2(%arg0: i32) -> (i32, i32) {
    %c0_i32 = arith.constant 0 : i32
    %c0_i32_0 = arith.constant 0 : i32
    %c0_i32_1 = arith.constant 0 : i32
    return %c0_i32, %c0_i32_0 : i32, i32
  }
  func.func @transform_3(%arg0: i32) -> (i32, i32) {
    %c0_i32 = arith.constant 0 : i32
    %c0_i32_0 = arith.constant 0 : i32
    return %arg0, %c0_i32 : i32, i32
  }
}

module attributes {stable_mosaic.version = 11 : i64} {
  func.func @_bilstm_kernel(%arg0: i32, %arg1: memref<1x2x64xf32, #tpu.memory_space<vmem>>, %arg2: memref<1x2x64xf32, #tpu.memory_space<vmem>>, %arg3: memref<16x64xbf16, #tpu.memory_space<vmem>>, %arg4: memref<16x64xbf16, #tpu.memory_space<vmem>>, %arg5: memref<2x4x2x16xf32, #tpu.memory_space<vmem>>, %arg6: memref<2x16xf32, #tpu.memory_space<vmem>>, %arg7: memref<2x16xf32, #tpu.memory_space<vmem>>, %arg8: memref<2x16xf32, #tpu.memory_space<vmem>>, %arg9: memref<2x16xf32, #tpu.memory_space<vmem>>) attributes {dimension_semantics = [#tpu.dimension_semantics<arbitrary>], iteration_bounds = array<i64: 4>, scalar_prefetch = 0 : i64, scratch_operands = 4 : i64, tpu.core_type = #tpu.core_type<tc>, window_params = [{transform_indices = @transform_0, window_bounds = array<i64: 1, 2, 64>}, {transform_indices = @transform_1, window_bounds = array<i64: 1, 2, 64>}, {pipeline_mode = #tpu.pipeline_mode<synchronous>, transform_indices = @transform_2, window_bounds = array<i64: 16, 64>}, {pipeline_mode = #tpu.pipeline_mode<synchronous>, transform_indices = @transform_3, window_bounds = array<i64: 16, 64>}, {pipeline_mode = #tpu.pipeline_mode<synchronous>, transform_indices = @transform_4, window_bounds = array<i64: 2, 4, 2, 16>}]} {
    %c0_i32 = arith.constant 0 : i32
    %0 = arith.cmpi eq, %arg0, %c0_i32 : i32
    %1 = arith.extui %0 : i1 to i32
    %c0_i32_0 = arith.constant 0 : i32
    %2 = arith.cmpi ne, %1, %c0_i32_0 : i32
    scf.if %2 {
      %cst_38 = arith.constant 0.000000e+00 : f32
      %80 = vector.broadcast %cst_38 : f32 to vector<2x16xf32>
      %c0_39 = arith.constant 0 : index
      %c0_40 = arith.constant 0 : index
      %81 = vector.load %arg6[%c0_39, %c0_40] : memref<2x16xf32, #tpu.memory_space<vmem>>, vector<2x16xf32>
      tpu.vector_store %arg6[%c0_39, %c0_40], %80 {strides = array<i32>} : memref<2x16xf32, #tpu.memory_space<vmem>>, vector<2x16xf32>,
      %cst_41 = arith.constant 0.000000e+00 : f32
      %82 = vector.broadcast %cst_41 : f32 to vector<2x16xf32>
      %c0_42 = arith.constant 0 : index
      %c0_43 = arith.constant 0 : index
      %83 = vector.load %arg7[%c0_42, %c0_43] : memref<2x16xf32, #tpu.memory_space<vmem>>, vector<2x16xf32>
      tpu.vector_store %arg7[%c0_42, %c0_43], %82 {strides = array<i32>} : memref<2x16xf32, #tpu.memory_space<vmem>>, vector<2x16xf32>,
      %cst_44 = arith.constant 0.000000e+00 : f32
      %84 = vector.broadcast %cst_44 : f32 to vector<2x16xf32>
      %c0_45 = arith.constant 0 : index
      %c0_46 = arith.constant 0 : index
      %85 = vector.load %arg8[%c0_45, %c0_46] : memref<2x16xf32, #tpu.memory_space<vmem>>, vector<2x16xf32>
      tpu.vector_store %arg8[%c0_45, %c0_46], %84 {strides = array<i32>} : memref<2x16xf32, #tpu.memory_space<vmem>>, vector<2x16xf32>,
      %cst_47 = arith.constant 0.000000e+00 : f32
      %86 = vector.broadcast %cst_47 : f32 to vector<2x16xf32>
      %c0_48 = arith.constant 0 : index
      %c0_49 = arith.constant 0 : index
      %87 = vector.load %arg9[%c0_48, %c0_49] : memref<2x16xf32, #tpu.memory_space<vmem>>, vector<2x16xf32>
      tpu.vector_store %arg9[%c0_48, %c0_49], %86 {strides = array<i32>} : memref<2x16xf32, #tpu.memory_space<vmem>>, vector<2x16xf32>,
    } else {
    }
    %c0 = arith.constant 0 : index
    %c0_1 = arith.constant 0 : index
    %c0_2 = arith.constant 0 : index
    %3 = vector.load %arg1[%c0, %c0_1, %c0_2] : memref<1x2x64xf32, #tpu.memory_space<vmem>>, vector<1x2x64xf32>
    %4 = vector.shape_cast %3 : vector<1x2x64xf32> to vector<2x64xf32>
    %c0_3 = arith.constant 0 : index
    %c0_4 = arith.constant 0 : index
    %5 = vector.load %arg6[%c0_3, %c0_4] : memref<2x16xf32, #tpu.memory_space<vmem>>, vector<2x16xf32>
    %c0_5 = arith.constant 0 : index
    %c0_6 = arith.constant 0 : index
    %6 = vector.load %arg3[%c0_5, %c0_6] : memref<16x64xbf16, #tpu.memory_space<vmem>>, vector<16x64xbf16>
    %7 = arith.truncf %5 : vector<2x16xf32> to vector<2x16xbf16>
    %cst = arith.constant dense<0.000000e+00> : vector<2x64xf32>
    %8 = tpu.matmul %7, %6, %cst {dimension_numbers = #tpu.dot_dimension_numbers<[1], [0], [0], [1], [0, 0, 1, 1], [], []>} : vector<2x16xbf16>, vector<16x64xbf16>, vector<2x64xf32> -> vector<2x64xf32>
    %9 = arith.addf %4, %8 : vector<2x64xf32>
    %10 = vector.extract_strided_slice %9 {offsets = [0, 0], sizes = [2, 16], strides = [1, 1]} : vector<2x64xf32> to vector<2x16xf32>
    %11 = arith.negf %10 : vector<2x16xf32>
    %12 = math.exp %11 : vector<2x16xf32>
    %cst_7 = arith.constant 1.000000e+00 : f32
    %13 = vector.broadcast %cst_7 : f32 to vector<2x16xf32>
    %14 = arith.addf %13, %12 : vector<2x16xf32>
    %15 = arith.divf %13, %14 : vector<2x16xf32>
    %16 = vector.extract_strided_slice %9 {offsets = [0, 16], sizes = [2, 16], strides = [1, 1]} : vector<2x64xf32> to vector<2x16xf32>
    %17 = arith.negf %16 : vector<2x16xf32>
    %18 = math.exp %17 : vector<2x16xf32>
    %cst_8 = arith.constant 1.000000e+00 : f32
    %19 = vector.broadcast %cst_8 : f32 to vector<2x16xf32>
    %20 = arith.addf %19, %18 : vector<2x16xf32>
    %21 = arith.divf %19, %20 : vector<2x16xf32>
    %22 = vector.extract_strided_slice %9 {offsets = [0, 32], sizes = [2, 16], strides = [1, 1]} : vector<2x64xf32> to vector<2x16xf32>
    %23 = math.tanh %22 : vector<2x16xf32>
    %24 = vector.extract_strided_slice %9 {offsets = [0, 48], sizes = [2, 16], strides = [1, 1]} : vector<2x64xf32> to vector<2x16xf32>
    %25 = arith.negf %24 : vector<2x16xf32>
    %26 = math.exp %25 : vector<2x16xf32>
    %cst_9 = arith.constant 1.000000e+00 : f32
    %27 = vector.broadcast %cst_9 : f32 to vector<2x16xf32>
    %28 = arith.addf %27, %26 : vector<2x16xf32>
    %29 = arith.divf %27, %28 : vector<2x16xf32>
    %c0_10 = arith.constant 0 : index
    %c0_11 = arith.constant 0 : index
    %30 = vector.load %arg7[%c0_10, %c0_11] : memref<2x16xf32, #tpu.memory_space<vmem>>, vector<2x16xf32>
    %31 = arith.mulf %21, %30 : vector<2x16xf32>
    %32 = arith.mulf %15, %23 : vector<2x16xf32>
    %33 = arith.addf %31, %32 : vector<2x16xf32>
    %34 = math.tanh %33 : vector<2x16xf32>
    %35 = arith.mulf %29, %34 : vector<2x16xf32>
    %c0_12 = arith.constant 0 : index
    %c0_13 = arith.constant 0 : index
    %36 = vector.load %arg7[%c0_12, %c0_13] : memref<2x16xf32, #tpu.memory_space<vmem>>, vector<2x16xf32>
    tpu.vector_store %arg7[%c0_12, %c0_13], %33 {strides = array<i32>} : memref<2x16xf32, #tpu.memory_space<vmem>>, vector<2x16xf32>,
    %c0_14 = arith.constant 0 : index
    %c0_15 = arith.constant 0 : index
    %37 = vector.load %arg6[%c0_14, %c0_15] : memref<2x16xf32, #tpu.memory_space<vmem>>, vector<2x16xf32>
    tpu.vector_store %arg6[%c0_14, %c0_15], %35 {strides = array<i32>} : memref<2x16xf32, #tpu.memory_space<vmem>>, vector<2x16xf32>,
    %c0_16 = arith.constant 0 : index
    %c0_17 = arith.constant 0 : index
    %c0_18 = arith.constant 0 : index
    %38 = vector.load %arg2[%c0_16, %c0_17, %c0_18] : memref<1x2x64xf32, #tpu.memory_space<vmem>>, vector<1x2x64xf32>
    %39 = vector.shape_cast %38 : vector<1x2x64xf32> to vector<2x64xf32>
    %c0_19 = arith.constant 0 : index
    %c0_20 = arith.constant 0 : index
    %40 = vector.load %arg8[%c0_19, %c0_20] : memref<2x16xf32, #tpu.memory_space<vmem>>, vector<2x16xf32>
    %c0_21 = arith.constant 0 : index
    %c0_22 = arith.constant 0 : index
    %41 = vector.load %arg4[%c0_21, %c0_22] : memref<16x64xbf16, #tpu.memory_space<vmem>>, vector<16x64xbf16>
    %42 = arith.truncf %40 : vector<2x16xf32> to vector<2x16xbf16>
    %cst_23 = arith.constant dense<0.000000e+00> : vector<2x64xf32>
    %43 = tpu.matmul %42, %41, %cst_23 {dimension_numbers = #tpu.dot_dimension_numbers<[1], [0], [0], [1], [0, 0, 1, 1], [], []>} : vector<2x16xbf16>, vector<16x64xbf16>, vector<2x64xf32> -> vector<2x64xf32>
    %44 = arith.addf %39, %43 : vector<2x64xf32>
    %45 = vector.extract_strided_slice %44 {offsets = [0, 0], sizes = [2, 16], strides = [1, 1]} : vector<2x64xf32> to vector<2x16xf32>
    %46 = arith.negf %45 : vector<2x16xf32>
    %47 = math.exp %46 : vector<2x16xf32>
    %cst_24 = arith.constant 1.000000e+00 : f32
    %48 = vector.broadcast %cst_24 : f32 to vector<2x16xf32>
    %49 = arith.addf %48, %47 : vector<2x16xf32>
    %50 = arith.divf %48, %49 : vector<2x16xf32>
    %51 = vector.extract_strided_slice %44 {offsets = [0, 16], sizes = [2, 16], strides = [1, 1]} : vector<2x64xf32> to vector<2x16xf32>
    %52 = arith.negf %51 : vector<2x16xf32>
    %53 = math.exp %52 : vector<2x16xf32>
    %cst_25 = arith.constant 1.000000e+00 : f32
    %54 = vector.broadcast %cst_25 : f32 to vector<2x16xf32>
    %55 = arith.addf %54, %53 : vector<2x16xf32>
    %56 = arith.divf %54, %55 : vector<2x16xf32>
    %57 = vector.extract_strided_slice %44 {offsets = [0, 32], sizes = [2, 16], strides = [1, 1]} : vector<2x64xf32> to vector<2x16xf32>
    %58 = math.tanh %57 : vector<2x16xf32>
    %59 = vector.extract_strided_slice %44 {offsets = [0, 48], sizes = [2, 16], strides = [1, 1]} : vector<2x64xf32> to vector<2x16xf32>
    %60 = arith.negf %59 : vector<2x16xf32>
    %61 = math.exp %60 : vector<2x16xf32>
    %cst_26 = arith.constant 1.000000e+00 : f32
    %62 = vector.broadcast %cst_26 : f32 to vector<2x16xf32>
    %63 = arith.addf %62, %61 : vector<2x16xf32>
    %64 = arith.divf %62, %63 : vector<2x16xf32>
    %c0_27 = arith.constant 0 : index
    %c0_28 = arith.constant 0 : index
    %65 = vector.load %arg9[%c0_27, %c0_28] : memref<2x16xf32, #tpu.memory_space<vmem>>, vector<2x16xf32>
    %66 = arith.mulf %56, %65 : vector<2x16xf32>
    %67 = arith.mulf %50, %58 : vector<2x16xf32>
    %68 = arith.addf %66, %67 : vector<2x16xf32>
    %69 = math.tanh %68 : vector<2x16xf32>
    %70 = arith.mulf %64, %69 : vector<2x16xf32>
    %c0_29 = arith.constant 0 : index
    %c0_30 = arith.constant 0 : index
    %71 = vector.load %arg9[%c0_29, %c0_30] : memref<2x16xf32, #tpu.memory_space<vmem>>, vector<2x16xf32>
    tpu.vector_store %arg9[%c0_29, %c0_30], %68 {strides = array<i32>} : memref<2x16xf32, #tpu.memory_space<vmem>>, vector<2x16xf32>,
    %c0_31 = arith.constant 0 : index
    %c0_32 = arith.constant 0 : index
    %72 = vector.load %arg8[%c0_31, %c0_32] : memref<2x16xf32, #tpu.memory_space<vmem>>, vector<2x16xf32>
    tpu.vector_store %arg8[%c0_31, %c0_32], %70 {strides = array<i32>} : memref<2x16xf32, #tpu.memory_space<vmem>>, vector<2x16xf32>,
    %73 = vector.shape_cast %35 : vector<2x16xf32> to vector<1x1x2x16xf32>
    %c0_33 = arith.constant 0 : index
    %74 = arith.index_cast %arg0 : i32 to index
    %c0_34 = arith.constant 0 : index
    %c0_35 = arith.constant 0 : index
    %75 = vector.load %arg5[%c0_33, %74, %c0_34, %c0_35] : memref<2x4x2x16xf32, #tpu.memory_space<vmem>>, vector<1x1x2x16xf32>
    tpu.vector_store %arg5[%c0_33, %74, %c0_34, %c0_35], %73 {strides = array<i32>} : memref<2x4x2x16xf32, #tpu.memory_space<vmem>>, vector<1x1x2x16xf32>,
    %76 = vector.shape_cast %70 : vector<2x16xf32> to vector<1x1x2x16xf32>
    %c3_i32 = arith.constant 3 : i32
    %77 = arith.subi %c3_i32, %arg0 : i32
    %c1 = arith.constant 1 : index
    %78 = arith.index_cast %77 : i32 to index
    %c0_36 = arith.constant 0 : index
    %c0_37 = arith.constant 0 : index
    %79 = vector.load %arg5[%c1, %78, %c0_36, %c0_37] : memref<2x4x2x16xf32, #tpu.memory_space<vmem>>, vector<1x1x2x16xf32>
    tpu.vector_store %arg5[%c1, %78, %c0_36, %c0_37], %76 {strides = array<i32>} : memref<2x4x2x16xf32, #tpu.memory_space<vmem>>, vector<1x1x2x16xf32>,
    return
  }
  func.func @transform_0(%arg0: i32) -> (i32, i32, i32) {
    %c0_i32 = arith.constant 0 : i32
    %c0_i32_0 = arith.constant 0 : i32
    %c0_i32_1 = arith.constant 0 : i32
    return %arg0, %c0_i32, %c0_i32_0 : i32, i32, i32
  }
  func.func @transform_1(%arg0: i32) -> (i32, i32, i32) {
    %c3_i32 = arith.constant 3 : i32
    %0 = arith.subi %c3_i32, %arg0 : i32
    %c0_i32 = arith.constant 0 : i32
    %c0_i32_0 = arith.constant 0 : i32
    %c0_i32_1 = arith.constant 0 : i32
    return %0, %c0_i32, %c0_i32_0 : i32, i32, i32
  }
  func.func @transform_2(%arg0: i32) -> (i32, i32) {
    %c0_i32 = arith.constant 0 : i32
    %c0_i32_0 = arith.constant 0 : i32
    %c0_i32_1 = arith.constant 0 : i32
    return %c0_i32, %c0_i32_0 : i32, i32
  }
  func.func @transform_3(%arg0: i32) -> (i32, i32) {
    %c0_i32 = arith.constant 0 : i32
    %c0_i32_0 = arith.constant 0 : i32
    %c0_i32_1 = arith.constant 0 : i32
    return %c0_i32, %c0_i32_0 : i32, i32
  }
  func.func @transform_4(%arg0: i32) -> (i32, i32, i32, i32) {
    %c0_i32 = arith.constant 0 : i32
    %c0_i32_0 = arith.constant 0 : i32
    %c0_i32_1 = arith.constant 0 : i32
    %c0_i32_2 = arith.constant 0 : i32
    %c0_i32_3 = arith.constant 0 : i32
    return %c0_i32, %c0_i32_0, %c0_i32_1, %c0_i32_2 : i32, i32, i32, i32
  }
}

</mosaic_0001>

<bundles_post_ra>
// kernel: _lambda_.8
= control target key start
LH: loop header
LB: loop body
LE: loop exit
PB: predicated region body
PF: predicated region fallthrough
CT: control target
= control target key end

     0   :  { %vm22_vm0 = vcmask 261120   ;;  %v263_v16 = vmov 32.0   ;;  %s471_s0 = inlined_call_operand.vmem [shape: f32[64,32], index: 0, kind: input, shape index: {}]   ;;  %s472_s1 = inlined_call_operand.vmem [shape: f32[1,32], index: 1, kind: input, shape index: {}]   ;;  %s473_s2 = inlined_call_operand.vmem [shape: f32[1,32], index: 2, kind: input, shape index: {}]   ;;  %s474_s3 = inlined_call_operand.vmem [shape: f32[64,32], index: 3, kind: output, shape index: {}]  }
   0x1   :  { %v18_v0 = vld [vmem:[%s471_s0 + $0x20] sm:$0xff]  ;;  %v16_v1 = vld [vmem:[%s471_s0 + $0x10] sm:$0xff]  ;;  %v19_v6 = vld [vmem:[%s471_s0 + $0x28] sm:$0xff]  ;;  %245 = vrcp.f32 %v263_v16 }
   0x2   :  { %v14_v2 = vld [vmem:[%s471_s0] sm:$0xff]  ;;  %v35_v3 = vsel %vm22_vm0, %v18_v0, 0.0  ;;  %v29_v4 = vsel %vm22_vm0, %v16_v1, 0.0  ;;  %v17_v7 = vld [vmem:[%s471_s0 + $0x18] sm:$0xff]  ;;  %v15_v8 = vld [vmem:[%s471_s0 + $0x8] sm:$0xff]  ;;  %v38_v9 = vsel %vm22_vm0, %v19_v6, 0.0 }
   0x3   :  { %v23_v5 = vsel %vm22_vm0, %v14_v2, 0.0  ;;  %36 = vadd.xlane.f32.xlu2 %v35_v3  ;;  %30 = vadd.xlane.f32.xlu1 %v29_v4  ;;  %v32_v10 = vsel %vm22_vm0, %v17_v7, 0.0  ;;  %v26_v11 = vsel %vm22_vm0, %v15_v8, 0.0  ;;  %v21_v12 = vld [vmem:[%s471_s0 + $0x38] sm:$0xff]  ;;  %v20_v13 = vld [vmem:[%s471_s0 + $0x30] sm:$0xff] }
   0x4   :  { %24 = vadd.xlane.f32.xlu0 %v23_v5  ;;  %v44_v14 = vsel %vm22_vm0, %v21_v12, 0.0  ;;  %v41_v15 = vsel %vm22_vm0, %v20_v13, 0.0 }
   0x7   :  { %v246_v17 = vpop.eup %245 }
   0x8   :  { %v48_v18 = vmul.f32 32.0, %v246_v17  ;;  %vm52_vm1 = vweird.f32 %v246_v17 }
   0xa   :  { %v49_v19 = vsub.f32 1.0, %v48_v18 }
   0xb   :  { %39 = vadd.xlane.f32.xlu2 %v38_v9  ;;  %33 = vadd.xlane.f32.xlu1 %v32_v10 }
   0xc   :  { %27 = vadd.xlane.f32.xlu0 %v26_v11  ;;  %v50_v20 = vmul.f32 %v246_v17, %v49_v19 }
   0xe   :  { %v51_v21 = vadd.f32 %v246_v17, %v50_v20 }
  0x10   :  { %v316_v22 = vsel %vm52_vm1, %v246_v17, %v51_v21 }
  0x13   :  { %45 = vadd.xlane.f32.xlu1 %v44_v14 }
  0x14   :  { %42 = vadd.xlane.f32.xlu0 %v41_v15 }
  0x76   :  { %v37_v23 = vpop.xlane.xlu2 %36  ;;  %v31_v24 = vpop.xlane.xlu1 %30 }
  0x77   :  { %v56_v25 = vmul.f32 %v316_v22, %v31_v24  ;;  %v25_v26 = vpop.xlane.xlu0 %24  ;;  %v58_v39 = vmul.f32 %v316_v22, %v37_v23 }
  0x78   :  { %v54_v27 = vmul.f32 %v316_v22, %v25_v26 }
  0x79   :  { %v320_v28 = vsub.f32 %v16_v1, %v56_v25  ;;  %v344_v46 = vsub.f32 %v18_v0, %v58_v39 }
  0x7a   :  { %v322_v29 = vsub.f32 %v14_v2, %v54_v27 }
  0x7b   :  { %v72_v30 = vmul.f32 %v320_v28, %v320_v28  ;;  %v74_v55 = vmul.f32 %v344_v46, %v344_v46 }
  0x7c   :  { %v70_v31 = vmul.f32 %v322_v29, %v322_v29 }
  0x7d   :  { %v84_v32 = vsel %vm22_vm0, %v72_v30, 0.0  ;;  %v90_v58 = vsel %vm22_vm0, %v74_v55, 0.0 }
  0x7e   :  { %v40_v33 = vpop.xlane.xlu2 %39  ;;  %85 = vadd.xlane.f32.xlu1 %v84_v32  ;;  %v34_v34 = vpop.xlane.xlu1 %33  ;;  %v78_v35 = vsel %vm22_vm0, %v70_v31, 0.0 }
  0x7f   :  { %v59_v36 = vmul.f32 %v316_v22, %v40_v33  ;;  %v57_v37 = vmul.f32 %v316_v22, %v34_v34  ;;  %79 = vadd.xlane.f32.xlu2 %v78_v35  ;;  %v28_v38 = vpop.xlane.xlu0 %27 }
  0x80   :  { %v55_v40 = vmul.f32 %v316_v22, %v28_v38 }
  0x81   :  { %v334_v41 = vsub.f32 %v19_v6, %v59_v36  ;;  %v336_v42 = vsub.f32 %v17_v7, %v57_v37  ;;  %v384_v37 = vld [vmem:[%s472_s1] ss:$0 sm:$0xff] }
  0x82   :  { %v338_v43 = vsub.f32 %v15_v8, %v55_v40 }
  0x83   :  { %v75_v44 = vmul.f32 %v334_v41, %v334_v41  ;;  %v73_v45 = vmul.f32 %v336_v42, %v336_v42 }
  0x84   :  { %v71_v47 = vmul.f32 %v338_v43, %v338_v43 }
  0x85   :  { %v93_v48 = vsel %vm22_vm0, %v75_v44, 0.0  ;;  %v87_v49 = vsel %vm22_vm0, %v73_v45, 0.0 }
  0x86   :  { %94 = vadd.xlane.f32.xlu1 %v93_v48  ;;  %v81_v50 = vsel %vm22_vm0, %v71_v47, 0.0  ;;  %v46_v51 = vpop.xlane.xlu1 %45  ;;  %v394_v48 = vld [vmem:[%s473_s2] ss:$0 sm:$0xff] }
  0x87   :  { %88 = vadd.xlane.f32.xlu2 %v87_v49  ;;  %82 = vadd.xlane.f32.xlu0 %v81_v50  ;;  %v43_v52 = vpop.xlane.xlu0 %42  ;;  %v61_v54 = vmul.f32 %v316_v22, %v46_v51 }
  0x88   :  { %v60_v53 = vmul.f32 %v316_v22, %v43_v52 }
  0x89   :  { %v357_v57 = vsub.f32 %v21_v12, %v61_v54 }
  0x8a   :  { %v355_v56 = vsub.f32 %v20_v13, %v60_v53 }
  0x8b   :  { %v77_v61 = vmul.f32 %v357_v57, %v357_v57 }
  0x8c   :  { %v76_v59 = vmul.f32 %v355_v56, %v355_v56 }
  0x8d   :  { %v99_v62 = vsel %vm22_vm0, %v77_v61, 0.0 }
  0x8e   :  { %v96_v60 = vsel %vm22_vm0, %v76_v59, 0.0 }
  0x8f   :  { %91 = vadd.xlane.f32.xlu0 %v90_v58  ;;  %97 = vadd.xlane.f32.xlu2 %v96_v60 }
  0x97   :  { %100 = vadd.xlane.f32.xlu0 %v99_v62 }
  0xf1   :  { %v86_v63 = vpop.xlane.xlu1 %85 }
  0xf2   :  { %v104_v0 = vmul.f32 %v86_v63, %v316_v22  ;;  %v80_v1 = vpop.xlane.xlu2 %79 }
  0xf3   :  { %v102_v2 = vmul.f32 %v80_v1, %v316_v22 }
  0xf4   :  { %v112_v3 = vadd.f32 1e-12, %v104_v0 }
  0xf5   :  { %v110_v4 = vadd.f32 1e-12, %v102_v2 }
  0xf6   :  { %247 = vrsqrt.f32 %v112_v3  ;;  %vm144_vm2 = vweird.f32 %v112_v3 }
  0xf7   :  { %249 = vrsqrt.f32 %v110_v4  ;;  %vm124_vm6 = vweird.f32 %v110_v4 }
  0xf9   :  { %v95_v5 = vpop.xlane.xlu1 %94 }
  0xfa   :  { %v107_v6 = vmul.f32 %v95_v5, %v316_v22  ;;  %v89_v7 = vpop.xlane.xlu2 %88  ;;  %v83_v8 = vpop.xlane.xlu0 %82 }
  0xfb   :  { %v105_v9 = vmul.f32 %v89_v7, %v316_v22  ;;  %v103_v10 = vmul.f32 %v83_v8, %v316_v22 }
  0xfc   :  { %v248_v11 = vpop.eup %247  ;;  %v115_v12 = vadd.f32 1e-12, %v107_v6 }
  0xfd   :  { %v250_v13 = vpop.eup %249  ;;  %v139_v14 = vmul.f32 %v248_v11, %v112_v3  ;;  %v371_v15 = vadd.f32 1e-12, %v105_v9  ;;  %v373_v16 = vadd.f32 1e-12, %v103_v10  ;;  %vm145_vm3 = vweird.f32 %v248_v11 }
  0xfe   :  { %v119_v17 = vmul.f32 %v250_v13, %v110_v4  ;;  %251 = vrsqrt.f32 %v115_v12  ;;  %vm125_vm4 = vweird.f32 %v250_v13  ;;  %vm146_vm5 = vmor %vm144_vm2, %vm145_vm3  ;;  %vm174_vm8 = vweird.f32 %v115_v12 }
  0xff   :  { %v140_v18 = vmul.f32 %v248_v11, %v139_v14  ;;  %253 = vrsqrt.f32 %v371_v15  ;;  %vm126_vm7 = vmor %vm124_vm6, %vm125_vm4  ;;  %vm154_vm10 = vweird.f32 %v371_v15  ;;  %vm134_vm15 = vweird.f32 %v373_v16 }
 0x100   :  { %v120_v19 = vmul.f32 %v250_v13, %v119_v17  ;;  %255 = vrsqrt.f32 %v373_v16 }
 0x101   :  { %v141_v20 = vmul.f32 0.5, %v140_v18 }
 0x102   :  { %v121_v21 = vmul.f32 0.5, %v120_v19  ;;  %v98_v23 = vpop.xlane.xlu2 %97  ;;  %v92_v24 = vpop.xlane.xlu0 %91 }
 0x103   :  { %v142_v25 = vsub.f32 1.5, %v141_v20  ;;  %v108_v26 = vmul.f32 %v98_v23, %v316_v22  ;;  %v106_v27 = vmul.f32 %v92_v24, %v316_v22 }
 0x104   :  { %v252_v30 = vpop.eup %251  ;;  %v122_v31 = vsub.f32 1.5, %v121_v21 }
 0x105   :  { %v254_v32 = vpop.eup %253  ;;  %v143_v33 = vmul.f32 %v248_v11, %v142_v25  ;;  %v169_v34 = vmul.f32 %v252_v30, %v115_v12  ;;  %v379_v35 = vadd.f32 1e-12, %v108_v26  ;;  %v388_v40 = vadd.f32 1e-12, %v106_v27 }
 0x106   :  { %v256_v36 = vpop.eup %255  ;;  %v123_v38 = vmul.f32 %v250_v13, %v122_v31  ;;  %v149_v39 = vmul.f32 %v254_v32, %v371_v15  ;;  %vm175_vm9 = vweird.f32 %v252_v30  ;;  %vm155_vm12 = vweird.f32 %v254_v32 }
 0x107   :  { %v147_v44 = vsel %vm146_vm5, %v248_v11, %v143_v33  ;;  %v170_v45 = vmul.f32 %v252_v30, %v169_v34  ;;  %v129_v47 = vmul.f32 %v256_v36, %v373_v16  ;;  %257 = vrsqrt.f32 %v379_v35  ;;  %vm406_vm11 = vmor %vm174_vm8, %vm175_vm9 }
 0x108   :  { %v200_v49 = vmul.f32 %v147_v44, %v320_v28  ;;  %v127_v50 = vsel %vm126_vm7, %v250_v13, %v123_v38  ;;  %v150_v51 = vmul.f32 %v254_v32, %v149_v39  ;;  %259 = vrsqrt.f32 %v388_v40  ;;  %vm156_vm14 = vmor %vm154_vm10, %vm155_vm12 }
 0x109   :  { %v198_v52 = vmul.f32 %v127_v50, %v322_v29  ;;  %v171_v53 = vmul.f32 0.5, %v170_v45  ;;  %v130_v54 = vmul.f32 %v256_v36, %v129_v47  ;;  %vm135_vm13 = vweird.f32 %v256_v36 }
 0x10a   :  { %v212_v55 = vmul.f32 %v384_v37, %v200_v49  ;;  %v151_v58 = vmul.f32 0.5, %v150_v51  ;;  %v101_v59 = vpop.xlane.xlu0 %100  ;;  %vm136_vm1 = vmor %vm134_vm15, %vm135_vm13  ;;  %vm184_vm2 = vweird.f32 %v379_v35  ;;  %vm164_vm6 = vweird.f32 %v388_v40 }
 0x10b   :  { %v210_v60 = vmul.f32 %v384_v37, %v198_v52  ;;  %v172_v28 = vsub.f32 1.5, %v171_v53  ;;  %v131_v61 = vmul.f32 0.5, %v130_v54  ;;  %v109_v62 = vmul.f32 %v101_v59, %v316_v22 }
 0x10c   :  { %v224_v63 = vadd.f32 %v394_v48, %v212_v55  ;;  %v152_v0 = vsub.f32 1.5, %v151_v58 }
 0x10d   :  { %v222_v1 = vadd.f32 %v394_v48, %v210_v60  ;;  %v173_v2 = vmul.f32 %v252_v30, %v172_v28  ;;  %v132_v3 = vsub.f32 1.5, %v131_v61  ;;  %v117_v4 = vadd.f32 1e-12, %v109_v62  ;;  %v258_v5 = vpop.eup %257 }
 0x10e   :  { %232 = vst.msk [vmem:[%s474_s3 + $0x10] sm:$0xff] %vm22_vm0, %v224_v63  ;;  %v153_v22 = vmul.f32 %v254_v32, %v152_v0  ;;  %v179_v8 = vmul.f32 %v258_v5, %v379_v35  ;;  %v260_v9 = vpop.eup %259  ;;  %vm185_vm3 = vweird.f32 %v258_v5 }
 0x10f   :  { %230 = vst.msk [vmem:[%s474_s3] sm:$0xff] %vm22_vm0, %v222_v1  ;;  %v177_v6 = vsel %vm406_vm11, %v252_v30, %v173_v2  ;;  %v133_v7 = vmul.f32 %v256_v36, %v132_v3  ;;  %261 = vrsqrt.f32 %v117_v4  ;;  %v159_v17 = vmul.f32 %v260_v9, %v388_v40  ;;  %vm186_vm5 = vmor %vm184_vm2, %vm185_vm3 }
 0x110   :  { %v203_v10 = vmul.f32 %v177_v6, %v334_v41  ;;  %v157_v11 = vsel %vm156_vm14, %v254_v32, %v153_v22  ;;  %v180_v14 = vmul.f32 %v258_v5, %v179_v8  ;;  %vm165_vm4 = vweird.f32 %v260_v9 }
 0x111   :  { %v201_v12 = vmul.f32 %v157_v11, %v336_v42  ;;  %v137_v13 = vsel %vm136_vm1, %v256_v36, %v133_v7  ;;  %v160_v20 = vmul.f32 %v260_v9, %v159_v17  ;;  %vm166_vm7 = vmor %vm164_vm6, %vm165_vm4  ;;  %vm194_vm9 = vweird.f32 %v117_v4 }
 0x112   :  { %v215_v15 = vmul.f32 %v384_v37, %v203_v10  ;;  %v199_v18 = vmul.f32 %v137_v13, %v338_v43  ;;  %v181_v19 = vmul.f32 0.5, %v180_v14 }
 0x113   :  { %v213_v16 = vmul.f32 %v384_v37, %v201_v12  ;;  %v161_v24 = vmul.f32 0.5, %v160_v20 }
 0x114   :  { %v227_v41 = vadd.f32 %v394_v48, %v215_v15  ;;  %v211_v21 = vmul.f32 %v384_v37, %v199_v18  ;;  %v182_v23 = vsub.f32 1.5, %v181_v19 }
 0x115   :  { %v225_v42 = vadd.f32 %v394_v48, %v213_v16  ;;  %v262_v25 = vpop.eup %261  ;;  %v162_v27 = vsub.f32 1.5, %v161_v24 }
 0x116   :  { %235 = vst.msk [vmem:[%s474_s3 + $0x28] sm:$0xff] %vm22_vm0, %v227_v41  ;;  %v223_v43 = vadd.f32 %v394_v48, %v211_v21  ;;  %v183_v26 = vmul.f32 %v258_v5, %v182_v23  ;;  %v189_v30 = vmul.f32 %v262_v25, %v117_v4  ;;  %vm195_vm8 = vweird.f32 %v262_v25 }
 0x117   :  { %233 = vst.msk [vmem:[%s474_s3 + $0x18] sm:$0xff] %vm22_vm0, %v225_v42  ;;  %v163_v32 = vmul.f32 %v260_v9, %v162_v27  ;;  %vm196_vm10 = vmor %vm194_vm9, %vm195_vm8 }
 0x118   :  { %231 = vst.msk [vmem:[%s474_s3 + $0x8] sm:$0xff] %vm22_vm0, %v223_v43  ;;  %v187_v31 = vsel %vm186_vm5, %v258_v5, %v183_v26  ;;  %v190_v33 = vmul.f32 %v262_v25, %v189_v30 }
 0x119   :  { %v204_v34 = vmul.f32 %v187_v31, %v355_v56  ;;  %v167_v35 = vsel %vm166_vm7, %v260_v9, %v163_v32 }
 0x11a   :  { %v191_v36 = vmul.f32 0.5, %v190_v33  ;;  %v202_v39 = vmul.f32 %v167_v35, %v344_v46 }
 0x11b   :  { %v216_v38 = vmul.f32 %v384_v37, %v204_v34 }
 0x11c   :  { %v192_v44 = vsub.f32 1.5, %v191_v36  ;;  %v214_v47 = vmul.f32 %v384_v37, %v202_v39 }
 0x11d   :  { %v228_v45 = vadd.f32 %v394_v48, %v216_v38 }
 0x11e   :  { %v193_v49 = vmul.f32 %v262_v25, %v192_v44  ;;  %v226_v56 = vadd.f32 %v394_v48, %v214_v47 }
 0x11f   :  { %236 = vst.msk [vmem:[%s474_s3 + $0x30] sm:$0xff] %vm22_vm0, %v228_v45 }
 0x120   :  { %v197_v40 = vsel %vm196_vm10, %v262_v25, %v193_v49  ;;  %234 = vst.msk [vmem:[%s474_s3 + $0x20] sm:$0xff] %vm22_vm0, %v226_v56 }
 0x121   :  { %v205_v46 = vmul.f32 %v197_v40, %v357_v57 }
 0x123   :  { %v217_v50 = vmul.f32 %v384_v37, %v205_v46 }
 0x125   :  { %v229_v51 = vadd.f32 %v394_v48, %v217_v50 }
 0x127   :  { %237 = vst.msk [vmem:[%s474_s3 + $0x38] sm:$0xff] %vm22_vm0, %v229_v51 }

// kernel: _lambda_.13
= control target key start
LH: loop header
LB: loop body
LE: loop exit
PB: predicated region body
PF: predicated region fallthrough
CT: control target
= control target key end

     0   :  { %v142_v1 = vmov 0   ;;  %vm46_vm0 = vcmask 261120   ;;  %s208_s1 = inlined_call_operand.vmem [shape: bf16[32,32], index: 1, kind: input, shape index: {}]   ;;  %s209_s0 = inlined_call_operand.vmem [shape: f32[8,32], index: 0, kind: input, shape index: {}]   ;;  %s210_s3 = inlined_call_operand.vmem [shape: f32[8,1], index: 3, kind: input, shape index: {}]   ;;  %s211_s2 = inlined_call_operand.vmem [shape: f32[1,32], index: 2, kind: input, shape index: {}]   ;;  %s212_s5 = inlined_call_operand.vmem [shape: f32[1,32], index: 5, kind: input, shape index: {}]   ;;  %s213_s4 = inlined_call_operand.vmem [shape: bf16[32,32], index: 4, kind: input, shape index: {}]   ;;  %s214_s6 = inlined_call_operand.vmem [shape: f32[8,32], index: 6, kind: output, shape index: {}]  }
   0x1   :  { %v133_v0 = vld [vmem:[%s208_s1 + $0x8] sm:$0xff]  ;;  %137 = vset.pattern.permute.xlu0 %v142_v1  ;;  %v64_v2 = vld [vmem:[%s210_s3] sm:$0xff] }
   0x2   :  { %56 = vmatpush.bf16.msra.mxu0 %v133_v0  ;;  %v132_v3 = vld [vmem:[%s208_s1] sm:$0xff]  ;;  %67 = vperm.xlu0 %137, %v64_v2   ;;  %v135_v6 = vld [vmem:[%s213_s4 + $0x8] sm:$0xff] }
   0x3   :  { %v24_v4 = vld [vmem:[%s209_s0] sm:$0xff]  ;;  %101 = vmatpush.bf16.msra.mxu1 %v135_v6 }
   0x4   :  { %v29_v5 = vpack.c.bf16 %v24_v4, %v24_v4  ;;  %v134_v7 = vld [vmem:[%s213_s4] sm:$0xff] }
   0x5   :  { %v138_v8 = vld [vmem:[%s211_s2] ss:$0 sm:$0xff] }
   0x6   :  { %57 = vmatpush.bf16.msra.mxu0 %v132_v3  ;;  %v139_v16 = vld [vmem:[%s212_s5] ss:$0 sm:$0xff] }
   0x7   :  { %102 = vmatpush.bf16.msra.mxu1 %v134_v7 }
   0x9   :  { %122 = vmatmul.msk.bf16.vlgmr.msra.gmra.mxu0 %vm46_vm0, %v29_v5 }
  0x74   :  { %v68_v11 = vpop.permute.xlu0 %67 }
  0x86   :  { %v59_v9 = vpop.f32.mrf.mxu0 }
  0x87   :  { %v60_v10 = vadd.f32 %v138_v8, %v59_v9 }
  0x89   :  { %140 = vtanh.f32 %v60_v10 }
  0x8e   :  { %v61_v12 = vpop.f32.mrf.mxu0 }
  0x8f   :  { %v141_v13 = vpop.eup %140 }
  0x90   :  { %v70_v14 = vmul.f32 %v141_v13, %v68_v11 }
  0x92   :  { %v75_v15 = vpack.c.bf16 %v70_v14, %v70_v14 }
  0x94   :  { %131 = vmatmul.msk.bf16.vlgmr.msra.gmra.mxu1 %vm46_vm0, %v75_v15 }
 0x111   :  { %v104_v17 = vpop.f32.mrf.mxu1 }
 0x112   :  { %v105_v18 = vadd.f32 %v139_v16, %v104_v17 }
 0x114   :  { %v108_v19 = vmax.f32 %v105_v18, 0.0 }
 0x116   :  { %109 = vst.msk [vmem:[%s214_s6] sm:$0xff] %vm46_vm0, %v108_v19 }
 0x119   :  { %v106_v20 = vpop.f32.mrf.mxu1 }

// kernel: _lambda_.10
= control target key start
LH: loop header
LB: loop body
LE: loop exit
PB: predicated region body
PF: predicated region fallthrough
CT: control target
= control target key end

     0   :  { %vm59_vm0 = vcmask 261120   ;;  %vm213_vm1 = vcmask 523264   ;;  %s843_s1 = inlined_call_operand.vmem [shape: bf16[32,64], index: 1, kind: input, shape index: {}]   ;;  %s844_s0 = inlined_call_operand.vmem [shape: f32[64,32], index: 0, kind: input, shape index: {}]   ;;  %s845_s2 = inlined_call_operand.vmem [shape: f32[1,64], index: 2, kind: input, shape index: {}]   ;;  %s846_s4 = inlined_call_operand.vmem [shape: f32[1,32], index: 4, kind: input, shape index: {}]   ;;  %s847_s3 = inlined_call_operand.vmem [shape: bf16[64,32], index: 3, kind: input, shape index: {}]   ;;  %s848_s5 = inlined_call_operand.vmem [shape: f32[1,32], index: 5, kind: input, shape index: {}]   ;;  %s849_s6 = inlined_call_operand.vmem [shape: f32[1,32], index: 6, kind: input, shape index: {}]   ;;  %s850_s7 = inlined_call_operand.vmem [shape: f32[64,32], index: 7, kind: output, shape index: {}]  }
   0x1   :  { %v515_v0 = vld [vmem:[%s843_s1 + $0x8] sm:$0xff]  ;;  %v514_v1 = vld [vmem:[%s843_s1] sm:$0xff]  ;;  %v625_v4 = vld [vmem:[%s844_s0 + $0x10] sm:$0xff] }
   0x2   :  { %v615_v2 = vld [vmem:[%s844_s0] sm:$0xff]  ;;  %78 = vmatpush.bf16.msra.mxu0 %v515_v0  ;;  %520 = vmatpush.bf16.msra.mxu3 %v515_v0  ;;  %v620_v3 = vld [vmem:[%s844_s0 + $0x8] sm:$0xff]  ;;  %v630_v5 = vld [vmem:[%s844_s0 + $0x18] sm:$0xff] }
   0x3   :  { %v39_v6 = vpack.c.bf16 %v620_v3, %v615_v2  ;;  %v40_v7 = vpack.c.bf16 %v630_v5, %v625_v4  ;;  %v641_v8 = vld [vmem:[%s844_s0 + $0x20] sm:$0xff]  ;;  %v646_v9 = vld [vmem:[%s844_s0 + $0x28] sm:$0xff]  ;;  %v654_v11 = vld [vmem:[%s844_s0 + $0x30] sm:$0xff] }
   0x4   :  { %v41_v10 = vpack.c.bf16 %v646_v9, %v641_v8  ;;  %v659_v12 = vld [vmem:[%s844_s0 + $0x38] sm:$0xff]  ;;  %v518_v15 = vld [vmem:[%s847_s3 + $0x10] sm:$0xff]  ;;  %v517_v16 = vld [vmem:[%s847_s3 + $0x8] sm:$0xff] }
   0x5   :  { %v42_v13 = vpack.c.bf16 %v659_v12, %v654_v11  ;;  %v519_v14 = vld [vmem:[%s847_s3 + $0x18] sm:$0xff]  ;;  %v676_v17 = vld [vmem:[%s845_s2] ss:$0 sm:$0xff] }
   0x6   :  { %79 = vmatpush.bf16.msra.mxu0 %v514_v1  ;;  %521 = vmatpush.bf16.msra.mxu3 %v514_v1  ;;  %v516_v18 = vld [vmem:[%s847_s3] sm:$0xff] }
   0x7   :  { %230 = vmatpush.bf16.msra.mxu1 %v519_v14  ;;  %522 = vmatpush.bf16.msra.mxu2 %v519_v14 }
   0x9   :  { %490 = vmatmul.msk.bf16.vlgmr.msra.gmra.mxu0 %vm59_vm0, %v39_v6  ;;  %491 = vmatmul.msk.bf16.vlgmr.msra.gmra.mxu3 %vm59_vm0, %v40_v7 }
   0xb   :  { %231 = vmatpush.bf16.msra.mxu1 %v518_v15  ;;  %523 = vmatpush.bf16.msra.mxu2 %v518_v15 }
   0xf   :  { %232 = vmatpush.bf16.msra.mxu1 %v517_v16  ;;  %524 = vmatpush.bf16.msra.mxu2 %v517_v16 }
  0x13   :  { %233 = vmatpush.bf16.msra.mxu1 %v516_v18  ;;  %525 = vmatpush.bf16.msra.mxu2 %v516_v18 }
  0x19   :  { %492 = vmatmul.msk.bf16.gmra.mxu3 %vm59_vm0, %v41_v10 }
  0x29   :  { %493 = vmatmul.msk.bf16.gmra.mxu3 %vm59_vm0, %v42_v13 }
  0x86   :  { %v81_v19 = vpop.f32.mrf.mxu0 }
  0x87   :  { %v82_v20 = vadd.f32 %v676_v17, %v81_v19 }
  0x89   :  { %v101_v21 = vmul.f32 %v82_v20, %v82_v20 }
  0x8b   :  { %v109_v22 = vmul.f32 %v101_v21, %v82_v20 }
  0x8c   :  { %v86_v23 = vpop.f32.mrf.mxu3 }
  0x8d   :  { %v117_v24 = vmul.f32 0.044715, %v109_v22  ;;  %v683_v25 = vadd.f32 %v676_v17, %v86_v23 }
  0x8e   :  { %v83_v26 = vpop.f32.mrf.mxu0 }
  0x8f   :  { %v125_v27 = vadd.f32 %v117_v24, %v82_v20  ;;  %v84_v28 = vadd.f32 %v676_v17, %v83_v26  ;;  %v103_v30 = vmul.f32 %v683_v25, %v683_v25 }
  0x91   :  { %v133_v29 = vmul.f32 0.7978846, %v125_v27  ;;  %v102_v31 = vmul.f32 %v84_v28, %v84_v28  ;;  %v111_v34 = vmul.f32 %v103_v30, %v683_v25 }
  0x93   :  { %v110_v32 = vmul.f32 %v102_v31, %v84_v28  ;;  %531 = vtanh.f32 %v133_v29  ;;  %v119_v39 = vmul.f32 0.044715, %v111_v34 }
  0x94   :  { %v88_v33 = vpop.f32.mrf.mxu3 }
  0x95   :  { %v118_v35 = vmul.f32 0.044715, %v110_v32  ;;  %v89_v36 = vadd.f32 %v676_v17, %v88_v33  ;;  %v127_v45 = vadd.f32 %v119_v39, %v683_v25 }
  0x97   :  { %v126_v37 = vadd.f32 %v118_v35, %v84_v28  ;;  %v104_v38 = vmul.f32 %v89_v36, %v89_v36  ;;  %v135_v52 = vmul.f32 0.7978846, %v127_v45 }
  0x99   :  { %v134_v40 = vmul.f32 0.7978846, %v126_v37  ;;  %v112_v41 = vmul.f32 %v104_v38, %v89_v36  ;;  %v532_v42 = vpop.eup %531 }
  0x9a   :  { %v149_v48 = vadd.f32 1.0, %v532_v42 }
  0x9b   :  { %533 = vtanh.f32 %v134_v40  ;;  %v120_v43 = vmul.f32 0.044715, %v112_v41 }
  0x9c   :  { %v91_v44 = vpop.f32.mrf.mxu3  ;;  %v157_v55 = vmul.f32 0.5, %v149_v48 }
  0x9d   :  { %v128_v46 = vadd.f32 %v120_v43, %v89_v36  ;;  %v92_v47 = vadd.f32 %v676_v17, %v91_v44 }
  0x9e   :  { %v165_v61 = vmul.f32 %v157_v55, %v82_v20 }
  0x9f   :  { %v136_v49 = vmul.f32 0.7978846, %v128_v46  ;;  %v105_v50 = vmul.f32 %v92_v47, %v92_v47 }
  0xa1   :  { %v534_v51 = vpop.eup %533  ;;  %v113_v53 = vmul.f32 %v105_v50, %v92_v47  ;;  %535 = vtanh.f32 %v136_v49 }
  0xa2   :  { %v150_v54 = vadd.f32 1.0, %v534_v51  ;;  %537 = vtanh.f32 %v135_v52 }
  0xa3   :  { %v121_v56 = vmul.f32 0.044715, %v113_v53 }
  0xa4   :  { %v93_v57 = vpop.f32.mrf.mxu3  ;;  %v158_v58 = vmul.f32 0.5, %v150_v54 }
  0xa5   :  { %v129_v59 = vadd.f32 %v121_v56, %v92_v47  ;;  %v94_v60 = vadd.f32 %v676_v17, %v93_v57 }
  0xa6   :  { %v166_v62 = vmul.f32 %v158_v58, %v84_v28 }
  0xa7   :  { %v137_v63 = vmul.f32 0.7978846, %v129_v59  ;;  %v106_v0 = vmul.f32 %v94_v60, %v94_v60  ;;  %v536_v6 = vpop.eup %535 }
  0xa8   :  { %v181_v1 = vpack.c.bf16 %v166_v62, %v165_v61  ;;  %v538_v10 = vpop.eup %537  ;;  %v152_v15 = vadd.f32 1.0, %v536_v6 }
  0xa9   :  { %v114_v7 = vmul.f32 %v106_v0, %v94_v60  ;;  %539 = vtanh.f32 %v137_v63  ;;  %v151_v19 = vadd.f32 1.0, %v538_v10 }
  0xaa   :  { %510 = vmatmul.msk.bf16.vlgmr.msra.gmra.mxu1 %vm213_vm1, %v181_v1  ;;  %v160_v22 = vmul.f32 0.5, %v152_v15 }
  0xab   :  { %v122_v13 = vmul.f32 0.044715, %v114_v7  ;;  %v159_v26 = vmul.f32 0.5, %v151_v19 }
  0xac   :  { %v96_v14 = vpop.f32.mrf.mxu3  ;;  %v168_v29 = vmul.f32 %v160_v22, %v89_v36 }
  0xad   :  { %v130_v16 = vadd.f32 %v122_v13, %v94_v60  ;;  %v97_v18 = vadd.f32 %v676_v17, %v96_v14  ;;  %v167_v33 = vmul.f32 %v159_v26, %v683_v25 }
  0xaf   :  { %v138_v21 = vmul.f32 0.7978846, %v130_v16  ;;  %v107_v20 = vmul.f32 %v97_v18, %v97_v18  ;;  %v540_v23 = vpop.eup %539  ;;  %v182_v38 = vpack.c.bf16 %v168_v29, %v167_v33  ;;  %v565_v29 = vmov 32.0  }
  0xb0   :  { %v153_v30 = vadd.f32 1.0, %v540_v23 }
  0xb1   :  { %541 = vtanh.f32 %v138_v21  ;;  %v115_v24 = vmul.f32 %v107_v20, %v97_v18 }
  0xb2   :  { %v161_v40 = vmul.f32 0.5, %v153_v30 }
  0xb3   :  { %v123_v27 = vmul.f32 0.044715, %v115_v24 }
  0xb4   :  { %v98_v28 = vpop.f32.mrf.mxu3  ;;  %v169_v44 = vmul.f32 %v161_v40, %v92_v47  ;;  %v528_v47 = vld [vmem:[%s846_s4] ss:$0 sm:$0xff] }
  0xb5   :  { %v131_v31 = vadd.f32 %v123_v27, %v97_v18  ;;  %v99_v32 = vadd.f32 %v676_v17, %v98_v28 }
  0xb7   :  { %v542_v34 = vpop.eup %541  ;;  %v139_v35 = vmul.f32 0.7978846, %v131_v31  ;;  %v108_v37 = vmul.f32 %v99_v32, %v99_v32 }
  0xb8   :  { %v154_v39 = vadd.f32 1.0, %v542_v34 }
  0xb9   :  { %v116_v41 = vmul.f32 %v108_v37, %v99_v32  ;;  %543 = vtanh.f32 %v139_v35 }
  0xba   :  { %511 = vmatmul.msk.bf16.gmra.mxu1 %vm213_vm1, %v182_v38  ;;  %v162_v42 = vmul.f32 0.5, %v154_v39 }
  0xbb   :  { %v124_v43 = vmul.f32 0.044715, %v116_v41 }
  0xbc   :  { %v170_v36 = vmul.f32 %v162_v42, %v94_v60 }
  0xbd   :  { %v132_v45 = vadd.f32 %v124_v43, %v99_v32 }
  0xbe   :  { %v183_v46 = vpack.c.bf16 %v170_v36, %v169_v44 }
  0xbf   :  { %v140_v48 = vmul.f32 0.7978846, %v132_v45  ;;  %v544_v17 = vpop.eup %543 }
  0xc0   :  { %512 = vmatmul.msk.bf16.vlgmr.msra.gmra.mxu2 %vm213_vm1, %v183_v46  ;;  %v155_v25 = vadd.f32 1.0, %v544_v17 }
  0xc1   :  { %545 = vtanh.f32 %v140_v48 }
  0xc2   :  { %v163_v51 = vmul.f32 0.5, %v155_v25  ;;  %547 = vrcp.f32 %v565_v29  ;;  %v775_v29 = vld [vmem:[%s848_s5] ss:$0 sm:$0xff] }
  0xc4   :  { %v171_v53 = vmul.f32 %v163_v51, %v97_v18 }
  0xc7   :  { %v546_v49 = vpop.eup %545 }
  0xc8   :  { %v156_v50 = vadd.f32 1.0, %v546_v49 }
  0xca   :  { %v164_v52 = vmul.f32 0.5, %v156_v50 }
  0xcc   :  { %v172_v54 = vmul.f32 %v164_v52, %v99_v32 }
  0xce   :  { %v184_v55 = vpack.c.bf16 %v172_v54, %v171_v53 }
  0xd0   :  { %513 = vmatmul.msk.bf16.gmra.mxu2 %vm213_vm1, %v184_v55 }
 0x127   :  { %v235_v56 = vpop.f32.mrf.mxu1 }
 0x128   :  { %v236_v57 = vadd.f32 %v528_v47, %v235_v56 }
 0x12a   :  { %v255_v58 = vadd.f32 %v236_v57, %v615_v2 }
 0x12c   :  { %v263_v59 = vsel %vm59_vm0, %v255_v58, 0.0 }
 0x12d   :  { %264 = vadd.xlane.f32.xlu0 %v263_v59 }
 0x12f   :  { %v237_v60 = vpop.f32.mrf.mxu1 }
 0x130   :  { %v238_v61 = vadd.f32 %v528_v47, %v237_v60 }
 0x132   :  { %v256_v62 = vadd.f32 %v238_v61, %v620_v3 }
 0x134   :  { %v266_v63 = vsel %vm59_vm0, %v256_v62, 0.0 }
 0x135   :  { %267 = vadd.xlane.f32.xlu0 %v266_v63 }
 0x137   :  { %v240_v0 = vpop.f32.mrf.mxu1 }
 0x138   :  { %v241_v1 = vadd.f32 %v528_v47, %v240_v0 }
 0x13a   :  { %v257_v6 = vadd.f32 %v241_v1, %v625_v4 }
 0x13c   :  { %v269_v7 = vsel %vm59_vm0, %v257_v6, 0.0 }
 0x13d   :  { %270 = vadd.xlane.f32.xlu1 %v269_v7 }
 0x13f   :  { %v242_v10 = vpop.f32.mrf.mxu1 }
 0x140   :  { %v243_v13 = vadd.f32 %v528_v47, %v242_v10 }
 0x142   :  { %v258_v2 = vadd.f32 %v243_v13, %v630_v5 }
 0x143   :  { %v245_v14 = vpop.f32.mrf.mxu2 }
 0x144   :  { %v246_v15 = vadd.f32 %v528_v47, %v245_v14  ;;  %v272_v16 = vsel %vm59_vm0, %v258_v2, 0.0 }
 0x145   :  { %273 = vadd.xlane.f32.xlu1 %v272_v16 }
 0x146   :  { %v259_v3 = vadd.f32 %v246_v15, %v641_v8 }
 0x148   :  { %v275_v18 = vsel %vm59_vm0, %v259_v3, 0.0 }
 0x149   :  { %276 = vadd.xlane.f32.xlu2 %v275_v18 }
 0x14b   :  { %v247_v19 = vpop.f32.mrf.mxu2 }
 0x14c   :  { %v248_v21 = vadd.f32 %v528_v47, %v247_v19 }
 0x14e   :  { %v260_v4 = vadd.f32 %v248_v21, %v646_v9  ;;  %v548_v9 = vpop.eup %547 }
 0x14f   :  { %v288_v30 = vmul.f32 32.0, %v548_v9  ;;  %vm292_vm2 = vweird.f32 %v548_v9 }
 0x150   :  { %v278_v20 = vsel %vm59_vm0, %v260_v4, 0.0 }
 0x151   :  { %279 = vadd.xlane.f32.xlu2 %v278_v20  ;;  %v289_v31 = vsub.f32 1.0, %v288_v30 }
 0x153   :  { %v250_v22 = vpop.f32.mrf.mxu2  ;;  %v290_v32 = vmul.f32 %v548_v9, %v289_v31  ;;  %v780_v31 = vld [vmem:[%s849_s6] ss:$0 sm:$0xff] }
 0x154   :  { %v251_v23 = vadd.f32 %v528_v47, %v250_v22 }
 0x155   :  { %v291_v33 = vadd.f32 %v548_v9, %v290_v32 }
 0x156   :  { %v261_v5 = vadd.f32 %v251_v23, %v654_v11 }
 0x157   :  { %v719_v34 = vsel %vm292_vm2, %v548_v9, %v291_v33 }
 0x158   :  { %v281_v24 = vsel %vm59_vm0, %v261_v5, 0.0 }
 0x159   :  { %282 = vadd.xlane.f32.xlu0 %v281_v24 }
 0x15b   :  { %v252_v26 = vpop.f32.mrf.mxu2 }
 0x15c   :  { %v253_v27 = vadd.f32 %v528_v47, %v252_v26 }
 0x15e   :  { %v262_v8 = vadd.f32 %v253_v27, %v659_v12 }
 0x160   :  { %v284_v28 = vsel %vm59_vm0, %v262_v8, 0.0 }
 0x161   :  { %285 = vadd.xlane.f32.xlu1 %v284_v28 }
 0x1a0   :  { %v265_v11 = vpop.xlane.xlu0 %264 }
 0x1a1   :  { %v294_v35 = vmul.f32 %v719_v34, %v265_v11 }
 0x1a3   :  { %v722_v37 = vsub.f32 %v255_v58, %v294_v35 }
 0x1a5   :  { %v310_v12 = vmul.f32 %v722_v37, %v722_v37 }
 0x1a7   :  { %v318_v38 = vsel %vm59_vm0, %v310_v12, 0.0 }
 0x1a8   :  { %319 = vadd.xlane.f32.xlu2 %v318_v38  ;;  %v268_v39 = vpop.xlane.xlu0 %267 }
 0x1a9   :  { %v295_v40 = vmul.f32 %v719_v34, %v268_v39 }
 0x1ab   :  { %v728_v41 = vsub.f32 %v256_v62, %v295_v40 }
 0x1ad   :  { %v311_v42 = vmul.f32 %v728_v41, %v728_v41 }
 0x1af   :  { %v321_v43 = vsel %vm59_vm0, %v311_v42, 0.0 }
 0x1b0   :  { %v271_v44 = vpop.xlane.xlu1 %270  ;;  %322 = vadd.xlane.f32.xlu0 %v321_v43 }
 0x1b1   :  { %v296_v36 = vmul.f32 %v719_v34, %v271_v44 }
 0x1b3   :  { %v734_v45 = vsub.f32 %v257_v6, %v296_v36 }
 0x1b5   :  { %v312_v46 = vmul.f32 %v734_v45, %v734_v45 }
 0x1b7   :  { %v324_v48 = vsel %vm59_vm0, %v312_v46, 0.0 }
 0x1b8   :  { %325 = vadd.xlane.f32.xlu1 %v324_v48  ;;  %v274_v17 = vpop.xlane.xlu1 %273 }
 0x1b9   :  { %v297_v25 = vmul.f32 %v719_v34, %v274_v17 }
 0x1bb   :  { %v740_v49 = vsub.f32 %v258_v2, %v297_v25 }
 0x1bc   :  { %v277_v50 = vpop.xlane.xlu2 %276 }
 0x1bd   :  { %v298_v51 = vmul.f32 %v719_v34, %v277_v50  ;;  %v313_v52 = vmul.f32 %v740_v49, %v740_v49 }
 0x1bf   :  { %v745_v53 = vsub.f32 %v259_v3, %v298_v51  ;;  %v327_v54 = vsel %vm59_vm0, %v313_v52, 0.0 }
 0x1c0   :  { %328 = vadd.xlane.f32.xlu2 %v327_v54 }
 0x1c1   :  { %v314_v55 = vmul.f32 %v745_v53, %v745_v53 }
 0x1c3   :  { %v330_v47 = vsel %vm59_vm0, %v314_v55, 0.0 }
 0x1c4   :  { %v280_v56 = vpop.xlane.xlu2 %279  ;;  %331 = vadd.xlane.f32.xlu0 %v330_v47 }
 0x1c5   :  { %v299_v57 = vmul.f32 %v719_v34, %v280_v56 }
 0x1c7   :  { %v752_v58 = vsub.f32 %v260_v4, %v299_v57 }
 0x1c9   :  { %v315_v59 = vmul.f32 %v752_v58, %v752_v58 }
 0x1cb   :  { %v333_v60 = vsel %vm59_vm0, %v315_v59, 0.0 }
 0x1cc   :  { %334 = vadd.xlane.f32.xlu1 %v333_v60  ;;  %v283_v61 = vpop.xlane.xlu0 %282 }
 0x1cd   :  { %v300_v62 = vmul.f32 %v719_v34, %v283_v61 }
 0x1cf   :  { %v758_v63 = vsub.f32 %v261_v5, %v300_v62 }
 0x1d1   :  { %v316_v0 = vmul.f32 %v758_v63, %v758_v63 }
 0x1d3   :  { %v336_v1 = vsel %vm59_vm0, %v316_v0, 0.0 }
 0x1d4   :  { %v286_v6 = vpop.xlane.xlu1 %285  ;;  %337 = vadd.xlane.f32.xlu2 %v336_v1 }
 0x1d5   :  { %v301_v7 = vmul.f32 %v719_v34, %v286_v6 }
 0x1d7   :  { %v764_v10 = vsub.f32 %v262_v8, %v301_v7 }
 0x1d9   :  { %v317_v13 = vmul.f32 %v764_v10, %v764_v10 }
 0x1db   :  { %v339_v2 = vsel %vm59_vm0, %v317_v13, 0.0 }
 0x1dc   :  { %340 = vadd.xlane.f32.xlu0 %v339_v2 }
 0x21b   :  { %v320_v14 = vpop.xlane.xlu2 %319 }
 0x21c   :  { %v342_v15 = vmul.f32 %v320_v14, %v719_v34 }
 0x21e   :  { %v350_v16 = vadd.f32 1e-12, %v342_v15 }
 0x220   :  { %549 = vrsqrt.f32 %v350_v16  ;;  %vm364_vm4 = vweird.f32 %v350_v16 }
 0x223   :  { %v323_v3 = vpop.xlane.xlu0 %322 }
 0x224   :  { %v343_v18 = vmul.f32 %v323_v3, %v719_v34 }
 0x226   :  { %v550_v19 = vpop.eup %549  ;;  %v351_v21 = vadd.f32 1e-12, %v343_v18 }
 0x227   :  { %v359_v4 = vmul.f32 %v550_v19, %v350_v16  ;;  %vm365_vm3 = vweird.f32 %v550_v19 }
 0x228   :  { %551 = vrsqrt.f32 %v351_v21  ;;  %vm366_vm5 = vmor %vm364_vm4, %vm365_vm3  ;;  %vm374_vm7 = vweird.f32 %v351_v21 }
 0x229   :  { %v360_v20 = vmul.f32 %v550_v19, %v359_v4 }
 0x22b   :  { %v361_v22 = vmul.f32 0.5, %v360_v20  ;;  %v326_v23 = vpop.xlane.xlu1 %325 }
 0x22c   :  { %v344_v5 = vmul.f32 %v326_v23, %v719_v34 }
 0x22d   :  { %v362_v24 = vsub.f32 1.5, %v361_v22 }
 0x22e   :  { %v552_v26 = vpop.eup %551  ;;  %v352_v27 = vadd.f32 1e-12, %v344_v5 }
 0x22f   :  { %v363_v8 = vmul.f32 %v550_v19, %v362_v24  ;;  %v369_v28 = vmul.f32 %v552_v26, %v351_v21  ;;  %vm375_vm6 = vweird.f32 %v552_v26 }
 0x230   :  { %553 = vrsqrt.f32 %v352_v27  ;;  %vm376_vm8 = vmor %vm374_vm7, %vm375_vm6  ;;  %vm384_vm10 = vweird.f32 %v352_v27 }
 0x231   :  { %v367_v9 = vsel %vm366_vm5, %v550_v19, %v363_v8  ;;  %v370_v30 = vmul.f32 %v552_v26, %v369_v28 }
 0x232   :  { %v438_v32 = vmul.f32 %v367_v9, %v722_v37 }
 0x233   :  { %v371_v33 = vmul.f32 0.5, %v370_v30  ;;  %v329_v11 = vpop.xlane.xlu2 %328 }
 0x234   :  { %v450_v35 = vmul.f32 %v775_v29, %v438_v32  ;;  %v345_v12 = vmul.f32 %v329_v11, %v719_v34 }
 0x235   :  { %v372_v38 = vsub.f32 1.5, %v371_v33 }
 0x236   :  { %v554_v39 = vpop.eup %553  ;;  %v462_v40 = vadd.f32 %v780_v31, %v450_v35  ;;  %v353_v42 = vadd.f32 1e-12, %v345_v12 }
 0x237   :  { %v373_v43 = vmul.f32 %v552_v26, %v372_v38  ;;  %v379_v44 = vmul.f32 %v554_v39, %v352_v27  ;;  %v332_v36 = vpop.xlane.xlu0 %331  ;;  %vm385_vm9 = vweird.f32 %v554_v39 }
 0x238   :  { %470 = vst.msk [vmem:[%s850_s7] sm:$0xff] %vm59_vm0, %v462_v40  ;;  %555 = vrsqrt.f32 %v353_v42  ;;  %v346_v37 = vmul.f32 %v332_v36, %v719_v34  ;;  %vm386_vm11 = vmor %vm384_vm10, %vm385_vm9  ;;  %vm394_vm13 = vweird.f32 %v353_v42 }
 0x239   :  { %v377_v46 = vsel %vm376_vm8, %v552_v26, %v373_v43  ;;  %v380_v48 = vmul.f32 %v554_v39, %v379_v44 }
 0x23a   :  { %v439_v17 = vmul.f32 %v377_v46, %v728_v41  ;;  %v354_v25 = vadd.f32 1e-12, %v346_v37 }
 0x23b   :  { %v381_v50 = vmul.f32 0.5, %v380_v48 }
 0x23c   :  { %v451_v51 = vmul.f32 %v775_v29, %v439_v17  ;;  %557 = vrsqrt.f32 %v354_v25  ;;  %vm404_vm1 = vweird.f32 %v354_v25 }
 0x23d   :  { %v382_v52 = vsub.f32 1.5, %v381_v50 }
 0x23e   :  { %v556_v54 = vpop.eup %555  ;;  %v463_v55 = vadd.f32 %v780_v31, %v451_v51 }
 0x23f   :  { %v383_v47 = vmul.f32 %v554_v39, %v382_v52  ;;  %v389_v56 = vmul.f32 %v556_v54, %v353_v42  ;;  %v335_v57 = vpop.xlane.xlu1 %334  ;;  %vm395_vm12 = vweird.f32 %v556_v54 }
 0x240   :  { %471 = vst.msk [vmem:[%s850_s7 + $0x8] sm:$0xff] %vm59_vm0, %v463_v55  ;;  %v347_v41 = vmul.f32 %v335_v57, %v719_v34  ;;  %vm396_vm14 = vmor %vm394_vm13, %vm395_vm12 }
 0x241   :  { %v387_v59 = vsel %vm386_vm11, %v554_v39, %v383_v47  ;;  %v390_v60 = vmul.f32 %v556_v54, %v389_v56 }
 0x242   :  { %v558_v61 = vpop.eup %557  ;;  %v440_v62 = vmul.f32 %v387_v59, %v734_v45  ;;  %v355_v0 = vadd.f32 1e-12, %v347_v41 }
 0x243   :  { %v391_v1 = vmul.f32 0.5, %v390_v60  ;;  %v399_v6 = vmul.f32 %v558_v61, %v354_v25  ;;  %vm405_vm15 = vweird.f32 %v558_v61 }
 0x244   :  { %v452_v7 = vmul.f32 %v775_v29, %v440_v62  ;;  %559 = vrsqrt.f32 %v355_v0  ;;  %vm406_vm2 = vmor %vm404_vm1, %vm405_vm15  ;;  %vm414_vm4 = vweird.f32 %v355_v0 }
 0x245   :  { %v392_v13 = vsub.f32 1.5, %v391_v1  ;;  %v400_v2 = vmul.f32 %v558_v61, %v399_v6 }
 0x246   :  { %v464_v14 = vadd.f32 %v780_v31, %v452_v7 }
 0x247   :  { %v393_v15 = vmul.f32 %v556_v54, %v392_v13  ;;  %v401_v16 = vmul.f32 0.5, %v400_v2  ;;  %v338_v3 = vpop.xlane.xlu2 %337 }
 0x248   :  { %472 = vst.msk [vmem:[%s850_s7 + $0x10] sm:$0xff] %vm59_vm0, %v464_v14  ;;  %v348_v45 = vmul.f32 %v338_v3, %v719_v34 }
 0x249   :  { %v397_v18 = vsel %vm396_vm14, %v556_v54, %v393_v15  ;;  %v402_v19 = vsub.f32 1.5, %v401_v16 }
 0x24a   :  { %v560_v21 = vpop.eup %559  ;;  %v441_v4 = vmul.f32 %v397_v18, %v740_v49  ;;  %v356_v20 = vadd.f32 1e-12, %v348_v45 }
 0x24b   :  { %v403_v22 = vmul.f32 %v558_v61, %v402_v19  ;;  %v409_v23 = vmul.f32 %v560_v21, %v355_v0  ;;  %vm415_vm3 = vweird.f32 %v560_v21 }
 0x24c   :  { %v453_v5 = vmul.f32 %v775_v29, %v441_v4  ;;  %561 = vrsqrt.f32 %v356_v20  ;;  %vm416_vm5 = vmor %vm414_vm4, %vm415_vm3  ;;  %vm424_vm7 = vweird.f32 %v356_v20 }
 0x24d   :  { %v407_v24 = vsel %vm406_vm2, %v558_v61, %v403_v22  ;;  %v410_v26 = vmul.f32 %v560_v21, %v409_v23 }
 0x24e   :  { %v465_v27 = vadd.f32 %v780_v31, %v453_v5  ;;  %v442_v8 = vmul.f32 %v407_v24, %v745_v53 }
 0x24f   :  { %v411_v28 = vmul.f32 0.5, %v410_v26  ;;  %v341_v9 = vpop.xlane.xlu0 %340 }
 0x250   :  { %473 = vst.msk [vmem:[%s850_s7 + $0x18] sm:$0xff] %vm59_vm0, %v465_v27  ;;  %v454_v49 = vmul.f32 %v775_v29, %v442_v8  ;;  %v349_v30 = vmul.f32 %v341_v9, %v719_v34 }
 0x251   :  { %v412_v32 = vsub.f32 1.5, %v411_v28 }
 0x252   :  { %v562_v33 = vpop.eup %561  ;;  %v466_v11 = vadd.f32 %v780_v31, %v454_v49  ;;  %v357_v35 = vadd.f32 1e-12, %v349_v30 }
 0x253   :  { %v413_v12 = vmul.f32 %v560_v21, %v412_v32  ;;  %v419_v53 = vmul.f32 %v562_v33, %v356_v20  ;;  %vm425_vm6 = vweird.f32 %v562_v33 }
 0x254   :  { %474 = vst.msk [vmem:[%s850_s7 + $0x20] sm:$0xff] %vm59_vm0, %v466_v11  ;;  %563 = vrsqrt.f32 %v357_v35  ;;  %vm426_vm8 = vmor %vm424_vm7, %vm425_vm6  ;;  %vm434_vm10 = vweird.f32 %v357_v35 }
 0x255   :  { %v417_v38 = vsel %vm416_vm5, %v560_v21, %v413_v12  ;;  %v420_v39 = vmul.f32 %v562_v33, %v419_v53 }
 0x256   :  { %v443_v34 = vmul.f32 %v417_v38, %v752_v58 }
 0x257   :  { %v421_v40 = vmul.f32 0.5, %v420_v39 }
 0x258   :  { %v455_v42 = vmul.f32 %v775_v29, %v443_v34 }
 0x259   :  { %v422_v43 = vsub.f32 1.5, %v421_v40 }
 0x25a   :  { %v564_v44 = vpop.eup %563  ;;  %v467_v36 = vadd.f32 %v780_v31, %v455_v42 }
 0x25b   :  { %v423_v37 = vmul.f32 %v562_v33, %v422_v43  ;;  %v429_v46 = vmul.f32 %v564_v44, %v357_v35  ;;  %vm435_vm9 = vweird.f32 %v564_v44 }
 0x25c   :  { %475 = vst.msk [vmem:[%s850_s7 + $0x28] sm:$0xff] %vm59_vm0, %v467_v36  ;;  %vm436_vm11 = vmor %vm434_vm10, %vm435_vm9 }
 0x25d   :  { %v427_v48 = vsel %vm426_vm8, %v562_v33, %v423_v37  ;;  %v430_v17 = vmul.f32 %v564_v44, %v429_v46 }
 0x25e   :  { %v444_v58 = vmul.f32 %v427_v48, %v758_v63 }
 0x25f   :  { %v431_v25 = vmul.f32 0.5, %v430_v17 }
 0x260   :  { %v456_v50 = vmul.f32 %v775_v29, %v444_v58 }
 0x261   :  { %v432_v51 = vsub.f32 1.5, %v431_v25 }
 0x262   :  { %v468_v52 = vadd.f32 %v780_v31, %v456_v50 }
 0x263   :  { %v433_v54 = vmul.f32 %v564_v44, %v432_v51 }
 0x264   :  { %476 = vst.msk [vmem:[%s850_s7 + $0x30] sm:$0xff] %vm59_vm0, %v468_v52 }
 0x265   :  { %v437_v55 = vsel %vm436_vm11, %v564_v44, %v433_v54 }
 0x266   :  { %v445_v47 = vmul.f32 %v437_v55, %v764_v10 }
 0x268   :  { %v457_v63 = vmul.f32 %v775_v29, %v445_v47 }
 0x26a   :  { %v469_v56 = vadd.f32 %v780_v31, %v457_v63 }
 0x26c   :  { %477 = vst.msk [vmem:[%s850_s7 + $0x38] sm:$0xff] %vm59_vm0, %v469_v56 }

// kernel: _lambda_.9
= control target key start
LH: loop header
LB: loop body
LE: loop exit
PB: predicated region body
PF: predicated region fallthrough
CT: control target
= control target key end

     0   :  { %vm62_vm0 = vcmask 261120   ;;  %s1610_s26 = smov 96   ;;  %s1612_s27 = smov 80   ;;  %vm125_vm1 = vcmask 130048   ;;  %vm455_vm2 = vcmask 1043456   ;;  %vm353_vm3 = vcmask 64512   ;;  %s2242_s2 = inlined_call_operand.vmem [shape: bf16[32,96], index: 2, kind: input, shape index: {}]   ;;  %s2243_s0 = inlined_call_operand.vmem [shape: f32[8,8,32], index: 0, kind: input, shape index: {}]   ;;  %s2244_s3 = inlined_call_operand.vmem [shape: f32[1,96], index: 3, kind: input, shape index: {}]   ;;  %s2245_s1 = inlined_call_operand.vmem [shape: f32[8,1,8], index: 1, kind: input, shape index: {}]   ;;  %s2246_s4 = inlined_call_operand.vmem [shape: bf16[32,32], index: 4, kind: input, shape index: {}]   ;;  %s2247_s5 = inlined_call_operand.vmem [shape: f32[1,32], index: 5, kind: input, shape index: {}]   ;;  %s2248_s6 = inlined_call_operand.vmem [shape: f32[1,32], index: 6, kind: input, shape index: {}]   ;;  %s2249_s7 = inlined_call_operand.vmem [shape: f32[1,32], index: 7, kind: input, shape index: {}]   ;;  %s2250_s8 = inlined_call_operand.vmem [shape: f32[8,8,32], index: 8, kind: output, shape index: {}]  }
   0x1   :  { %v1472_v0 = vld [vmem:[%s2242_s2 + $0x8] sm:$0xff]  ;;  %v1471_v1 = vld [vmem:[%s2242_s2] sm:$0xff]  ;;  %v32_v4 = vld [vmem:[%s2243_s0 + $0x10] sm:$0xff]  ;;  %s1613_s21 = smov 112   ;;  %s1615_s22 = smov 16  }
   0x2   :  { %v30_v2 = vld [vmem:[%s2243_s0] sm:$0xff]  ;;  %v31_v3 = vld [vmem:[%s2243_s0 + $0x8] sm:$0xff]  ;;  %81 = vmatpush.bf16.msra.mxu0 %v1472_v0  ;;  %1475 = vmatpush.bf16.msra.mxu1 %v1472_v0  ;;  %v33_v5 = vld [vmem:[%s2243_s0 + $0x18] sm:$0xff] }
   0x3   :  { %v34_v6 = vld [vmem:[%s2243_s0 + $0x20] sm:$0xff]  ;;  %v35_v7 = vld [vmem:[%s2243_s0 + $0x28] sm:$0xff]  ;;  %1476 = vmatpush.bf16.msra.mxu2 %v1472_v0  ;;  %1477 = vmatpush.bf16.msra.mxu3 %v1472_v0  ;;  %v36_v8 = vld [vmem:[%s2243_s0 + $0x30] sm:$0xff]  ;;  %v42_v10 = vpack.c.bf16 %v31_v3, %v30_v2  ;;  %v43_v11 = vpack.c.bf16 %v33_v5, %v32_v4 }
   0x4   :  { %v37_v9 = vld [vmem:[%s2243_s0 + $0x38] sm:$0xff]  ;;  %v44_v12 = vpack.c.bf16 %v35_v7, %v34_v6  ;;  %v1508_v14 = vld [vmem:[%s2244_s3] ss:$0 sm:$0xff]  ;;  %s1611_s3 = smov 64  }
   0x5   :  { %v45_v13 = vpack.c.bf16 %v37_v9, %v36_v8 }
   0x6   :  { %82 = vmatpush.bf16.msra.mxu0 %v1471_v1  ;;  %1478 = vmatpush.bf16.msra.mxu1 %v1471_v1 }
   0x7   :  { %1479 = vmatpush.bf16.msra.mxu2 %v1471_v1  ;;  %1480 = vmatpush.bf16.msra.mxu3 %v1471_v1 }
   0x9   :  { %1423 = vmatmul.msk.bf16.vlgmr.msra.gmra.mxu0 %vm62_vm0, %v42_v10  ;;  %1424 = vmatmul.msk.bf16.vlgmr.msra.gmra.mxu1 %vm62_vm0, %v43_v11 }
   0xa   :  { %1425 = vmatmul.msk.bf16.vlgmr.msra.gmra.mxu2 %vm62_vm0, %v44_v12  ;;  %1426 = vmatmul.msk.bf16.vlgmr.msra.gmra.mxu3 %vm62_vm0, %v45_v13 }
  0x86   :  { %v84_v15 = vpop.f32.mrf.mxu0  ;;  %v89_v16 = vpop.f32.mrf.mxu1 }
  0x87   :  { %v90_v17 = vadd.f32 %v1508_v14, %v89_v16  ;;  %v85_v30 = vadd.f32 %v1508_v14, %v84_v15 }
  0x89   :  { %v1699_v18 = vpack.c.bf16 %v90_v17, %v90_v17  ;;  %v1716_v38 = vpack.c.bf16 %v85_v30, %v85_v30  ;;  %v1806_v30 = vld [vmem:[%s2245_s1 + $0x1] ss:$0 sm:$0xff] }
  0x8b   :  { %v170_v19 = vunpack.c.l.b16 %v1699_v18  ;;  %v121_v47 = vunpack.c.l.b16 %v1716_v38 }
  0x8d   :  { %v1702_v20 = vpack.c.b16 %v170_v19, %v170_v19  ;;  %v94_v21 = vpop.f32.mrf.mxu2  ;;  %v99_v22 = vpop.f32.mrf.mxu3  ;;  %v1736_v52 = vpack.c.b16 %v121_v47, %v121_v47 }
  0x8e   :  { %v86_v23 = vpop.f32.mrf.mxu0  ;;  %v95_v24 = vadd.f32 %v1508_v14, %v94_v21  ;;  %v91_v25 = vpop.f32.mrf.mxu1  ;;  %v100_v27 = vadd.f32 %v1508_v14, %v99_v22 }
  0x8f   :  { %v87_v26 = vadd.f32 %v1508_v14, %v86_v23  ;;  %172 = vrot.lane.b32.xlu1 %v1702_v20, %s1610_s26  ;;  %v92_v28 = vadd.f32 %v1508_v14, %v91_v25  ;;  %v1796_v25 = vld [vmem:[%s2245_s1 + $0x2] ss:$0 sm:$0xff] }
  0x90   :  { %v1706_v29 = vpack.c.bf16 %v95_v24, %v95_v24  ;;  %v1711_v35 = vpack.c.bf16 %v100_v27, %v100_v27 }
  0x91   :  { %v113_v31 = vpack.c.bf16 %v87_v26, %v87_v26  ;;  %v1708_v32 = vpack.c.bf16 %v92_v28, %v92_v28 }
  0x92   :  { %v218_v33 = vunpack.c.l.b16 %v1706_v29  ;;  %v266_v44 = vunpack.c.l.b16 %v1711_v35 }
  0x93   :  { %v146_v34 = vunpack.c.l.b16 %v113_v31  ;;  %v194_v36 = vunpack.c.l.b16 %v1708_v32 }
  0x94   :  { %v1714_v37 = vpack.c.b16 %v218_v33, %v218_v33  ;;  %v1730_v49 = vpack.c.b16 %v266_v44, %v266_v44  ;;  %v1820_v44 = vld [vmem:[%s2245_s1 + $0x5] ss:$0 sm:$0xff] }
  0x95   :  { %v1718_v39 = vpack.c.b16 %v146_v34, %v146_v34  ;;  %v101_v40 = vpop.f32.mrf.mxu3  ;;  %v1720_v41 = vpack.c.b16 %v194_v36, %v194_v36  ;;  %v96_v42 = vpop.f32.mrf.mxu2  ;;  %v1811_v34 = vld [vmem:[%s2245_s1] ss:$0 sm:$0xff] }
  0x96   :  { %v97_v43 = vadd.f32 %v1508_v14, %v96_v42  ;;  %v102_v45 = vadd.f32 %v1508_v14, %v101_v40 }
  0x97   :  { %220 = vrot.lane.b32.xlu1 %v1714_v37, %s1610_s26  ;;  %148 = vrot.lane.b32.xlu0 %v1718_v39, %s1610_s26 }
  0x98   :  { %v117_v46 = vpack.c.bf16 %v97_v43, %v97_v43  ;;  %196 = vrot.lane.b32.xlu2 %v1720_v41, %s1610_s26  ;;  %v1732_v50 = vpack.c.bf16 %v102_v45, %v102_v45 }
  0x9a   :  { %v242_v48 = vunpack.c.l.b16 %v117_v46  ;;  %v290_v53 = vunpack.c.l.b16 %v1732_v50 }
  0x9c   :  { %v1734_v51 = vpack.c.b16 %v242_v48, %v242_v48  ;;  %v1745_v54 = vpack.c.b16 %v290_v53, %v290_v53 }
  0x9f   :  { %268 = vrot.lane.b32.xlu1 %v1730_v49, %s1610_s26  ;;  %123 = vrot.lane.b32.xlu0 %v1736_v52, %s1610_s26 }
  0xa0   :  { %244 = vrot.lane.b32.xlu2 %v1734_v51, %s1610_s26 }
  0xa7   :  { %450 = vrot.lane.b32.xlu1 %v1736_v52, %s1611_s3  ;;  %292 = vrot.lane.b32.xlu0 %v1745_v54, %s1610_s26 }
  0xa8   :  { %493 = vrot.lane.b32.xlu2 %v1702_v20, %s1611_s3 }
  0xaf   :  { %514 = vrot.lane.b32.xlu1 %v1720_v41, %s1611_s3  ;;  %472 = vrot.lane.b32.xlu0 %v1718_v39, %s1611_s3 }
  0xb0   :  { %577 = vrot.lane.b32.xlu2 %v1730_v49, %s1611_s3 }
  0xb7   :  { %644 = vrot.lane.b32.xlu1 %v1718_v39, %s1612_s27  ;;  %535 = vrot.lane.b32.xlu0 %v1714_v37, %s1611_s3 }
  0xbf   :  { %621 = vrot.lane.b32.xlu0 %v1736_v52, %s1612_s27  ;;  %556 = vrot.lane.b32.xlu1 %v1734_v51, %s1611_s3 }
  0xc7   :  { %598 = vrot.lane.b32.xlu0 %v1745_v54, %s1611_s3 }
  0xf2   :  { %v197_v55 = vpop.permute.xlu2 %196 }
  0xf3   :  { %v202_v0 = vsel %vm125_vm1, %v197_v55, 0 }
  0xfa   :  { %v245_v56 = vpop.permute.xlu2 %244 }
  0xfb   :  { %v250_v58 = vsel %vm125_vm1, %v245_v56, 0 }
 0x101   :  { %v173_v57 = vpop.permute.xlu1 %172 }
 0x102   :  { %v178_v59 = vsel %vm125_vm1, %v173_v57, 0  ;;  %v494_v9 = vpop.permute.xlu2 %493  ;;  %v1830_v57 = vld [vmem:[%s2245_s1 + $0x3] ss:$0 sm:$0xff] }
 0x103   :  { %187 = vmatpush.bf16.xpose.msrb.mxu3 %v178_v59  ;;  %v499_v10 = vsel %vm455_vm2, %v494_v9, 0 }
 0x109   :  { %v221_v60 = vpop.permute.xlu1 %220  ;;  %v149_v61 = vpop.permute.xlu0 %148 }
 0x10a   :  { %v226_v62 = vsel %vm125_vm1, %v221_v60, 0  ;;  %1429 = vmatmul.msk.bf16.vlgmr.msrb.gmra.mxu3 %vm125_vm1, %v1699_v18  ;;  %v154_v63 = vsel %vm125_vm1, %v149_v61, 0  ;;  %v578_v18 = vpop.permute.xlu2 %577 }
 0x10b   :  { %259 = vmatpush.bf16.xpose.msra.mxu3 %v250_v58  ;;  %163 = vmatpush.bf16.xpose.msrb.mxu2 %v154_v63  ;;  %v583_v19 = vsel %vm455_vm2, %v578_v18, 0  ;;  %v1837_v63 = vld [vmem:[%s2245_s1 + $0x4] ss:$0 sm:$0xff] }
 0x111   :  { %v269_v1 = vpop.permute.xlu1 %268  ;;  %v124_v2 = vpop.permute.xlu0 %123 }
 0x112   :  { %1428 = vmatmul.msk.bf16.vlgmr.msrb.gmra.mxu2 %vm125_vm1, %v113_v31  ;;  %v130_v3 = vsel %vm125_vm1, %v124_v2, 0  ;;  %v274_v4 = vsel %vm125_vm1, %v269_v1, 0 }
 0x113   :  { %235 = vmatpush.bf16.xpose.msra.mxu2 %v226_v62  ;;  %139 = vmatpush.bf16.xpose.msrb.mxu1 %v130_v3 }
 0x119   :  { %v451_v5 = vpop.permute.xlu1 %450  ;;  %v293_v6 = vpop.permute.xlu0 %292 }
 0x11a   :  { %v457_v7 = vsel %vm455_vm2, %v451_v5, 0  ;;  %v298_v8 = vsel %vm125_vm1, %v293_v6, 0  ;;  %1427 = vmatmul.msk.bf16.vlgmr.msrb.gmra.mxu1 %vm125_vm1, %v1716_v38  ;;  %1432 = vmatmul.msk.bf16.vlgmr.msra.gmra.mxu3 %vm125_vm1, %v117_v46 }
 0x11b   :  { %211 = vmatpush.bf16.xpose.msra.mxu1 %v202_v0  ;;  %466 = vmatpush.bf16.msrb.mxu3 %v457_v7  ;;  %v1849_v7 = vld [vmem:[%s2245_s1 + $0x6] ss:$0 sm:$0xff] }
 0x11c   :  { %307 = vmatpush.bf16.xpose.msrb.mxu2 %v298_v8 }
 0x121   :  { %v515_v11 = vpop.permute.xlu1 %514  ;;  %v473_v12 = vpop.permute.xlu0 %472 }
 0x122   :  { %v520_v13 = vsel %vm455_vm2, %v515_v11, 0  ;;  %1431 = vmatmul.msk.bf16.vlgmr.msra.gmra.mxu2 %vm125_vm1, %v1706_v29  ;;  %v478_v15 = vsel %vm455_vm2, %v473_v12, 0 }
 0x123   :  { %283 = vmatpush.bf16.xpose.msrb.mxu1 %v274_v4  ;;  %529 = vmatpush.bf16.msra.mxu3 %v520_v13  ;;  %v1844_v4 = vld [vmem:[%s2245_s1 + $0x7] ss:$0 sm:$0xff]  ;;  %s1614_s1 = smov 48  }
 0x124   :  { %508 = vmatpush.bf16.msra.mxu2 %v499_v10 }
 0x129   :  { %v536_v14 = vpop.permute.xlu0 %535  ;;  %v1784_v17 = vpop.permute.xlu1 %644 }
 0x12a   :  { %1430 = vmatmul.msk.bf16.vlgmr.msra.gmra.mxu1 %vm125_vm1, %v1708_v32  ;;  %v541_v16 = vsel %vm455_vm2, %v536_v14, 0 }
 0x12b   :  { %487 = vmatpush.bf16.msra.mxu1 %v478_v15  ;;  %550 = vmatpush.bf16.msrb.mxu0 %v541_v16 }
 0x131   :  { %v622_v21 = vpop.permute.xlu0 %621  ;;  %v557_v23 = vpop.permute.xlu1 %556 }
 0x132   :  { %v627_v22 = vsel %vm125_vm1, %v622_v21, 0  ;;  %1434 = vmatmul.msk.bf16.vlgmr.msrb.gmra.mxu2 %vm125_vm1, %v1732_v50  ;;  %v562_v24 = vsel %vm455_vm2, %v557_v23, 0 }
 0x133   :  { %636 = vmatpush.bf16.xpose.msra.mxu0 %v627_v22  ;;  %592 = vmatpush.bf16.msrb.mxu2 %v583_v19 }
 0x139   :  { %v1859_v16 = vpop.permute.xlu0 %598 }
 0x13a   :  { %1433 = vmatmul.msk.bf16.vlgmr.msrb.gmra.mxu1 %vm125_vm1, %v1711_v35 }
 0x13b   :  { %571 = vmatpush.bf16.msrb.mxu1 %v562_v24 }
 0x18d   :  { %v189_v26 = vpop.f32.mrf.mxu3 }
 0x18e   :  { %v315_v27 = vmul.f32 0.25, %v189_v26 }
 0x190   :  { %v1799_v28 = vadd.f32 %v1796_v25, %v315_v27 }
 0x192   :  { %v360_v29 = vsel %vm353_vm3, %v1799_v28, -inf }
 0x193   :  { %361 = vmax.xlane.f32.xlu1 %v360_v29 }
 0x195   :  { %v165_v31 = vpop.f32.mrf.mxu2  ;;  %v191_v32 = vpop.f32.mrf.mxu3 }
 0x196   :  { %v314_v33 = vmul.f32 0.25, %v165_v31 }
 0x197   :  { %v141_v35 = vpop.f32.mrf.mxu1 }
 0x198   :  { %v313_v36 = vmul.f32 0.25, %v141_v35  ;;  %v346_v38 = vadd.f32 %v1806_v30, %v314_v33 }
 0x19a   :  { %v357_v40 = vsel %vm353_vm3, %v346_v38, -inf  ;;  %v345_v42 = vadd.f32 %v1811_v34, %v313_v36 }
 0x19b   :  { %358 = vmax.xlane.f32.xlu0 %v357_v40 }
 0x19c   :  { %v354_v43 = vsel %vm353_vm3, %v345_v42, -inf }
 0x19d   :  { %v167_v45 = vpop.f32.mrf.mxu2  ;;  %v261_v46 = vpop.f32.mrf.mxu3  ;;  %355 = vmax.xlane.f32.xlu2 %v354_v43 }
 0x19e   :  { %v318_v47 = vmul.f32 0.25, %v261_v46 }
 0x19f   :  { %v143_v48 = vpop.f32.mrf.mxu1 }
 0x1a0   :  { %v1823_v50 = vadd.f32 %v1820_v44, %v318_v47 }
 0x1a2   :  { %v369_v53 = vsel %vm353_vm3, %v1823_v50, -inf }
 0x1a3   :  { %370 = vmax.xlane.f32.xlu0 %v369_v53 }
 0x1a5   :  { %v237_v55 = vpop.f32.mrf.mxu2  ;;  %v263_v56 = vpop.f32.mrf.mxu3 }
 0x1a6   :  { %v317_v61 = vmul.f32 0.25, %v237_v55 }
 0x1a7   :  { %v213_v58 = vpop.f32.mrf.mxu1 }
 0x1a8   :  { %v316_v59 = vmul.f32 0.25, %v213_v58  ;;  %v349_v2 = vadd.f32 %v1837_v63, %v317_v61 }
 0x1aa   :  { %v348_v60 = vadd.f32 %v1830_v57, %v316_v59  ;;  %v366_v3 = vsel %vm353_vm3, %v349_v2, -inf }
 0x1ac   :  { %v363_v62 = vsel %vm353_vm3, %v348_v60, -inf }
 0x1ad   :  { %v239_v0 = vpop.f32.mrf.mxu2  ;;  %364 = vmax.xlane.f32.xlu2 %v363_v62 }
 0x1af   :  { %v215_v1 = vpop.f32.mrf.mxu1 }
 0x1b5   :  { %367 = vmax.xlane.f32.xlu2 %v366_v3  ;;  %v309_v5 = vpop.f32.mrf.mxu2 }
 0x1b6   :  { %v320_v6 = vmul.f32 0.25, %v309_v5 }
 0x1b7   :  { %v285_v8 = vpop.f32.mrf.mxu1 }
 0x1b8   :  { %v319_v9 = vmul.f32 0.25, %v285_v8  ;;  %v352_v10 = vadd.f32 %v1844_v4, %v320_v6 }
 0x1ba   :  { %v351_v11 = vadd.f32 %v1849_v7, %v319_v9  ;;  %v375_v13 = vsel %vm353_vm3, %v352_v10, -inf }
 0x1bc   :  { %v372_v12 = vsel %vm353_vm3, %v351_v11, -inf }
 0x1bd   :  { %373 = vmax.xlane.f32.xlu1 %v372_v12  ;;  %376 = vmax.xlane.f32.xlu2 %v375_v13  ;;  %v311_v14 = vpop.f32.mrf.mxu2 }
 0x1bf   :  { %v287_v15 = vpop.f32.mrf.mxu1 }
 0x1d5   :  { %667 = vrot.lane.b32.xlu2 %v1702_v20, %s1612_s27 }
 0x1d6   :  { %619 = vrot.lane.b32.xlu1 %v1736_v52, %s1613_s21 }
 0x206   :  { %v362_v36 = vpop.xlane.xlu1 %361 }
 0x207   :  { %v380_v1 = vsub.f32 %v1799_v28, %v362_v36 }
 0x20e   :  { %v359_v18 = vpop.xlane.xlu0 %358 }
 0x20f   :  { %v379_v19 = vsub.f32 %v346_v38, %v359_v18 }
 0x210   :  { %v356_v21 = vpop.xlane.xlu2 %355 }
 0x211   :  { %v388_v22 = vmul.f32 1.442695, %v379_v19  ;;  %v378_v23 = vsub.f32 %v345_v42, %v356_v21  ;;  %v650_v21 = vsel %vm125_vm1, %v1784_v17, 0 }
 0x213   :  { %1520 = vpow2.f32 %v388_v22  ;;  %v386_v24 = vmul.f32 1.442695, %v378_v23  ;;  %v604_v23 = vsel %vm455_vm2, %v1859_v16, 0 }
 0x215   :  { %1522 = vpow2.f32 %v386_v24 }
 0x216   :  { %v371_v3 = vpop.xlane.xlu0 %370 }
 0x217   :  { %v383_v5 = vsub.f32 %v1823_v50, %v371_v3 }
 0x219   :  { %v1861_v26 = vpop.eup %1520  ;;  %v396_v6 = vmul.f32 1.442695, %v383_v5 }
 0x21a   :  { %v405_v27 = vsel %vm353_vm3, %v1861_v26, 0.0 }
 0x21b   :  { %v1865_v29 = vpop.eup %1522  ;;  %406 = vadd.xlane.f32.xlu2 %v405_v27 }
 0x21c   :  { %v402_v31 = vsel %vm353_vm3, %v1865_v29, 0.0 }
 0x21d   :  { %403 = vadd.xlane.f32.xlu0 %v402_v31 }
 0x220   :  { %v365_v32 = vpop.xlane.xlu2 %364 }
 0x221   :  { %v381_v33 = vsub.f32 %v348_v60, %v365_v32 }
 0x223   :  { %v392_v35 = vmul.f32 1.442695, %v381_v33 }
 0x225   :  { %1524 = vpow2.f32 %v392_v35 }
 0x228   :  { %v368_v38 = vpop.xlane.xlu2 %367 }
 0x229   :  { %v382_v40 = vsub.f32 %v349_v2, %v368_v38  ;;  %v390_v2 = vmul.f32 1.442695, %v380_v1 }
 0x22b   :  { %v1869_v42 = vpop.eup %1524  ;;  %v394_v43 = vmul.f32 1.442695, %v382_v40 }
 0x22c   :  { %v411_v45 = vsel %vm353_vm3, %v1869_v42, 0.0 }
 0x22d   :  { %1526 = vpow2.f32 %v394_v43  ;;  %412 = vadd.xlane.f32.xlu2 %v411_v45 }
 0x230   :  { %v374_v46 = vpop.xlane.xlu1 %373  ;;  %v377_v47 = vpop.xlane.xlu2 %376 }
 0x231   :  { %v384_v48 = vsub.f32 %v351_v11, %v374_v46  ;;  %v385_v53 = vsub.f32 %v352_v10, %v377_v47  ;;  %690 = vrot.lane.b32.xlu0 %v1720_v41, %s1612_s27 }
 0x233   :  { %v1875_v55 = vpop.eup %1526  ;;  %v398_v56 = vmul.f32 1.442695, %v384_v48  ;;  %v400_v58 = vmul.f32 1.442695, %v385_v53 }
 0x234   :  { %v414_v59 = vsel %vm353_vm3, %v1875_v55, 0.0 }
 0x235   :  { %1528 = vpow2.f32 %v398_v56  ;;  %415 = vadd.xlane.f32.xlu1 %v414_v59 }
 0x236   :  { %1530 = vpow2.f32 %v400_v58 }
 0x237   :  { %1532 = vpow2.f32 %v390_v2 }
 0x238   :  { %1534 = vpow2.f32 %v396_v6  ;;  %v668_v10 = vpop.permute.xlu2 %667 }
 0x239   :  { %v673_v1 = vsel %vm125_vm1, %v668_v10, 0 }
 0x23b   :  { %v1879_v60 = vpop.eup %1528 }
 0x23c   :  { %v1881_v61 = vpop.eup %1530  ;;  %v420_v62 = vsel %vm353_vm3, %v1879_v60, 0.0 }
 0x23d   :  { %v423_v0 = vsel %vm353_vm3, %v1881_v61, 0.0  ;;  %421 = vadd.xlane.f32.xlu2 %v420_v62  ;;  %v1891_v8 = vpop.eup %1532 }
 0x23e   :  { %424 = vadd.xlane.f32.xlu1 %v423_v0  ;;  %v408_v9 = vsel %vm353_vm3, %v1891_v8, 0.0  ;;  %v1899_v28 = vpop.eup %1534 }
 0x23f   :  { %v417_v50 = vsel %vm353_vm3, %v1899_v28, 0.0 }
 0x248   :  { %v620_v24 = vpop.permute.xlu1 %619 }
 0x255   :  { %642 = vrot.lane.b32.xlu2 %v1718_v39, %s1613_s21 }
 0x257   :  { %688 = vrot.lane.b32.xlu1 %v1720_v41, %s1613_s21 }
 0x25b   :  { %409 = vadd.xlane.f32.xlu0 %v408_v9 }
 0x25d   :  { %713 = vrot.lane.b32.xlu2 %v1714_v37, %s1612_s27 }
 0x25f   :  { %759 = vrot.lane.b32.xlu1 %v1730_v49, %s1612_s27 }
 0x263   :  { %418 = vadd.xlane.f32.xlu0 %v417_v50 }
 0x265   :  { %782 = vrot.lane.b32.xlu2 %v1745_v54, %s1612_s27 }
 0x267   :  { %734 = vrot.lane.b32.xlu1 %v1734_v51, %s1613_s21 }
 0x26d   :  { %757 = vrot.lane.b32.xlu2 %v1730_v49, %s1613_s21 }
 0x277   :  { %665 = vrot.lane.b32.xlu0 %v1702_v20, %s1613_s21 }
 0x27f   :  { %736 = vrot.lane.b32.xlu0 %v1734_v51, %s1612_s27 }
 0x287   :  { %711 = vrot.lane.b32.xlu0 %v1714_v37, %s1613_s21 }
 0x28e   :  { %v407_v11 = vpop.xlane.xlu2 %406 }
 0x28f   :  { %1536 = vrcp.f32 %v407_v11  ;;  %780 = vrot.lane.b32.xlu0 %v1745_v54, %s1613_s21 }
 0x290   :  { %v404_v12 = vpop.xlane.xlu0 %403 }
 0x291   :  { %1538 = vrcp.f32 %v404_v12 }
 0x295   :  { %v1537_v13 = vpop.eup %1536 }
 0x296   :  { %v435_v14 = vmul.f32 %v1537_v13, %v1861_v26 }
 0x297   :  { %v1539_v15 = vpop.eup %1538 }
 0x298   :  { %v443_v18 = vpack.c.bf16 %v435_v14, %v435_v14  ;;  %v434_v19 = vmul.f32 %v1539_v15, %v1865_v29 }
 0x29a   :  { %v442_v22 = vpack.c.bf16 %v434_v19, %v434_v19  ;;  %1436 = vmatmul.msk.bf16.vlgmr.msra.gmra.mxu1 %vm353_vm3, %v443_v18 }
 0x29b   :  { %659 = vmatpush.bf16.xpose.msra.mxu1 %v650_v21 }
 0x29c   :  { %1435 = vmatmul.msk.bf16.vlgmr.msrb.gmra.mxu3 %vm353_vm3, %v442_v22 }
 0x29d   :  { %613 = vmatpush.bf16.msrb.mxu3 %v604_v23 }
 0x2a0   :  { %v413_v27 = vpop.xlane.xlu2 %412 }
 0x2a1   :  { %1540 = vrcp.f32 %v413_v27 }
 0x2a3   :  { %v691_v32 = vpop.permute.xlu0 %690 }
 0x2a4   :  { %v696_v33 = vsel %vm125_vm1, %v691_v32, 0 }
 0x2a7   :  { %v1541_v26 = vpop.eup %1540 }
 0x2a8   :  { %v437_v31 = vmul.f32 %v1541_v26, %v1869_v42  ;;  %v416_v29 = vpop.xlane.xlu1 %415 }
 0x2a9   :  { %1542 = vrcp.f32 %v416_v29 }
 0x2aa   :  { %v445_v17 = vpack.c.bf16 %v437_v31, %v437_v31 }
 0x2ac   :  { %1438 = vmatmul.msk.bf16.vlgmr.msra.gmra.mxu3 %vm353_vm3, %v445_v17 }
 0x2ad   :  { %705 = vmatpush.bf16.xpose.msra.mxu3 %v696_v33 }
 0x2af   :  { %v1543_v35 = vpop.eup %1542 }
 0x2b0   :  { %v438_v16 = vmul.f32 %v1543_v35, %v1875_v55  ;;  %v422_v36 = vpop.xlane.xlu2 %421 }
 0x2b1   :  { %v425_v38 = vpop.xlane.xlu1 %424 }
 0x2b2   :  { %1544 = vrcp.f32 %v425_v38  ;;  %v446_v40 = vpack.c.bf16 %v438_v16, %v438_v16 }
 0x2b4   :  { %1439 = vmatmul.msk.bf16.vlgmr.msrb.gmra.mxu0 %vm353_vm3, %v446_v40 }
 0x2b8   :  { %v1545_v43 = vpop.eup %1544  ;;  %v643_v42 = vpop.permute.xlu2 %642 }
 0x2b9   :  { %v441_v45 = vmul.f32 %v1545_v43, %v1881_v61 }
 0x2bb   :  { %v449_v46 = vpack.c.bf16 %v441_v45, %v441_v45 }
 0x2bd   :  { %1442 = vmatmul.msk.bf16.vlgmr.msrb.gmra.mxu3 %vm353_vm3, %v449_v46 }
 0x2c0   :  { %v714_v47 = vpop.permute.xlu2 %713 }
 0x2c1   :  { %v719_v48 = vsel %vm125_vm1, %v714_v47, 0 }
 0x2c2   :  { %728 = vmatpush.bf16.xpose.msrb.mxu0 %v719_v48 }
 0x2c4   :  { %1443 = vmatmul.msk.bf16.vlgmr.msra.gmra.mxu0 %vm125_vm1, %v620_v24 }
 0x2c8   :  { %v783_v53 = vpop.permute.xlu2 %782 }
 0x2c9   :  { %v788_v55 = vsel %vm125_vm1, %v783_v53, 0  ;;  %v689_v56 = vpop.permute.xlu1 %688 }
 0x2ca   :  { %797 = vmatpush.bf16.xpose.msrb.mxu3 %v788_v55 }
 0x2cd   :  { %1446 = vmatmul.msk.bf16.vlgmr.msra.gmra.mxu3 %vm125_vm1, %v689_v56 }
 0x2ce   :  { %v410_v58 = vpop.xlane.xlu0 %409 }
 0x2cf   :  { %1546 = vrcp.f32 %v410_v58 }
 0x2d0   :  { %v758_v15 = vpop.permute.xlu2 %757 }
 0x2d1   :  { %v760_v50 = vpop.permute.xlu1 %759 }
 0x2d2   :  { %v765_v12 = vsel %vm125_vm1, %v760_v50, 0 }
 0x2d5   :  { %v1547_v59 = vpop.eup %1546 }
 0x2d6   :  { %v436_v61 = vmul.f32 %v1547_v59, %v1891_v8  ;;  %v419_v62 = vpop.xlane.xlu0 %418 }
 0x2d7   :  { %1548 = vrcp.f32 %v419_v62 }
 0x2d8   :  { %v444_v0 = vpack.c.bf16 %v436_v61, %v436_v61  ;;  %1550 = vrcp.f32 %v422_v36 }
 0x2da   :  { %1437 = vmatmul.msk.bf16.vlgmr.msra.gmra.mxu2 %vm353_vm3, %v444_v0 }
 0x2db   :  { %682 = vmatpush.bf16.xpose.msra.mxu2 %v673_v1 }
 0x2dd   :  { %v1549_v2 = vpop.eup %1548 }
 0x2de   :  { %v439_v3 = vmul.f32 %v1549_v2, %v1899_v28  ;;  %v1551_v6 = vpop.eup %1550 }
 0x2df   :  { %v440_v9 = vmul.f32 %v1551_v6, %v1879_v60  ;;  %v735_v60 = vpop.permute.xlu1 %734 }
 0x2e0   :  { %v447_v5 = vpack.c.bf16 %v439_v3, %v439_v3 }
 0x2e1   :  { %v448_v8 = vpack.c.bf16 %v440_v9, %v440_v9 }
 0x2e2   :  { %1440 = vmatmul.msk.bf16.vlgmr.msrb.gmra.mxu1 %vm353_vm3, %v447_v5 }
 0x2e9   :  { %v666_v11 = vpop.permute.xlu0 %665 }
 0x2ea   :  { %1441 = vmatmul.msk.bf16.vlgmr.msrb.gmra.mxu2 %vm353_vm3, %v448_v8 }
 0x2eb   :  { %774 = vmatpush.bf16.xpose.msrb.mxu2 %v765_v12 }
 0x2f1   :  { %v737_v10 = vpop.permute.xlu0 %736 }
 0x2f2   :  { %v742_v13 = vsel %vm125_vm1, %v737_v10, 0  ;;  %1444 = vmatmul.msk.bf16.vlgmr.msra.gmra.mxu1 %vm125_vm1, %v643_v42 }
 0x2f3   :  { %751 = vmatpush.bf16.xpose.msrb.mxu1 %v742_v13 }
 0x2f9   :  { %v712_v28 = vpop.permute.xlu0 %711 }
 0x2fa   :  { %1445 = vmatmul.msk.bf16.vlgmr.msra.gmra.mxu2 %vm125_vm1, %v666_v11  ;;  %1447 = vmatmul.msk.bf16.vlgmr.msrb.gmra.mxu0 %vm125_vm1, %v712_v28 }
 0x301   :  { %v781_v14 = vpop.permute.xlu0 %780 }
 0x302   :  { %1448 = vmatmul.msk.bf16.vlgmr.msrb.gmra.mxu1 %vm125_vm1, %v735_v60  ;;  %1450 = vmatmul.msk.bf16.vlgmr.msrb.gmra.mxu3 %vm125_vm1, %v781_v14 }
 0x30a   :  { %1449 = vmatmul.msk.bf16.vlgmr.msrb.gmra.mxu2 %vm125_vm1, %v758_v15 }
 0x317   :  { %v1953_v18 = vpop.f32.mrf.mxu1 }
 0x31f   :  { %v1955_v19 = vpop.f32.mrf.mxu3  ;;  %v491_v21 = vpop.f32.mrf.mxu1 }
 0x327   :  { %v470_v22 = vpop.f32.mrf.mxu3 }
 0x32f   :  { %v1957_v23 = vpop.f32.mrf.mxu3 }
 0x331   :  { %v1959_v24 = vpop.f32.mrf.mxu0 }
 0x337   :  { %v533_v27 = vpop.f32.mrf.mxu3 }
 0x339   :  { %v554_v26 = vpop.f32.mrf.mxu0 }
 0x340   :  { %v1961_v31 = vpop.f32.mrf.mxu3 }
 0x341   :  { %v638_v29 = vpop.f32.mrf.mxu0 }
 0x342   :  { %v803_v32 = vmul.f32 0.25, %v638_v29 }
 0x344   :  { %v811_v17 = vadd.f32 %v1811_v34, %v803_v32 }
 0x346   :  { %v819_v33 = vsel %vm353_vm3, %v811_v17, -inf }
 0x347   :  { %820 = vmax.xlane.f32.xlu1 %v819_v33 }
 0x348   :  { %v617_v35 = vpop.f32.mrf.mxu3 }
 0x349   :  { %v640_v16 = vpop.f32.mrf.mxu0 }
 0x350   :  { %v707_v36 = vpop.f32.mrf.mxu3 }
 0x351   :  { %v806_v38 = vmul.f32 0.25, %v707_v36 }
 0x353   :  { %v1966_v40 = vadd.f32 %v1830_v57, %v806_v38 }
 0x355   :  { %v828_v43 = vsel %vm353_vm3, %v1966_v40, -inf }
 0x356   :  { %829 = vmax.xlane.f32.xlu1 %v828_v43 }
 0x358   :  { %v709_v42 = vpop.f32.mrf.mxu3 }
 0x35d   :  { %v1970_v45 = vpop.f32.mrf.mxu2 }
 0x35f   :  { %v1972_v46 = vpop.f32.mrf.mxu1 }
 0x365   :  { %v512_v34 = vpop.f32.mrf.mxu2 }
 0x367   :  { %v575_v47 = vpop.f32.mrf.mxu1 }
 0x36d   :  { %v1974_v48 = vpop.f32.mrf.mxu2 }
 0x36f   :  { %v661_v53 = vpop.f32.mrf.mxu1 }
 0x370   :  { %v804_v55 = vmul.f32 0.25, %v661_v53 }
 0x372   :  { %v812_v56 = vadd.f32 %v1806_v30, %v804_v55 }
 0x374   :  { %v822_v57 = vsel %vm353_vm3, %v812_v56, -inf }
 0x375   :  { %v596_v58 = vpop.f32.mrf.mxu2  ;;  %823 = vmax.xlane.f32.xlu2 %v822_v57 }
 0x377   :  { %v663_v59 = vpop.f32.mrf.mxu1  ;;  %v730_v61 = vpop.f32.mrf.mxu0 }
 0x378   :  { %v807_v62 = vmul.f32 0.25, %v730_v61 }
 0x37a   :  { %v815_v0 = vadd.f32 %v1837_v63, %v807_v62 }
 0x37c   :  { %v831_v1 = vsel %vm353_vm3, %v815_v0, -inf }
 0x37d   :  { %v684_v2 = vpop.f32.mrf.mxu2  ;;  %832 = vmax.xlane.f32.xlu2 %v831_v1 }
 0x37e   :  { %v805_v3 = vmul.f32 0.25, %v684_v2 }
 0x37f   :  { %v732_v5 = vpop.f32.mrf.mxu0  ;;  %v753_v6 = vpop.f32.mrf.mxu1 }
 0x380   :  { %v813_v9 = vadd.f32 %v1796_v25, %v805_v3  ;;  %v808_v50 = vmul.f32 0.25, %v753_v6 }
 0x382   :  { %v825_v30 = vsel %vm353_vm3, %v813_v9, -inf  ;;  %v816_v10 = vadd.f32 %v1820_v44, %v808_v50 }
 0x383   :  { %826 = vmax.xlane.f32.xlu0 %v825_v30 }
 0x384   :  { %v834_v28 = vsel %vm353_vm3, %v816_v10, -inf }
 0x385   :  { %v686_v8 = vpop.f32.mrf.mxu2  ;;  %v799_v11 = vpop.f32.mrf.mxu3 }
 0x386   :  { %v810_v12 = vmul.f32 0.25, %v799_v11 }
 0x387   :  { %v755_v13 = vpop.f32.mrf.mxu1 }
 0x388   :  { %v818_v63 = vadd.f32 %v1844_v4, %v810_v12 }
 0x38a   :  { %v840_v60 = vsel %vm353_vm3, %v818_v63, -inf }
 0x38b   :  { %835 = vmax.xlane.f32.xlu0 %v834_v28  ;;  %841 = vmax.xlane.f32.xlu2 %v840_v60 }
 0x38d   :  { %v776_v14 = vpop.f32.mrf.mxu2  ;;  %v801_v25 = vpop.f32.mrf.mxu3 }
 0x38e   :  { %v809_v15 = vmul.f32 0.25, %v776_v14 }
 0x390   :  { %v1987_v21 = vadd.f32 %v1849_v7, %v809_v15 }
 0x392   :  { %v837_v22 = vsel %vm353_vm3, %v1987_v21, -inf }
 0x393   :  { %838 = vmax.xlane.f32.xlu1 %v837_v22 }
 0x395   :  { %v778_v44 = vpop.f32.mrf.mxu2 }
 0x39f   :  { %936 = vrot.lane.b32.xlu0 %v1718_v39, %s1614_s1 }
 0x3a3   :  { %915 = vrot.lane.b32.xlu2 %v1736_v52, %s1614_s1 }
 0x3a7   :  { %978 = vrot.lane.b32.xlu0 %v1720_v41, %s1614_s1 }
 0x3ac   :  { %957 = vrot.lane.b32.xlu1 %v1702_v20, %s1614_s1 }
 0x3b4   :  { %999 = vrot.lane.b32.xlu1 %v1714_v37, %s1614_s1 }
 0x3ba   :  { %v821_v4 = vpop.xlane.xlu1 %820 }
 0x3bb   :  { %v843_v7 = vsub.f32 %v811_v17, %v821_v4 }
 0x3bd   :  { %v851_v27 = vmul.f32 1.442695, %v843_v7 }
 0x3bf   :  { %1552 = vpow2.f32 %v851_v27 }
 0x3c5   :  { %v2001_v26 = vpop.eup %1552 }
 0x3c6   :  { %v867_v39 = vsel %vm353_vm3, %v2001_v26, 0.0 }
 0x3c9   :  { %v830_v17 = vpop.xlane.xlu1 %829 }
 0x3ca   :  { %v846_v38 = vsub.f32 %v1966_v40, %v830_v17 }
 0x3cc   :  { %v857_v47 = vmul.f32 1.442695, %v846_v38 }
 0x3d1   :  { %868 = vadd.xlane.f32.xlu0 %v867_v39 }
 0x3e8   :  { %v824_v52 = vpop.xlane.xlu2 %823 }
 0x3e9   :  { %v844_v29 = vsub.f32 %v812_v56, %v824_v52 }
 0x3eb   :  { %v853_v32 = vmul.f32 1.442695, %v844_v29 }
 0x3ed   :  { %1554 = vpow2.f32 %v853_v32 }
 0x3f0   :  { %v833_v41 = vpop.xlane.xlu2 %832 }
 0x3f1   :  { %v847_v33 = vsub.f32 %v815_v0, %v833_v41 }
 0x3f3   :  { %v2005_v20 = vpop.eup %1554  ;;  %v859_v35 = vmul.f32 1.442695, %v847_v33 }
 0x3f4   :  { %v870_v37 = vsel %vm353_vm3, %v2005_v20, 0.0 }
 0x3f5   :  { %1556 = vpow2.f32 %v859_v35  ;;  %871 = vadd.xlane.f32.xlu1 %v870_v37 }
 0x3f6   :  { %v827_v16 = vpop.xlane.xlu0 %826 }
 0x3f7   :  { %v845_v36 = vsub.f32 %v813_v9, %v827_v16 }
 0x3f9   :  { %v855_v43 = vmul.f32 1.442695, %v845_v36 }
 0x3fb   :  { %v2010_v42 = vpop.eup %1556  ;;  %1558 = vpow2.f32 %v855_v43 }
 0x3fc   :  { %v879_v34 = vsel %vm353_vm3, %v2010_v42, 0.0  ;;  %1560 = vpow2.f32 %v857_v47 }
 0x3fd   :  { %880 = vadd.xlane.f32.xlu2 %v879_v34 }
 0x3fe   :  { %v842_v53 = vpop.xlane.xlu2 %841  ;;  %v836_v55 = vpop.xlane.xlu0 %835 }
 0x3ff   :  { %v850_v56 = vsub.f32 %v818_v63, %v842_v53  ;;  %v848_v57 = vsub.f32 %v816_v10, %v836_v55 }
 0x401   :  { %v2014_v58 = vpop.eup %1558  ;;  %v865_v59 = vmul.f32 1.442695, %v850_v56  ;;  %v861_v61 = vmul.f32 1.442695, %v848_v57 }
 0x402   :  { %v873_v40 = vsel %vm353_vm3, %v2014_v58, 0.0  ;;  %v1561_v0 = vpop.eup %1560 }
 0x403   :  { %1562 = vpow2.f32 %v865_v59  ;;  %874 = vadd.xlane.f32.xlu1 %v873_v40  ;;  %v876_v6 = vsel %vm353_vm3, %v1561_v0, 0.0 }
 0x404   :  { %1564 = vpow2.f32 %v861_v61 }
 0x406   :  { %v916_v62 = vpop.permute.xlu2 %915  ;;  %v839_v8 = vpop.xlane.xlu1 %838 }
 0x407   :  { %v921_v1 = vsel %vm455_vm2, %v916_v62, 0  ;;  %v849_v60 = vsub.f32 %v1987_v21, %v839_v8 }
 0x408   :  { %930 = vmatpush.bf16.msra.mxu0 %v921_v1 }
 0x409   :  { %v2019_v2 = vpop.eup %1562  ;;  %v863_v14 = vmul.f32 1.442695, %v849_v60 }
 0x40a   :  { %v2021_v3 = vpop.eup %1564  ;;  %v888_v5 = vsel %vm353_vm3, %v2019_v2, 0.0 }
 0x40b   :  { %889 = vadd.xlane.f32.xlu2 %v888_v5  ;;  %877 = vadd.xlane.f32.xlu1 %v876_v6  ;;  %v882_v9 = vsel %vm353_vm3, %v2021_v3, 0.0  ;;  %1566 = vpow2.f32 %v863_v14 }
 0x40c   :  { %883 = vadd.xlane.f32.xlu0 %v882_v9 }
 0x411   :  { %v937_v50 = vpop.permute.xlu0 %936  ;;  %v1567_v15 = vpop.eup %1566 }
 0x412   :  { %v942_v30 = vsel %vm455_vm2, %v937_v50, 0  ;;  %v885_v44 = vsel %vm353_vm3, %v1567_v15, 0.0 }
 0x413   :  { %951 = vmatpush.bf16.msra.mxu1 %v942_v30 }
 0x419   :  { %v979_v11 = vpop.permute.xlu0 %978 }
 0x41a   :  { %v984_v12 = vsel %vm455_vm2, %v979_v11, 0 }
 0x41b   :  { %993 = vmatpush.bf16.msra.mxu3 %v984_v12 }
 0x41e   :  { %v958_v10 = vpop.permute.xlu1 %957 }
 0x41f   :  { %v963_v13 = vsel %vm455_vm2, %v958_v10, 0 }
 0x420   :  { %1041 = vrot.lane.b32.xlu0 %v1730_v49, %s1614_s1  ;;  %972 = vmatpush.bf16.msra.mxu2 %v963_v13 }
 0x423   :  { %1062 = vrot.lane.b32.xlu2 %v1745_v54, %s1614_s1 }
 0x424   :  { %1020 = vrot.lane.b32.xlu1 %v1734_v51, %s1614_s1 }
 0x426   :  { %v1000_v63 = vpop.permute.xlu1 %999 }
 0x427   :  { %v1005_v28 = vsel %vm455_vm2, %v1000_v63, 0 }
 0x428   :  { %1014 = vmatpush.bf16.msrb.mxu0 %v1005_v28 }
 0x444   :  { %v869_v25 = vpop.xlane.xlu0 %868 }
 0x445   :  { %1568 = vrcp.f32 %v869_v25 }
 0x44b   :  { %v1569_v22 = vpop.eup %1568 }
 0x44c   :  { %v899_v49 = vmul.f32 %v1569_v22, %v2001_v26  ;;  %v1473_v22 = vld [vmem:[%s2246_s4] sm:$0xff] }
 0x44e   :  { %v907_v54 = vpack.c.bf16 %v899_v49, %v899_v49  ;;  %886 = vadd.xlane.f32.xlu1 %v885_v44 }
 0x450   :  { %1451 = vmatmul.msk.bf16.vlgmr.msra.gmra.mxu0 %vm353_vm3, %v907_v54 }
 0x468   :  { %v872_v51 = vpop.xlane.xlu1 %871 }
 0x469   :  { %1570 = vrcp.f32 %v872_v51 }
 0x46f   :  { %v1571_v4 = vpop.eup %1570 }
 0x470   :  { %v900_v7 = vmul.f32 %v1571_v4, %v2005_v20  ;;  %v881_v21 = vpop.xlane.xlu2 %880 }
 0x471   :  { %1572 = vrcp.f32 %v881_v21 }
 0x472   :  { %v908_v27 = vpack.c.bf16 %v900_v7, %v900_v7 }
 0x474   :  { %1452 = vmatmul.msk.bf16.vlgmr.msra.gmra.mxu1 %vm353_vm3, %v908_v27 }
 0x476   :  { %v875_v39 = vpop.xlane.xlu1 %874 }
 0x477   :  { %v1573_v52 = vpop.eup %1572  ;;  %1574 = vrcp.f32 %v875_v39 }
 0x478   :  { %v903_v26 = vmul.f32 %v1573_v52, %v2010_v42 }
 0x47a   :  { %v911_v29 = vpack.c.bf16 %v903_v26, %v903_v26 }
 0x47c   :  { %1455 = vmatmul.msk.bf16.vlgmr.msrb.gmra.mxu0 %vm353_vm3, %v911_v29 }
 0x47d   :  { %v1575_v32 = vpop.eup %1574 }
 0x47e   :  { %v901_v41 = vmul.f32 %v1575_v32, %v2014_v58  ;;  %v890_v33 = vpop.xlane.xlu2 %889  ;;  %v878_v35 = vpop.xlane.xlu1 %877 }
 0x47f   :  { %1576 = vrcp.f32 %v878_v35  ;;  %v884_v43 = vpop.xlane.xlu0 %883 }
 0x480   :  { %v909_v37 = vpack.c.bf16 %v901_v41, %v901_v41  ;;  %1578 = vrcp.f32 %v890_v33 }
 0x481   :  { %1580 = vrcp.f32 %v884_v43 }
 0x482   :  { %1453 = vmatmul.msk.bf16.vlgmr.msra.gmra.mxu2 %vm353_vm3, %v909_v37 }
 0x485   :  { %v1577_v20 = vpop.eup %1576 }
 0x486   :  { %v1063_v17 = vpop.permute.xlu2 %1062  ;;  %v902_v16 = vmul.f32 %v1577_v20, %v1561_v0  ;;  %v1579_v42 = vpop.eup %1578 }
 0x487   :  { %v1068_v36 = vsel %vm455_vm2, %v1063_v17, 0  ;;  %v1581_v34 = vpop.eup %1580  ;;  %v906_v55 = vmul.f32 %v1579_v42, %v2019_v2 }
 0x488   :  { %1077 = vmatpush.bf16.msrb.mxu3 %v1068_v36  ;;  %v910_v38 = vpack.c.bf16 %v902_v16, %v902_v16  ;;  %v904_v56 = vmul.f32 %v1581_v34, %v2021_v3  ;;  %v1602_v34 = vld [vmem:[%s2243_s0] sm:$0xff] }
 0x489   :  { %v914_v59 = vpack.c.bf16 %v906_v55, %v906_v55 }
 0x48a   :  { %1454 = vmatmul.msk.bf16.vlgmr.msra.gmra.mxu3 %vm353_vm3, %v910_v38  ;;  %v912_v61 = vpack.c.bf16 %v904_v56, %v904_v56 }
 0x492   :  { %v1042_v47 = vpop.permute.xlu0 %1041 }
 0x493   :  { %v1047_v53 = vsel %vm455_vm2, %v1042_v47, 0 }
 0x494   :  { %1056 = vmatpush.bf16.msrb.mxu2 %v1047_v53 }
 0x496   :  { %v1021_v57 = vpop.permute.xlu1 %1020 }
 0x497   :  { %v1026_v58 = vsel %vm455_vm2, %v1021_v57, 0 }
 0x498   :  { %1035 = vmatpush.bf16.msrb.mxu1 %v1026_v58 }
 0x49a   :  { %1458 = vmatmul.msk.bf16.vlgmr.msrb.gmra.mxu3 %vm353_vm3, %v914_v59 }
 0x49b   :  { %1456 = vmatmul.msk.bf16.vlgmr.msrb.gmra.mxu1 %vm353_vm3, %v912_v61  ;;  %v1604_v61 = vld [vmem:[%s2243_s0 + $0x10] sm:$0xff] }
 0x4c1   :  { %v887_v40 = vpop.xlane.xlu1 %886 }
 0x4c2   :  { %1582 = vrcp.f32 %v887_v40 }
 0x4c8   :  { %v1583_v62 = vpop.eup %1582 }
 0x4c9   :  { %v905_v0 = vmul.f32 %v1583_v62, %v1567_v15  ;;  %v1474_v15 = vld [vmem:[%s2246_s4 + $0x8] sm:$0xff] }
 0x4ca   :  { %1165 = vmatpush.bf16.msra.mxu0 %v1474_v15 }
 0x4cb   :  { %v913_v1 = vpack.c.bf16 %v905_v0, %v905_v0 }
 0x4cd   :  { %v932_v5 = vpop.f32.mrf.mxu0  ;;  %1457 = vmatmul.msk.bf16.vlgmr.msrb.gmra.mxu2 %vm353_vm3, %v913_v1 }
 0x4ce   :  { %1166 = vmatpush.bf16.msra.mxu0 %v1473_v22 }
 0x4d5   :  { %v934_v2 = vpop.f32.mrf.mxu0 }
 0x4f1   :  { %v953_v3 = vpop.f32.mrf.mxu1 }
 0x4f2   :  { %v1488_v6 = vpack.i.bf16 %v953_v3, %v932_v5  ;;  %v1605_v5 = vld [vmem:[%s2243_s0 + $0x18] sm:$0xff] }
 0x4f4   :  { %1489 = vrot.lane.b32.xlu0 %v1488_v6, %s1615_s22 }
 0x4f9   :  { %v955_v9 = vpop.f32.mrf.mxu1  ;;  %v1016_v50 = vpop.f32.mrf.mxu0 }
 0x501   :  { %v1018_v30 = vpop.f32.mrf.mxu0 }
 0x505   :  { %v974_v8 = vpop.f32.mrf.mxu2 }
 0x50d   :  { %v976_v11 = vpop.f32.mrf.mxu2  ;;  %v995_v12 = vpop.f32.mrf.mxu3 }
 0x50e   :  { %v1493_v10 = vpack.i.bf16 %v995_v12, %v974_v8 }
 0x510   :  { %1494 = vrot.lane.b32.xlu2 %v1493_v10, %s1615_s22  ;;  %v1607_v10 = vld [vmem:[%s2243_s0 + $0x28] sm:$0xff] }
 0x515   :  { %v997_v13 = vpop.f32.mrf.mxu3 }
 0x518   :  { %v1037_v63 = vpop.f32.mrf.mxu1 }
 0x519   :  { %v1498_v28 = vpack.i.bf16 %v1037_v63, %v1016_v50  ;;  %v1606_v50 = vld [vmem:[%s2243_s0 + $0x20] sm:$0xff] }
 0x51b   :  { %1499 = vrot.lane.b32.xlu0 %v1498_v28, %s1615_s22  ;;  %v1616_v28 = vmov 32.0  }
 0x51c   :  { %1584 = vrcp.f32 %v1616_v28 }
 0x51d   :  { %v1079_v60 = vpop.f32.mrf.mxu3 }
 0x520   :  { %v1039_v14 = vpop.f32.mrf.mxu1 }
 0x522   :  { %v1585_v22 = vpop.eup %1584 }
 0x523   :  { %vm1225_vm4 = vweird.f32 %v1585_v22 }
 0x525   :  { %v1081_v25 = vpop.f32.mrf.mxu3 }
 0x526   :  { %v1608_v25 = vld [vmem:[%s2243_s0 + $0x30] sm:$0xff] }
 0x550   :  { %v1058_v49 = vpop.f32.mrf.mxu2 }
 0x551   :  { %v1503_v44 = vpack.i.bf16 %v1079_v60, %v1058_v49 }
 0x553   :  { %1504 = vrot.lane.b32.xlu1 %v1503_v44, %s1615_s22 }
 0x558   :  { %v1060_v54 = vpop.f32.mrf.mxu2 }
 0x559   :  { %v1221_v54 = vmul.f32 32.0, %v1585_v22 }
 0x566   :  { %v1490_v51 = vpop.permute.xlu0 %1489 }
 0x567   :  { %v1492_v4 = vunpack.i.h.bf16 %v1490_v51  ;;  %v1491_v7 = vunpack.i.l.bf16 %v1490_v51 }
 0x569   :  { %v1116_v21 = vsel %vm125_vm1, %v1953_v18, %v1492_v4  ;;  %v1115_v27 = vsel %vm125_vm1, %v1955_v19, %v1491_v7  ;;  %v1609_v4 = vld [vmem:[%s2243_s0 + $0x38] sm:$0xff] }
 0x56a   :  { %v1127_v39 = vpack.c.bf16 %v1116_v21, %v1115_v27  ;;  %v1495_v52 = vpop.permute.xlu2 %1494  ;;  %v1222_v21 = vsub.f32 1.0, %v1221_v54 }
 0x56b   :  { %v1497_v26 = vunpack.i.h.bf16 %v1495_v52  ;;  %v1496_v29 = vunpack.i.l.bf16 %v1495_v52 }
 0x56c   :  { %1467 = vmatmul.msk.bf16.vlgmr.msra.gmra.mxu0 %vm62_vm0, %v1127_v39  ;;  %v1223_v39 = vmul.f32 %v1585_v22, %v1222_v21 }
 0x56d   :  { %v1117_v32 = vsel %vm125_vm1, %v1970_v45, %v1496_v29  ;;  %v1118_v41 = vsel %vm125_vm1, %v1957_v23, %v1497_v26 }
 0x56e   :  { %v1128_v33 = vpack.c.bf16 %v1118_v41, %v1117_v32  ;;  %v1224_v52 = vadd.f32 %v1585_v22, %v1223_v39 }
 0x570   :  { %v2118_v26 = vsel %vm1225_vm4, %v1585_v22, %v1224_v52 }
 0x57c   :  { %1468 = vmatmul.msk.bf16.gmra.mxu0 %vm62_vm0, %v1128_v33 }
 0x58d   :  { %v1500_v35 = vpop.permute.xlu0 %1499 }
 0x58e   :  { %v1502_v18 = vunpack.i.h.bf16 %v1500_v35  ;;  %v1501_v37 = vunpack.i.l.bf16 %v1500_v35 }
 0x590   :  { %v1119_v19 = vsel %vm125_vm1, %v1959_v24, %v1501_v37  ;;  %v1120_v20 = vsel %vm125_vm1, %v1972_v46, %v1502_v18  ;;  %v1517_v24 = vld [vmem:[%s2247_s5] ss:$0 sm:$0xff] }
 0x591   :  { %v1129_v17 = vpack.c.bf16 %v1120_v20, %v1119_v19 }
 0x593   :  { %1469 = vmatmul.msk.bf16.gmra.mxu0 %vm62_vm0, %v1129_v17 }
 0x5c5   :  { %v1505_v16 = vpop.permute.xlu1 %1504 }
 0x5c6   :  { %v1507_v45 = vunpack.i.h.bf16 %v1505_v16  ;;  %v1506_v36 = vunpack.i.l.bf16 %v1505_v16 }
 0x5c8   :  { %v1121_v23 = vsel %vm125_vm1, %v1974_v48, %v1506_v36  ;;  %v1122_v38 = vsel %vm125_vm1, %v1961_v31, %v1507_v45  ;;  %v1603_v31 = vld [vmem:[%s2243_s0 + $0x8] sm:$0xff] }
 0x5c9   :  { %v1130_v43 = vpack.c.bf16 %v1122_v38, %v1121_v23 }
 0x5cb   :  { %1470 = vmatmul.msk.bf16.gmra.mxu0 %vm62_vm0, %v1130_v43 }
 0x5e9   :  { %v1168_v46 = vpop.f32.mrf.mxu0 }
 0x5ea   :  { %v1169_v42 = vadd.f32 %v1517_v24, %v1168_v46 }
 0x5ec   :  { %v1188_v47 = vadd.f32 %v1602_v34, %v1169_v42 }
 0x5ee   :  { %v1196_v53 = vsel %vm62_vm0, %v1188_v47, 0.0 }
 0x5ef   :  { %1197 = vadd.xlane.f32.xlu2 %v1196_v53 }
 0x5f1   :  { %v1170_v48 = vpop.f32.mrf.mxu0 }
 0x5f2   :  { %v1171_v55 = vadd.f32 %v1517_v24, %v1170_v48 }
 0x5f4   :  { %v1189_v56 = vadd.f32 %v1603_v31, %v1171_v55 }
 0x5f6   :  { %v1199_v57 = vsel %vm62_vm0, %v1189_v56, 0.0 }
 0x5f7   :  { %1200 = vadd.xlane.f32.xlu0 %v1199_v57 }
 0x5f9   :  { %v1173_v58 = vpop.f32.mrf.mxu0 }
 0x5fa   :  { %v1174_v59 = vadd.f32 %v1517_v24, %v1173_v58 }
 0x5fc   :  { %v1190_v40 = vadd.f32 %v1604_v61, %v1174_v59 }
 0x5fe   :  { %v1202_v62 = vsel %vm62_vm0, %v1190_v40, 0.0 }
 0x5ff   :  { %1203 = vadd.xlane.f32.xlu1 %v1202_v62 }
 0x601   :  { %v1175_v0 = vpop.f32.mrf.mxu0 }
 0x602   :  { %v1176_v1 = vadd.f32 %v1517_v24, %v1175_v0 }
 0x604   :  { %v1191_v2 = vadd.f32 %v1605_v5, %v1176_v1 }
 0x606   :  { %v1205_v3 = vsel %vm62_vm0, %v1191_v2, 0.0 }
 0x607   :  { %1206 = vadd.xlane.f32.xlu2 %v1205_v3 }
 0x610   :  { %v1178_v6 = vpop.f32.mrf.mxu0 }
 0x611   :  { %v1179_v9 = vadd.f32 %v1517_v24, %v1178_v6 }
 0x613   :  { %v1192_v30 = vadd.f32 %v1606_v50, %v1179_v9 }
 0x615   :  { %v1208_v8 = vsel %vm62_vm0, %v1192_v30, 0.0 }
 0x616   :  { %1209 = vadd.xlane.f32.xlu0 %v1208_v8 }
 0x618   :  { %v1180_v11 = vpop.f32.mrf.mxu0 }
 0x619   :  { %v1181_v12 = vadd.f32 %v1517_v24, %v1180_v11 }
 0x61b   :  { %v1193_v13 = vadd.f32 %v1607_v10, %v1181_v12 }
 0x61d   :  { %v1211_v63 = vsel %vm62_vm0, %v1193_v13, 0.0 }
 0x61e   :  { %1212 = vadd.xlane.f32.xlu2 %v1211_v63 }
 0x648   :  { %v1183_v60 = vpop.f32.mrf.mxu0 }
 0x649   :  { %v1184_v14 = vadd.f32 %v1517_v24, %v1183_v60 }
 0x64b   :  { %v1194_v15 = vadd.f32 %v1608_v25, %v1184_v14 }
 0x64d   :  { %v1214_v49 = vsel %vm62_vm0, %v1194_v15, 0.0 }
 0x64e   :  { %1215 = vadd.xlane.f32.xlu0 %v1214_v49 }
 0x650   :  { %v1185_v44 = vpop.f32.mrf.mxu0 }
 0x651   :  { %v1186_v51 = vadd.f32 %v1517_v24, %v1185_v44 }
 0x653   :  { %v1195_v7 = vadd.f32 %v1609_v4, %v1186_v51  ;;  %v2174_v4 = vld [vmem:[%s2248_s6] ss:$0 sm:$0xff] }
 0x655   :  { %v1217_v27 = vsel %vm62_vm0, %v1195_v7, 0.0 }
 0x656   :  { %1218 = vadd.xlane.f32.xlu2 %v1217_v27  ;;  %v2179_v27 = vld [vmem:[%s2249_s7] ss:$0 sm:$0xff] }
 0x662   :  { %v1198_v29 = vpop.xlane.xlu2 %1197 }
 0x663   :  { %v1227_v32 = vmul.f32 %v2118_v26, %v1198_v29 }
 0x665   :  { %v2121_v41 = vsub.f32 %v1188_v47, %v1227_v32 }
 0x667   :  { %v1243_v33 = vmul.f32 %v2121_v41, %v2121_v41 }
 0x669   :  { %v1251_v35 = vsel %vm62_vm0, %v1243_v33, 0.0 }
 0x66a   :  { %v1201_v18 = vpop.xlane.xlu0 %1200  ;;  %1252 = vadd.xlane.f32.xlu0 %v1251_v35 }
 0x66b   :  { %v1228_v37 = vmul.f32 %v2118_v26, %v1201_v18 }
 0x66d   :  { %v2127_v19 = vsub.f32 %v1189_v56, %v1228_v37 }
 0x66f   :  { %v1244_v20 = vmul.f32 %v2127_v19, %v2127_v19 }
 0x671   :  { %v1254_v17 = vsel %vm62_vm0, %v1244_v20, 0.0 }
 0x672   :  { %v1204_v16 = vpop.xlane.xlu1 %1203  ;;  %1255 = vadd.xlane.f32.xlu2 %v1254_v17 }
 0x673   :  { %v1229_v45 = vmul.f32 %v2118_v26, %v1204_v16 }
 0x675   :  { %v2133_v36 = vsub.f32 %v1190_v40, %v1229_v45 }
 0x677   :  { %v1245_v23 = vmul.f32 %v2133_v36, %v2133_v36 }
 0x679   :  { %v1257_v38 = vsel %vm62_vm0, %v1245_v23, 0.0 }
 0x67a   :  { %1258 = vadd.xlane.f32.xlu1 %v1257_v38  ;;  %v1207_v43 = vpop.xlane.xlu2 %1206 }
 0x67b   :  { %v1230_v24 = vmul.f32 %v2118_v26, %v1207_v43 }
 0x67d   :  { %v2139_v46 = vsub.f32 %v1191_v2, %v1230_v24 }
 0x67f   :  { %v1246_v42 = vmul.f32 %v2139_v46, %v2139_v46 }
 0x681   :  { %v1260_v34 = vsel %vm62_vm0, %v1246_v42, 0.0 }
 0x682   :  { %1261 = vadd.xlane.f32.xlu0 %v1260_v34 }
 0x689   :  { %v1210_v47 = vpop.xlane.xlu0 %1209 }
 0x68a   :  { %v1231_v53 = vmul.f32 %v2118_v26, %v1210_v47 }
 0x68c   :  { %v2145_v48 = vsub.f32 %v1192_v30, %v1231_v53 }
 0x68e   :  { %v1247_v55 = vmul.f32 %v2145_v48, %v2145_v48 }
 0x690   :  { %v1263_v31 = vsel %vm62_vm0, %v1247_v55, 0.0 }
 0x691   :  { %1264 = vadd.xlane.f32.xlu2 %v1263_v31  ;;  %v1213_v56 = vpop.xlane.xlu2 %1212 }
 0x692   :  { %v1232_v57 = vmul.f32 %v2118_v26, %v1213_v56 }
 0x694   :  { %v2151_v58 = vsub.f32 %v1193_v13, %v1232_v57 }
 0x696   :  { %v1248_v59 = vmul.f32 %v2151_v58, %v2151_v58 }
 0x698   :  { %v1266_v61 = vsel %vm62_vm0, %v1248_v59, 0.0 }
 0x699   :  { %1267 = vadd.xlane.f32.xlu1 %v1266_v61 }
 0x6c1   :  { %v1216_v40 = vpop.xlane.xlu0 %1215 }
 0x6c2   :  { %v1233_v62 = vmul.f32 %v2118_v26, %v1216_v40 }
 0x6c4   :  { %v2157_v0 = vsub.f32 %v1194_v15, %v1233_v62 }
 0x6c6   :  { %v1249_v1 = vmul.f32 %v2157_v0, %v2157_v0 }
 0x6c8   :  { %v1269_v5 = vsel %vm62_vm0, %v1249_v1, 0.0 }
 0x6c9   :  { %1270 = vadd.xlane.f32.xlu0 %v1269_v5  ;;  %v1219_v2 = vpop.xlane.xlu2 %1218 }
 0x6ca   :  { %v1234_v3 = vmul.f32 %v2118_v26, %v1219_v2 }
 0x6cc   :  { %v2163_v6 = vsub.f32 %v1195_v7, %v1234_v3 }
 0x6ce   :  { %v1250_v9 = vmul.f32 %v2163_v6, %v2163_v6 }
 0x6d0   :  { %v1272_v50 = vsel %vm62_vm0, %v1250_v9, 0.0 }
 0x6d1   :  { %1273 = vadd.xlane.f32.xlu2 %v1272_v50 }
 0x6dd   :  { %v1253_v30 = vpop.xlane.xlu0 %1252 }
 0x6de   :  { %v1275_v8 = vmul.f32 %v1253_v30, %v2118_v26 }
 0x6e0   :  { %v1283_v11 = vadd.f32 1e-12, %v1275_v8 }
 0x6e2   :  { %1586 = vrsqrt.f32 %v1283_v11  ;;  %vm1297_vm6 = vweird.f32 %v1283_v11 }
 0x6e5   :  { %v1256_v12 = vpop.xlane.xlu2 %1255 }
 0x6e6   :  { %v1276_v10 = vmul.f32 %v1256_v12, %v2118_v26 }
 0x6e8   :  { %v1587_v13 = vpop.eup %1586  ;;  %v1284_v63 = vadd.f32 1e-12, %v1276_v10 }
 0x6e9   :  { %v1292_v28 = vmul.f32 %v1587_v13, %v1283_v11  ;;  %vm1298_vm5 = vweird.f32 %v1587_v13 }
 0x6ea   :  { %1588 = vrsqrt.f32 %v1284_v63  ;;  %vm1299_vm7 = vmor %vm1297_vm6, %vm1298_vm5  ;;  %vm1307_vm9 = vweird.f32 %v1284_v63 }
 0x6eb   :  { %v1293_v60 = vmul.f32 %v1587_v13, %v1292_v28 }
 0x6ed   :  { %v1294_v14 = vmul.f32 0.5, %v1293_v60  ;;  %v1259_v25 = vpop.xlane.xlu1 %1258 }
 0x6ee   :  { %v1277_v15 = vmul.f32 %v1259_v25, %v2118_v26 }
 0x6ef   :  { %v1295_v22 = vsub.f32 1.5, %v1294_v14 }
 0x6f0   :  { %v1589_v49 = vpop.eup %1588  ;;  %v1285_v44 = vadd.f32 1e-12, %v1277_v15 }
 0x6f1   :  { %v1296_v54 = vmul.f32 %v1587_v13, %v1295_v22  ;;  %v1302_v51 = vmul.f32 %v1589_v49, %v1284_v63  ;;  %vm1308_vm8 = vweird.f32 %v1589_v49 }
 0x6f2   :  { %1590 = vrsqrt.f32 %v1285_v44  ;;  %vm1309_vm10 = vmor %vm1307_vm9, %vm1308_vm8  ;;  %vm1317_vm12 = vweird.f32 %v1285_v44 }
 0x6f3   :  { %v1300_v7 = vsel %vm1299_vm7, %v1587_v13, %v1296_v54  ;;  %v1303_v21 = vmul.f32 %v1589_v49, %v1302_v51 }
 0x6f4   :  { %v1371_v39 = vmul.f32 %v1300_v7, %v2121_v41 }
 0x6f5   :  { %v1304_v52 = vmul.f32 0.5, %v1303_v21  ;;  %v1262_v29 = vpop.xlane.xlu0 %1261 }
 0x6f6   :  { %v1383_v32 = vmul.f32 %v2174_v4, %v1371_v39  ;;  %v1278_v33 = vmul.f32 %v1262_v29, %v2118_v26 }
 0x6f7   :  { %v1305_v35 = vsub.f32 1.5, %v1304_v52 }
 0x6f8   :  { %v1591_v18 = vpop.eup %1590  ;;  %v1395_v37 = vadd.f32 %v2179_v27, %v1383_v32  ;;  %v1286_v20 = vadd.f32 1e-12, %v1278_v33 }
 0x6f9   :  { %v1306_v17 = vmul.f32 %v1589_v49, %v1305_v35  ;;  %v1312_v16 = vmul.f32 %v1591_v18, %v1285_v44  ;;  %vm1318_vm11 = vweird.f32 %v1591_v18 }
 0x6fa   :  { %1403 = vst.msk [vmem:[%s2250_s8] sm:$0xff] %vm62_vm0, %v1395_v37  ;;  %1592 = vrsqrt.f32 %v1286_v20  ;;  %vm1319_vm13 = vmor %vm1317_vm12, %vm1318_vm11  ;;  %vm1327_vm15 = vweird.f32 %v1286_v20 }
 0x6fb   :  { %v1310_v41 = vsel %vm1309_vm10, %v1589_v49, %v1306_v17  ;;  %v1313_v45 = vmul.f32 %v1591_v18, %v1312_v16 }
 0x6fc   :  { %v1372_v23 = vmul.f32 %v1310_v41, %v2127_v19 }
 0x6fd   :  { %v1314_v38 = vmul.f32 0.5, %v1313_v45 }
 0x6fe   :  { %v1384_v43 = vmul.f32 %v2174_v4, %v1372_v23 }
 0x6ff   :  { %v1315_v24 = vsub.f32 1.5, %v1314_v38 }
 0x700   :  { %v1593_v42 = vpop.eup %1592  ;;  %v1396_v34 = vadd.f32 %v2179_v27, %v1384_v43 }
 0x701   :  { %v1316_v47 = vmul.f32 %v1591_v18, %v1315_v24  ;;  %v1322_v53 = vmul.f32 %v1593_v42, %v1286_v20  ;;  %vm1328_vm14 = vweird.f32 %v1593_v42 }
 0x702   :  { %1404 = vst.msk [vmem:[%s2250_s8 + $0x8] sm:$0xff] %vm62_vm0, %v1396_v34  ;;  %vm1329_vm1 = vmor %vm1327_vm15, %vm1328_vm14 }
 0x703   :  { %v1320_v55 = vsel %vm1319_vm13, %v1591_v18, %v1316_v47  ;;  %v1323_v31 = vmul.f32 %v1593_v42, %v1322_v53 }
 0x704   :  { %v1373_v19 = vmul.f32 %v1320_v55, %v2133_v36  ;;  %v1265_v56 = vpop.xlane.xlu2 %1264 }
 0x705   :  { %v1324_v57 = vmul.f32 0.5, %v1323_v31  ;;  %v1279_v59 = vmul.f32 %v1265_v56, %v2118_v26 }
 0x706   :  { %v1385_v61 = vmul.f32 %v2174_v4, %v1373_v19 }
 0x707   :  { %v1325_v40 = vsub.f32 1.5, %v1324_v57  ;;  %v1287_v62 = vadd.f32 1e-12, %v1279_v59 }
 0x708   :  { %v1397_v1 = vadd.f32 %v2179_v27, %v1385_v61 }
 0x709   :  { %v1326_v5 = vmul.f32 %v1593_v42, %v1325_v40  ;;  %1594 = vrsqrt.f32 %v1287_v62  ;;  %vm1337_vm3 = vweird.f32 %v1287_v62 }
 0x70a   :  { %1405 = vst.msk [vmem:[%s2250_s8 + $0x10] sm:$0xff] %vm62_vm0, %v1397_v1 }
 0x70b   :  { %v1330_v36 = vsel %vm1329_vm1, %v1593_v42, %v1326_v5 }
 0x70c   :  { %v1374_v2 = vmul.f32 %v1330_v36, %v2139_v46  ;;  %v1268_v3 = vpop.xlane.xlu1 %1267 }
 0x70d   :  { %v1280_v9 = vmul.f32 %v1268_v3, %v2118_v26 }
 0x70e   :  { %v1386_v50 = vmul.f32 %v2174_v4, %v1374_v2 }
 0x70f   :  { %v1595_v30 = vpop.eup %1594  ;;  %v1288_v8 = vadd.f32 1e-12, %v1280_v9 }
 0x710   :  { %v1398_v11 = vadd.f32 %v2179_v27, %v1386_v50  ;;  %v1332_v12 = vmul.f32 %v1595_v30, %v1287_v62  ;;  %vm1338_vm2 = vweird.f32 %v1595_v30 }
 0x711   :  { %1596 = vrsqrt.f32 %v1288_v8  ;;  %vm1339_vm4 = vmor %vm1337_vm3, %vm1338_vm2  ;;  %vm1347_vm6 = vweird.f32 %v1288_v8 }
 0x712   :  { %1406 = vst.msk [vmem:[%s2250_s8 + $0x18] sm:$0xff] %vm62_vm0, %v1398_v11  ;;  %v1333_v10 = vmul.f32 %v1595_v30, %v1332_v12 }
 0x714   :  { %v1334_v13 = vmul.f32 0.5, %v1333_v10 }
 0x716   :  { %v1335_v63 = vsub.f32 1.5, %v1334_v13 }
 0x717   :  { %v1597_v46 = vpop.eup %1596 }
 0x718   :  { %v1336_v28 = vmul.f32 %v1595_v30, %v1335_v63  ;;  %v1342_v60 = vmul.f32 %v1597_v46, %v1288_v8  ;;  %vm1348_vm5 = vweird.f32 %v1597_v46 }
 0x719   :  { %vm1349_vm7 = vmor %vm1347_vm6, %vm1348_vm5 }
 0x71a   :  { %v1340_v14 = vsel %vm1339_vm4, %v1595_v30, %v1336_v28  ;;  %v1343_v25 = vmul.f32 %v1597_v46, %v1342_v60 }
 0x71b   :  { %v1375_v15 = vmul.f32 %v1340_v14, %v2145_v48 }
 0x71c   :  { %v1344_v22 = vmul.f32 0.5, %v1343_v25 }
 0x71d   :  { %v1387_v49 = vmul.f32 %v2174_v4, %v1375_v15 }
 0x71e   :  { %v1345_v44 = vsub.f32 1.5, %v1344_v22 }
 0x71f   :  { %v1399_v54 = vadd.f32 %v2179_v27, %v1387_v49 }
 0x720   :  { %v1346_v51 = vmul.f32 %v1597_v46, %v1345_v44 }
 0x721   :  { %1407 = vst.msk [vmem:[%s2250_s8 + $0x20] sm:$0xff] %vm62_vm0, %v1399_v54 }
 0x722   :  { %v1350_v7 = vsel %vm1349_vm7, %v1597_v46, %v1346_v51 }
 0x723   :  { %v1376_v21 = vmul.f32 %v1350_v7, %v2151_v58 }
 0x725   :  { %v1388_v48 = vmul.f32 %v2174_v4, %v1376_v21 }
 0x727   :  { %v1400_v39 = vadd.f32 %v2179_v27, %v1388_v48 }
 0x729   :  { %1408 = vst.msk [vmem:[%s2250_s8 + $0x28] sm:$0xff] %vm62_vm0, %v1400_v39 }
 0x73c   :  { %v1271_v52 = vpop.xlane.xlu0 %1270 }
 0x73d   :  { %v1281_v29 = vmul.f32 %v1271_v52, %v2118_v26 }
 0x73f   :  { %v1289_v32 = vadd.f32 1e-12, %v1281_v29 }
 0x741   :  { %1598 = vrsqrt.f32 %v1289_v32  ;;  %vm1357_vm9 = vweird.f32 %v1289_v32 }
 0x744   :  { %v1274_v33 = vpop.xlane.xlu2 %1273 }
 0x745   :  { %v1282_v35 = vmul.f32 %v1274_v33, %v2118_v26 }
 0x747   :  { %v1599_v18 = vpop.eup %1598  ;;  %v1290_v37 = vadd.f32 1e-12, %v1282_v35 }
 0x748   :  { %v1352_v58 = vmul.f32 %v1599_v18, %v1289_v32  ;;  %vm1358_vm8 = vweird.f32 %v1599_v18 }
 0x749   :  { %1600 = vrsqrt.f32 %v1290_v37  ;;  %vm1359_vm10 = vmor %vm1357_vm9, %vm1358_vm8  ;;  %vm1367_vm12 = vweird.f32 %v1290_v37 }
 0x74a   :  { %v1353_v20 = vmul.f32 %v1599_v18, %v1352_v58 }
 0x74c   :  { %v1354_v17 = vmul.f32 0.5, %v1353_v20 }
 0x74e   :  { %v1355_v16 = vsub.f32 1.5, %v1354_v17 }
 0x74f   :  { %v1601_v41 = vpop.eup %1600 }
 0x750   :  { %v1356_v45 = vmul.f32 %v1599_v18, %v1355_v16  ;;  %v1362_v23 = vmul.f32 %v1601_v41, %v1290_v37  ;;  %vm1368_vm11 = vweird.f32 %v1601_v41 }
 0x751   :  { %vm1369_vm13 = vmor %vm1367_vm12, %vm1368_vm11 }
 0x752   :  { %v1360_v38 = vsel %vm1359_vm10, %v1599_v18, %v1356_v45  ;;  %v1363_v43 = vmul.f32 %v1601_v41, %v1362_v23 }
 0x753   :  { %v1377_v24 = vmul.f32 %v1360_v38, %v2157_v0 }
 0x754   :  { %v1364_v42 = vmul.f32 0.5, %v1363_v43 }
 0x755   :  { %v1389_v26 = vmul.f32 %v2174_v4, %v1377_v24 }
 0x756   :  { %v1365_v34 = vsub.f32 1.5, %v1364_v42 }
 0x757   :  { %v1401_v47 = vadd.f32 %v2179_v27, %v1389_v26 }
 0x758   :  { %v1366_v53 = vmul.f32 %v1601_v41, %v1365_v34 }
 0x759   :  { %1409 = vst.msk [vmem:[%s2250_s8 + $0x30] sm:$0xff] %vm62_vm0, %v1401_v47 }
 0x75a   :  { %v1370_v55 = vsel %vm1369_vm13, %v1601_v41, %v1366_v53 }
 0x75b   :  { %v1378_v31 = vmul.f32 %v1370_v55, %v2163_v6 }
 0x75d   :  { %v1390_v0 = vmul.f32 %v2174_v4, %v1378_v31 }
 0x75f   :  { %v1402_v19 = vadd.f32 %v2179_v27, %v1390_v0 }
 0x761   :  { %1410 = vst.msk [vmem:[%s2250_s8 + $0x38] sm:$0xff] %vm62_vm0, %v1402_v19 }

// kernel: _lambda_.14
= control target key start
LH: loop header
LB: loop body
LE: loop exit
PB: predicated region body
PF: predicated region fallthrough
CT: control target
= control target key end

     0   :  { %vm37_vm0 = vcmask 261120   ;;  %s106_s1 = inlined_call_operand.vmem [shape: bf16[32,128], index: 1, kind: input, shape index: {}]   ;;  %s107_s0 = inlined_call_operand.vmem [shape: f32[8,32], index: 0, kind: input, shape index: {}]   ;;  %s108_s2 = inlined_call_operand.vmem [shape: f32[1,128], index: 2, kind: input, shape index: {}]   ;;  %s109_s3 = inlined_call_operand.vmem [shape: f32[8,128], index: 3, kind: output, shape index: {}]  }
   0x1   :  { %v69_v0 = vld [vmem:[%s106_s1 + $0x8] sm:$0xff]  ;;  %v68_v1 = vld [vmem:[%s106_s1] sm:$0xff] }
   0x2   :  { %47 = vmatpush.bf16.msra.mxu0 %v69_v0  ;;  %v15_v2 = vld [vmem:[%s107_s0] sm:$0xff] }
   0x3   :  { %v20_v3 = vpack.c.bf16 %v15_v2, %v15_v2  ;;  %v70_v4 = vld [vmem:[%s108_s2] ss:$0 sm:$0xff] }
   0x6   :  { %48 = vmatpush.bf16.msra.mxu0 %v68_v1 }
   0x9   :  { %67 = vmatmul.msk.bf16.vlgmr.msra.gmra.mxu0 %vm37_vm0, %v20_v3 }
  0x86   :  { %v50_v5 = vpop.f32.mrf.mxu0 }
  0x87   :  { %v51_v6 = vadd.f32 %v70_v4, %v50_v5 }
  0x89   :  { %54 = vst [vmem:[%s109_s3] sm:$0xff] %v51_v6 }
  0x8e   :  { %v52_v7 = vpop.f32.mrf.mxu0 }

// kernel: _lambda_.15
= control target key start
LH: loop header
LB: loop body
LE: loop exit
PB: predicated region body
PF: predicated region fallthrough
CT: control target
= control target key end

     0   :  { %s524_s15 = smov 0   ;;  %s578_s0 = inlined_call_operand.vmem [shape: f32[4,2,64], index: 0, kind: input, shape index: {}]   ;;  %s579_s1 = inlined_call_operand.vmem [shape: f32[4,2,64], index: 1, kind: input, shape index: {}]   ;;  %s580_s2 = inlined_call_operand.vmem [shape: bf16[16,64], index: 2, kind: input, shape index: {}]   ;;  %s581_s3 = inlined_call_operand.vmem [shape: bf16[16,64], index: 3, kind: input, shape index: {}]   ;;  %s582_s4 = inlined_call_operand.vmem [shape: f32[2,4,2,16], index: 4, kind: output, shape index: {}]  }
   0x1 LB: > { %s530_s16 = sadd.s32 4294967295, %s491_s15   ;;  %p432_p0 = scmp.ge.s32.totalorder %s491_s15, 1  ;;  %s491_s15 = sphi %s524_s15, %s14_s15  }
   0x2   : > { %p169_p1 = scmp.lt.s32.totalorder %s491_s15, 5 }
   0x4   : > { %p170_p2 = pnand %p432_p0, %p169_p1 }
   0x5   : > { %p194_p3 = scmp.lt.s32.totalorder (!%p170_p2), %s530_s16, 3  ;;  %s536_s17 = ssub.s32 (!%p170_p2), 3, %s530_s16 }
   0x6   : > { %173 = sbr.rel (%p170_p2) target bundleno = 599 (0x257), region = 36  ;;  %p199_p4 = scmp.lt.s32.totalorder (!%p170_p2), %s536_s17, 3 }
   0x7   : > { %p435_p5 = scmp.ne.s32.totalorder (!%p170_p2), %s530_s16, 0 }
   0xb   : > { %s195_s18 = scalar_select %p194_p3, %s530_s16, 3 }
   0xc   : > { %s200_s19 = scalar_select %p199_p4, %s536_s17, 3 }
   0xd   : > { %s433_s20 = sshll.u32 %s195_s18, 1  ;;  %208 = sbr.rel (%p435_p5) target bundleno = 23 (0x17), region = 40 }
   0xe   : > { %s197_s23 = scalar_lea.vmem %s578_s0, %s433_s20  ;;  %s434_s24 = sshll.u32 %s200_s19, 1 }
   0xf   : > { %s547_s27 = scalar_lea.vmem %s579_s1, %s434_s24 }
  0x12   : > { %vm209_vm0 = vcmask 123904   ;;  %v493_v0 = vmov 0.0  }
  0x13   : > { %210 = vst.msk [vmem:[#allocation2] sm:$0x3] %vm209_vm0, %v493_v0 }
  0x14   : > { %211 = vst.msk [vmem:[#allocation3] sm:$0x3] %vm209_vm0, %v493_v0 }
  0x15   : > { %212 = vst.msk [vmem:[#allocation4] sm:$0x3] %vm209_vm0, %v493_v0 }
  0x16   : > { %213 = vst.msk [vmem:[#allocation5] sm:$0x3] %vm209_vm0, %v493_v0 }
  0x17 PF: > { %v453_v1 = vld [vmem:[%s580_s2] sm:$0xff]  ;;  %vm225_vm1 = vcmask 130048   ;;  %s494_s6 = smov 16   ;;  %s495_s7 = smov 96   ;;  %vm289_vm10 = vcmask 123904  }
  0x18   : > { %v454_v2 = vld [vmem:[%s581_s3] sm:$0xff]  ;;  %236 = vmatpush.bf16.msra.mxu0 %v453_v1  ;;  %s496_s8 = smov 32   ;;  %s497_s9 = smov 112  }
  0x19   : > { %317 = vmatpush.bf16.msra.mxu1 %v454_v2  ;;  %v214_v9 = vld [vmem:[%s197_s23] sm:$0x3]  ;;  %s498_s10 = smov 80   ;;  %s448_s11 = sshll.u32 %s530_s16, 1 }
  0x1a   : > { %v215_v3 = vld [vmem:[#allocation2] sm:$0x3]  ;;  %s377_s14 = scalar_lea.vmem %s582_s4, %s448_s11  ;;  %s449_s18 = sshll.u32 %s536_s17, 1 }
  0x1b   : > { %v218_v4 = vpack.c.bf16 %v215_v3, %v215_v3  ;;  %v263_v6 = vld [vmem:[#allocation3] sm:$0x3]  ;;  %v296_v13 = vld [vmem:[%s547_s27] sm:$0x3]  ;;  %s410_s21 = scalar_lea.vmem %s582_s4, %s449_s18 }
  0x1c   : > { %v297_v5 = vld [vmem:[#allocation4] sm:$0x3]  ;;  %265 = vrot.lane.b32.xlu1 %v263_v6, %s494_s6 }
  0x1d   : > { %v300_v7 = vpack.c.bf16 %v297_v5, %v297_v5  ;;  %440 = vmatmul.msk.bf16.vlgmr.msra.gmra.mxu0 %vm225_vm1, %v218_v4  ;;  %v344_v8 = vld [vmem:[#allocation5] sm:$0x3] }
  0x1f   : > { %446 = vmatmul.msk.bf16.vlgmr.msra.gmra.mxu1 %vm225_vm1, %v300_v7 }
  0x24   : > { %346 = vrot.lane.b32.xlu1 %v344_v8, %s494_s6 }
  0x8e   : > { %v266_v49 = vpop.permute.xlu1 %265 }
  0x96   : > { %v347_v53 = vpop.permute.xlu1 %346 }
  0x9a   : > { %v238_v10 = vpop.f32.mrf.mxu0 }
  0x9b   : > { %v242_v12 = vadd.f32 %v238_v10, %v214_v9 }
  0x9c   : > { %v319_v11 = vpop.f32.mrf.mxu1 }
  0x9d   : > { %469 = vtanh.f32 %v242_v12  ;;  %v323_v14 = vadd.f32 %v319_v11, %v296_v13  ;;  %v441_v19 = vmul.f32 -1.442695, %v242_v12 }
  0x9f   : > { %471 = vtanh.f32 %v323_v14  ;;  %v447_v20 = vmul.f32 -1.442695, %v323_v14 }
  0xa0   : > { %473 = vpow2.f32 %v441_v19 }
  0xa1   : > { %475 = vpow2.f32 %v447_v20 }
  0xa2   : > { %v240_v15 = vpop.f32.mrf.mxu0 }
  0xa3   : > { %v470_v17 = vpop.eup %469 }
  0xa4   : > { %v321_v16 = vpop.f32.mrf.mxu1  ;;  %270 = vrot.lane.b32.xlu0 %v470_v17, %s495_s7 }
  0xa5   : > { %v472_v18 = vpop.eup %471 }
  0xa6   : > { %v474_v21 = vpop.eup %473 }
  0xa7   : > { %v246_v22 = vadd.f32 1.0, %v474_v21  ;;  %v476_v23 = vpop.eup %475 }
  0xa8   : > { %v327_v24 = vadd.f32 1.0, %v476_v23 }
  0xa9   : > { %477 = vrcp.f32 %v246_v22  ;;  %v258_v33 = vand.u32 2147483648, %v246_v22  ;;  %vm252_vm3 = vweird.f32 %v246_v22  ;;  %v256_v34 = vand.u32 2147483647, %v246_v22 }
  0xaa   : > { %479 = vrcp.f32 %v327_v24  ;;  %vm333_vm6 = vweird.f32 %v327_v24  ;;  %v339_v42 = vand.u32 2147483648, %v327_v24  ;;  %v337_v43 = vand.u32 2147483647, %v327_v24 }
  0xab   : > { %v259_v37 = vor.u32 1.1754944e-38, %v258_v33  ;;  %vm257_vm5 = vcmp.eq.f32.partialorder %v256_v34, 8.507059e+37 }
  0xac   : > { %351 = vrot.lane.b32.xlu0 %v472_v18, %s495_s7  ;;  %v340_v45 = vor.u32 1.1754944e-38, %v339_v42  ;;  %vm338_vm9 = vcmp.eq.f32.partialorder %v337_v43, 8.507059e+37 }
  0xaf   : > { %v478_v25 = vpop.eup %477 }
  0xb0   : > { %v248_v26 = vmul.f32 %v478_v25, %v246_v22  ;;  %v480_v28 = vpop.eup %479  ;;  %vm253_vm2 = vweird.f32 %v478_v25 }
  0xb1   : > { %v329_v30 = vmul.f32 %v480_v28, %v327_v24  ;;  %vm254_vm4 = vmor %vm252_vm3, %vm253_vm2  ;;  %vm334_vm7 = vweird.f32 %v480_v28 }
  0xb2   : > { %v249_v27 = vsub.f32 1.0, %v248_v26  ;;  %vm335_vm8 = vmor %vm333_vm6, %vm334_vm7 }
  0xb3   : > { %v330_v32 = vsub.f32 1.0, %v329_v30 }
  0xb4   : > { %v250_v29 = vmul.f32 %v478_v25, %v249_v27 }
  0xb5   : > { %v331_v36 = vmul.f32 %v480_v28, %v330_v32 }
  0xb6   : > { %v251_v31 = vadd.f32 %v478_v25, %v250_v29 }
  0xb7   : > { %v332_v40 = vadd.f32 %v480_v28, %v331_v36 }
  0xb8   : > { %v255_v35 = vsel %vm254_vm4, %v478_v25, %v251_v31 }
  0xb9   : > { %v260_v38 = vsel %vm257_vm5, %v259_v37, %v255_v35  ;;  %v336_v44 = vsel %vm335_vm8, %v480_v28, %v332_v40 }
  0xba   : > { %v341_v46 = vsel %vm338_vm9, %v340_v45, %v336_v44  ;;  %v268_v50 = vmul.f32 %v266_v49, %v260_v38 }
  0xbb   : > { %v349_v54 = vmul.f32 %v347_v53, %v341_v46 }
 0x116   : > { %v271_v39 = vpop.permute.xlu0 %270 }
 0x117   : > { %v273_v41 = vmul.f32 %v271_v39, %v260_v38 }
 0x119   : > { %275 = vrot.lane.b32.xlu2 %v273_v41, %s494_s6 }
 0x11e   : > { %v352_v47 = vpop.permute.xlu0 %351 }
 0x11f   : > { %v354_v48 = vmul.f32 %v352_v47, %v341_v46 }
 0x121   : > { %356 = vrot.lane.b32.xlu2 %v354_v48, %s494_s6 }
 0x173   : > { %v276_v51 = vpop.permute.xlu2 %275 }
 0x174   : > { %v278_v52 = vadd.f32 %v276_v51, %v268_v50 }
 0x176   : > { %481 = vtanh.f32 %v278_v52 }
 0x17b   : > { %v357_v55 = vpop.permute.xlu2 %356 }
 0x17c   : > { %v482_v56 = vpop.eup %481  ;;  %v359_v57 = vadd.f32 %v357_v55, %v349_v54 }
 0x17d   : > { %281 = vrot.lane.b32.xlu0 %v482_v56, %s496_s8 }
 0x17e   : > { %483 = vtanh.f32 %v359_v57 }
 0x184   : > { %v484_v58 = vpop.eup %483 }
 0x185   : > { %362 = vrot.lane.b32.xlu1 %v484_v58, %s496_s8  ;;  %286 = vrot.lane.b32.xlu0 %v278_v52, %s497_s9 }
 0x18d   : > { %367 = vrot.lane.b32.xlu1 %v359_v57, %s497_s9 }
 0x1ef   : > { %v282_v59 = vpop.permute.xlu0 %281 }
 0x1f0   : > { %v284_v60 = vmul.f32 %v282_v59, %v260_v38 }
 0x1f2   : > { %292 = vrot.lane.b32.xlu2 %v284_v60, %s498_s10 }
 0x1f7   : > { %v363_v61 = vpop.permute.xlu1 %362  ;;  %v287_v62 = vpop.permute.xlu0 %286 }
 0x1f8   : > { %v365_v63 = vmul.f32 %v363_v61, %v341_v46  ;;  %290 = vst.msk [vmem:[#allocation3] sm:$0x3] %vm289_vm10, %v287_v62 }
 0x1fa   : > { %372 = vrot.lane.b32.xlu2 %v365_v63, %s498_s10 }
 0x1ff   : > { %v368_v0 = vpop.permute.xlu1 %367 }
 0x200   : > { %370 = vst.msk [vmem:[#allocation5] sm:$0x3] %vm289_vm10, %v368_v0 }
 0x24c   : > { %v293_v1 = vpop.permute.xlu2 %292 }
 0x24d   : > { %295 = vst.msk [vmem:[#allocation2] sm:$0x3] %vm289_vm10, %v293_v1 }
 0x24e   : > { %378 = vst.msk [vmem:[%s377_s14] sm:$0x3] %vm289_vm10, %v293_v1 }
 0x254   : > { %v373_v2 = vpop.permute.xlu2 %372 }
 0x255   : > { %375 = vst.msk [vmem:[#allocation4] sm:$0x3] %vm289_vm10, %v373_v2 }
 0x256   : > { %450 = vst.msk [vmem:[%s410_s21 + $0x8] sm:$0x3] %vm289_vm10, %v373_v2 }
 0x257 PF: > { %s14_s15 = sadd.s32 1, %s491_s15  }
 0x258   : > { %p11_p6 = scmp.ge.s32.totalorder %s14_s15, 6  }
 0x25a   :  { %13 = sbr.rel (!%p11_p6) target bundleno = 1 (0x1), region = 71 }

</bundles_post_ra>
